<compile_context>
chip_gen: v7x
topology: tpu7x:2x2x1
jax: 0.10.0
libtpu: 0.0.40
codegen_flags: <defaults>
</compile_context>

<pallas_src>
import functools

import jax
import jax.numpy as jnp
from jax import lax
from jax.experimental import pallas as pl
from jax.experimental.pallas import tpu as pltpu

# ----------------------------- architecture ------------------------------- #
C_IN = 3
C1, K1 = 16, 4            # conv1: 3 -> 16, kernel 4x4
P1H, P1W = 4, 3           # maxpool1
C2, K2 = 32, 2            # conv2: 16 -> 32, kernel 2x2
P2H, P2W = 3, 2           # maxpool2
FEAT = 512                # flatten -> (rows, 512)
H1, H2, H3, OUT = 128, 32, 8, 2
C_PAD = 8                 # conv1 input channels zero-padded 3 -> 8 (sublane tile)
BLOCK_B = 8               # samples per grid step (multiple of 8 for the out block)


def _geometry(H, W):
    """Static layout bookkeeping for the flat-lane fused kernel."""
    WS = ((W + 31) // 32) * 32              # padded row stride of the flat input
    OH1, OW1 = H - K1 + 1, W - K1 + 1       # conv1 output
    PH1, PW1 = OH1 // P1H, OW1 // P1W       # pool1 output
    OH2, OW2 = PH1 - K2 + 1, PW1 - K2 + 1   # conv2 output
    PH2, PW2 = OH2 // P2H, OW2 // P2W       # pool2 output

    # lane strides at each stage: lane(row, col) = row * rstride + col * cstride
    r1, c1 = WS, 1                          # conv1 output
    r2, c2 = P1H * WS, P1W                  # pool1 output == conv2 in/out
    r3, c3 = P2H * r2, P2W * c2             # pool2 output

    # minimum lane lengths, derived bottom-up so every shifted slice is in bounds
    f_len = (PH2 - 1) * r3 + (PW2 - 1) * c3 + 1            # pool2 values
    lh2 = f_len + (P2W - 1) * c2                           # pool2 height-maxed
    l2 = lh2 + (P2H - 1) * r2                              # conv2 output
    lp1 = l2 + (K2 - 1) * r2 + (K2 - 1) * c2               # pool1 output
    lh1 = lp1 + (P1W - 1) * c1                             # pool1 height-maxed
    l1 = lh1 + (P1H - 1) * r1                              # conv1 output
    xf = max(l1 + (K1 - 1) * r1 + (K1 - 1) * c1, H * WS)   # flat input length
    return dict(WS=WS, PH2=PH2, PW2=PW2, r2=r2, c2=c2, r3=r3, c3=c3,
                F=f_len, LH2=lh2, L2=l2, LP1=lp1, LH1=lh1, L1=l1, XF=xf)


# ------------------------------ fused kernel ------------------------------ #
def _make_dqn_kernel(g, block_b):
    WS = g["WS"]
    r2, c2 = g["r2"], g["c2"]
    L1, LH1, LP1 = g["L1"], g["LH1"], g["LP1"]
    L2, LH2, F = g["L2"], g["LH2"], g["F"]

    def fill_windows(dst_ref, src, ksz, rstride, cstride, length, rows):
        # pack the ksz*ksz shifted windows along the contraction (sublane) dim
        for s in range(ksz * ksz):
            i, j = divmod(s, ksz)
            off = i * rstride + j * cstride
            dst_ref[s * rows:(s + 1) * rows, :] = src[:, off:off + length]

    def pool_max(v, ph, pw, rstride, cstride, len_h, len_w):
        # unrolled chain of maxima over shifted slices (pure VPU)
        hv = v[:, 0:len_h]
        for dh in range(1, ph):
            o = dh * rstride
            hv = jnp.maximum(hv, v[:, o:o + len_h])
        wv = hv[:, 0:len_w]
        for dw in range(1, pw):
            o = dw * cstride
            wv = jnp.maximum(wv, hv[:, o:o + len_w])
        return wv

    def kernel(x_ref, w1c, b1c, w2c, b2c, sel, rep, cmask,
               w1m, b1m, w2m, b2m, w3m, b3m, w4m, b4m,
               o_ref, xw1_ref, xw2_ref):
        # hoisted, loop-invariant iota used to place each sample's feature row
        row_ids = lax.broadcasted_iota(jnp.int32, (block_b, FEAT), 0)

        def sample_body(b, feat):
            x = x_ref[b]                                            # (C_PAD, XF)

            # conv1: one folded-K MXU dot  (16, 128) @ (128, L1)
            fill_windows(xw1_ref, x, K1, WS, 1, L1, C_PAD)
            a1 = jnp.dot(w1c[...], xw1_ref[...],
                         preferred_element_type=jnp.float32) + b1c[...]
            # maxpool1: valid values move to lanes row*r2 + col*c2
            p1 = pool_max(a1, P1H, P1W, WS, 1, LH1, LP1)            # (16, LP1)

            # conv2: one folded-K MXU dot  (32, 64) @ (64, L2)
            fill_windows(xw2_ref, p1, K2, r2, c2, L2, C1)
            a2 = jnp.dot(w2c[...], xw2_ref[...],
                         preferred_element_type=jnp.float32) + b2c[...]
            # maxpool2: valid values at lanes row*r3 + col*c3
            p2 = pool_max(a2, P2H, P2W, r2, c2, LH2, F)             # (32, F)

            # compact the 16 valid lanes per channel (MXU lane gather), then
            # build the lane-dense torch-flatten (1, 512) row without reshape:
            #   wide[c, x] = q[c, x % 16];  row[x] = wide[x // 16, x]
            q = jnp.dot(p2, sel[...],
                        preferred_element_type=jnp.float32)         # (32, 16)
            wide = jnp.dot(q, rep[...],
                           preferred_element_type=jnp.float32)      # (32, 512)
            row = jnp.sum(wide * cmask[...], axis=0, keepdims=True)  # (1, 512)

            # place the row at sample slot b of the block's feature tile
            return jnp.where(row_ids == b, row, feat)

        feat = lax.fori_loop(0, block_b, sample_body,
                             jnp.zeros((block_b, FEAT), jnp.float32))

        # batched 4-layer MLP + softmax, once per block (M = block_b)
        h = jnp.maximum(
            jnp.dot(feat, w1m[...], preferred_element_type=jnp.float32) + b1m[...], 0.0)
        h = jnp.maximum(
            jnp.dot(h, w2m[...], preferred_element_type=jnp.float32) + b2m[...], 0.0)
        h = jnp.maximum(
            jnp.dot(h, w3m[...], preferred_element_type=jnp.float32) + b3m[...], 0.0)
        logits = jnp.dot(h, w4m[...], preferred_element_type=jnp.float32) + b4m[...]

        m = jnp.max(logits, axis=-1, keepdims=True)
        e = jnp.exp(logits - m)
        o_ref[...] = e / jnp.sum(e, axis=-1, keepdims=True)

    return kernel


# ------------------------------ forward pass ------------------------------ #
def dqn_forward(prepped, x, block_b=BLOCK_B):
    N, C, H, W = x.shape
    if C != C_IN:
        raise ValueError("expected 3 input channels")
    g = _geometry(H, W)
    if C2 * g["PH2"] * g["PW2"] != FEAT:
        raise ValueError("input spatial size incompatible with the 512-feature head")
    if block_b % 8 != 0:
        raise ValueError("block_b must be a multiple of 8")

    WS = g["WS"]
    # One-time boundary layout conversion: pad channels 3->8 and width W->WS
    # with zeros, flatten rows into a single lane axis, pad lanes to XF.
    xp = jnp.pad(x, ((0, 0), (0, C_PAD - C), (0, 0), (0, WS - W)))
    x_flat = xp.reshape(N, C_PAD, H * WS)
    if g["XF"] > H * WS:
        x_flat = jnp.pad(x_flat, ((0, 0), (0, 0), (0, g["XF"] - H * WS)))
    # pad the batch to a multiple of block_b (tail sliced off after the call)
    n_pad = (-N) % block_b
    if n_pad:
        x_flat = jnp.pad(x_flat, ((0, n_pad), (0, 0), (0, 0)))
    n_tot = N + n_pad

    # constant 0/1 matrices (constant-folded by XLA under jit)
    nkeep = g["PH2"] * g["PW2"]                                   # 16
    k_idx = jnp.arange(nkeep, dtype=jnp.int32)
    target = (k_idx // g["PW2"]) * g["r3"] + (k_idx % g["PW2"]) * g["c3"]
    lanes = jnp.arange(g["F"], dtype=jnp.int32)[:, None]
    sel = (lanes == target[None, :]).astype(jnp.float32)          # (F, 16)
    xcols = jnp.arange(FEAT, dtype=jnp.int32)
    rep = (k_idx[:, None] == (xcols[None, :] % nkeep)).astype(jnp.float32)     # (16, 512)
    chans = jnp.arange(C2, dtype=jnp.int32)
    cmask = (chans[:, None] == (xcols[None, :] // nkeep)).astype(jnp.float32)  # (32, 512)

    weights = (prepped["w1c"], prepped["b1c"], prepped["w2c"], prepped["b2c"],
               sel, rep, cmask,
               prepped["w1m"], prepped["b1m"], prepped["w2m"], prepped["b2m"],
               prepped["w3m"], prepped["b3m"], prepped["w4m"], prepped["b4m"])

    def resident(a):  # full-array block, constant index -> stays VMEM-resident
        nd = a.ndim
        return pl.BlockSpec(a.shape, lambda n, _nd=nd: (0,) * _nd)

    out = pl.pallas_call(
        _make_dqn_kernel(g, block_b),
        out_shape=jax.ShapeDtypeStruct((n_tot, OUT), jnp.float32),
        grid=(n_tot // block_b,),
        in_specs=[pl.BlockSpec((block_b, C_PAD, g["XF"]), lambda n: (n, 0, 0))]
                 + [resident(a) for a in weights],
        out_specs=pl.BlockSpec((block_b, OUT), lambda n: (n, 0)),
        scratch_shapes=[pltpu.VMEM((K1 * K1 * C_PAD, g["L1"]), jnp.float32),
                        pltpu.VMEM((K2 * K2 * C1, g["L2"]), jnp.float32)],
        compiler_params=pltpu.CompilerParams(dimension_semantics=("parallel",)),
    )(x_flat, *weights)
    return out[:N]


# ----------------------------- params handling ----------------------------- #
def init_params(key):
    def u(k, shape, fan_in):
        bound = 1.0 / float(fan_in) ** 0.5
        return jax.random.uniform(k, shape, jnp.float32, -bound, bound)

    ks = jax.random.split(key, 16)
    return {
        "conv1_w": u(ks[0], (C1, C_IN, K1, K1), C_IN * K1 * K1),
        "conv1_b": u(ks[1], (C1,), C_IN * K1 * K1),
        "conv2_w": u(ks[2], (C2, C1, K2, K2), C1 * K2 * K2),
        "conv2_b": u(ks[3], (C2,), C1 * K2 * K2),
        "lin1_w": u(ks[4], (H1, FEAT), FEAT),
        "lin1_b": u(ks[5], (H1,), FEAT),
        "lin2_w": u(ks[6], (H2, H1), H1),
        "lin2_b": u(ks[7], (H2,), H1),
        "lin3_w": u(ks[8], (H3, H2), H2),
        "lin3_b": u(ks[9], (H3,), H2),
        "lin4_w": u(ks[10], (OUT, H3), H3),
        "lin4_b": u(ks[11], (OUT,), H3),
    }


def prepare_params(p):
    """One-time weight relayout (at init, not per forward step)."""
    # conv weights folded along the contraction dim in (window, in-channel) order,
    # matching the im2col packing order used inside the kernel.
    w1 = jnp.transpose(p["conv1_w"], (0, 2, 3, 1))               # (16, 4, 4, 3)
    w1 = jnp.pad(w1, ((0, 0), (0, 0), (0, 0), (0, C_PAD - C_IN)))
    w1c = w1.reshape(C1, K1 * K1 * C_PAD)                        # (16, 128)
    w2 = jnp.transpose(p["conv2_w"], (0, 2, 3, 1))               # (32, 2, 2, 16)
    w2c = w2.reshape(C2, K2 * K2 * C1)                           # (32, 64)
    return {
        "w1c": w1c,
        "b1c": p["conv1_b"].reshape(C1, 1),
        "w2c": w2c,
        "b2c": p["conv2_b"].reshape(C2, 1),
        "w1m": p["lin1_w"].T,                                    # (512, 128)
        "b1m": p["lin1_b"].reshape(1, H1),
        "w2m": p["lin2_w"].T,                                    # (128, 32)
        "b2m": p["lin2_b"].reshape(1, H2),
        "w3m": p["lin3_w"].T,                                    # (32, 8)
        "b3m": p["lin3_b"].reshape(1, H3),
        "w4m": p["lin4_w"].T,                                    # (8, 2)
        "b4m": p["lin4_b"].reshape(1, OUT),
    }


# ------------------------- pure-JAX reference model ------------------------ #
def dqn_reference(p, x):
    hi = lax.Precision.HIGHEST
    y = lax.conv_general_dilated(x, p["conv1_w"], (1, 1), "VALID",
                                 dimension_numbers=("NCHW", "OIHW", "NCHW"),
                                 precision=hi)
    y = y + p["conv1_b"][None, :, None, None]
    y = lax.reduce_window(y, -jnp.inf, lax.max, (1, 1, P1H, P1W),
                          (1, 1, P1H, P1W), "VALID")
    y = lax.conv_general_dilated(y, p["conv2_w"], (1, 1), "VALID",
                                 dimension_numbers=("NCHW", "OIHW", "NCHW"),
                                 precision=hi)
    y = y + p["conv2_b"][None, :, None, None]
    y = lax.reduce_window(y, -jnp.inf, lax.max, (1, 1, P2H, P2W),
                          (1, 1, P2H, P2W), "VALID")
    feat = y.reshape(-1).reshape(-1, FEAT)
    h = jax.nn.relu(jnp.dot(feat, p["lin1_w"].T, precision=hi) + p["lin1_b"])
    h = jax.nn.relu(jnp.dot(h, p["lin2_w"].T, precision=hi) + p["lin2_b"])
    h = jax.nn.relu(jnp.dot(h, p["lin3_w"].T, precision=hi) + p["lin3_b"])
    logits = jnp.dot(h, p["lin4_w"].T, precision=hi) + p["lin4_b"]
    return jax.nn.softmax(logits, axis=-1)


# TODO(synk): DQN.save (torch.save to disk) is file I/O, not a kernel; omitted.

if __name__ == "__main__":
    key = jax.random.PRNGKey(0)
    pkey, xkey = jax.random.split(key)
    params = init_params(pkey)
    prepped = prepare_params(params)

    # (N=10, C=3, H=55, W=30):
    # conv1(k=4) -> (16,52,27); pool(4,3) -> (16,13,9);
    # conv2(k=2) -> (32,12,8);  pool(3,2) -> (32,4,4) => 512 features/sample.
    # N=10 is not a multiple of BLOCK_B=8 -> exercises the tail-padding path.
    x = jax.random.uniform(xkey, (10, 3, 55, 30), jnp.float32)

    fwd = jax.jit(functools.partial(dqn_forward, prepped))
    out = jax.block_until_ready(fwd(x))

    assert out.shape == (10, 2)
    assert bool(jnp.all(jnp.isfinite(out)))
    assert bool(jnp.allclose(jnp.sum(out, axis=-1), 1.0, atol=1e-5))

    ref = dqn_reference(params, x)
    assert bool(jnp.allclose(out, ref, atol=5e-3, rtol=5e-3)), (out, ref)

    print("KERNEL_OK")
</pallas_src>

<mosaic_0001>
module attributes {stable_mosaic.version = 11 : i64} {
  func.func @kernel(%arg0: i32, %arg1: memref<8x8x1760xf32, #tpu.memory_space<vmem>>, %arg2: memref<16x128xf32, #tpu.memory_space<vmem>>, %arg3: memref<16x1xf32, #tpu.memory_space<vmem>>, %arg4: memref<32x64xf32, #tpu.memory_space<vmem>>, %arg5: memref<32x1xf32, #tpu.memory_space<vmem>>, %arg6: memref<1171x16xf32, #tpu.memory_space<vmem>>, %arg7: memref<16x512xf32, #tpu.memory_space<vmem>>, %arg8: memref<32x512xf32, #tpu.memory_space<vmem>>, %arg9: memref<512x128xf32, #tpu.memory_space<vmem>>, %arg10: memref<1x128xf32, #tpu.memory_space<vmem>>, %arg11: memref<128x32xf32, #tpu.memory_space<vmem>>, %arg12: memref<1x32xf32, #tpu.memory_space<vmem>>, %arg13: memref<32x8xf32, #tpu.memory_space<vmem>>, %arg14: memref<1x8xf32, #tpu.memory_space<vmem>>, %arg15: memref<8x2xf32, #tpu.memory_space<vmem>>, %arg16: memref<1x2xf32, #tpu.memory_space<vmem>>, %arg17: memref<8x2xf32, #tpu.memory_space<vmem>>, %arg18: memref<128x1659xf32, #tpu.memory_space<vmem>>, %arg19: memref<64x1430xf32, #tpu.memory_space<vmem>>) attributes {dimension_semantics = [#tpu.dimension_semantics<parallel>], iteration_bounds = array<i64: 2>, scalar_prefetch = 0 : i64, scratch_operands = 2 : i64, tpu.core_type = #tpu.core_type<tc>, window_params = [{transform_indices = @transform_0, window_bounds = array<i64: 8, 8, 1760>}, {pipeline_mode = #tpu.pipeline_mode<synchronous>, transform_indices = @transform_1, window_bounds = array<i64: 16, 128>}, {pipeline_mode = #tpu.pipeline_mode<synchronous>, transform_indices = @transform_2, window_bounds = array<i64: 16, 1>}, {pipeline_mode = #tpu.pipeline_mode<synchronous>, transform_indices = @transform_3, window_bounds = array<i64: 32, 64>}, {pipeline_mode = #tpu.pipeline_mode<synchronous>, transform_indices = @transform_4, window_bounds = array<i64: 32, 1>}, {pipeline_mode = #tpu.pipeline_mode<synchronous>, transform_indices = @transform_5, window_bounds = array<i64: 1171, 16>}, {pipeline_mode = #tpu.pipeline_mode<synchronous>, transform_indices = @transform_6, window_bounds = array<i64: 16, 512>}, {pipeline_mode = #tpu.pipeline_mode<synchronous>, transform_indices = @transform_7, window_bounds = array<i64: 32, 512>}, {pipeline_mode = #tpu.pipeline_mode<synchronous>, transform_indices = @transform_8, window_bounds = array<i64: 512, 128>}, {pipeline_mode = #tpu.pipeline_mode<synchronous>, transform_indices = @transform_9, window_bounds = array<i64: 1, 128>}, {pipeline_mode = #tpu.pipeline_mode<synchronous>, transform_indices = @transform_10, window_bounds = array<i64: 128, 32>}, {pipeline_mode = #tpu.pipeline_mode<synchronous>, transform_indices = @transform_11, window_bounds = array<i64: 1, 32>}, {pipeline_mode = #tpu.pipeline_mode<synchronous>, transform_indices = @transform_12, window_bounds = array<i64: 32, 8>}, {pipeline_mode = #tpu.pipeline_mode<synchronous>, transform_indices = @transform_13, window_bounds = array<i64: 1, 8>}, {pipeline_mode = #tpu.pipeline_mode<synchronous>, transform_indices = @transform_14, window_bounds = array<i64: 8, 2>}, {pipeline_mode = #tpu.pipeline_mode<synchronous>, transform_indices = @transform_15, window_bounds = array<i64: 1, 2>}, {transform_indices = @transform_16, window_bounds = array<i64: 8, 2>}]} {
    %0 = tpu.iota {dimensions = array<i32: 0>} : vector<8x512xi32>
    %cst = arith.constant 0.000000e+00 : f32
    %1 = vector.broadcast %cst : f32 to vector<8x512xf32>
    %c0_i32 = arith.constant 0 : i32
    %c8_i32 = arith.constant 8 : i32
    %2 = arith.addi %c0_i32, %c8_i32 : i32
    %c1_i32 = arith.constant 1 : i32
    %3 = scf.for %arg20 = %c0_i32 to %2 step %c1_i32 iter_args(%arg21 = %1) -> (vector<8x512xf32>)  : i32 {
      %40 = arith.index_cast %arg20 : i32 to index
      %c0_27 = arith.constant 0 : index
      %c0_28 = arith.constant 0 : index
      %41 = vector.load %arg1[%40, %c0_27, %c0_28] : memref<8x8x1760xf32, #tpu.memory_space<vmem>>, vector<1x8x1760xf32>
      %42 = vector.shape_cast %41 : vector<1x8x1760xf32> to vector<8x1760xf32>
      %43 = vector.extract_strided_slice %42 {offsets = [0, 0], sizes = [8, 1659], strides = [1, 1]} : vector<8x1760xf32> to vector<8x1659xf32>
      %c0_29 = arith.constant 0 : index
      %c0_30 = arith.constant 0 : index
      %44 = vector.load %arg18[%c0_29, %c0_30] : memref<128x1659xf32, #tpu.memory_space<vmem>>, vector<8x1659xf32>
      tpu.vector_store %arg18[%c0_29, %c0_30], %43 {strides = array<i32>} : memref<128x1659xf32, #tpu.memory_space<vmem>>, vector<8x1659xf32>,
      %45 = vector.extract_strided_slice %42 {offsets = [0, 1], sizes = [8, 1659], strides = [1, 1]} : vector<8x1760xf32> to vector<8x1659xf32>
      %c8 = arith.constant 8 : index
      %c0_31 = arith.constant 0 : index
      %46 = vector.load %arg18[%c8, %c0_31] : memref<128x1659xf32, #tpu.memory_space<vmem>>, vector<8x1659xf32>
      tpu.vector_store %arg18[%c8, %c0_31], %45 {strides = array<i32>} : memref<128x1659xf32, #tpu.memory_space<vmem>>, vector<8x1659xf32>,
      %47 = vector.extract_strided_slice %42 {offsets = [0, 2], sizes = [8, 1659], strides = [1, 1]} : vector<8x1760xf32> to vector<8x1659xf32>
      %c16 = arith.constant 16 : index
      %c0_32 = arith.constant 0 : index
      %48 = vector.load %arg18[%c16, %c0_32] : memref<128x1659xf32, #tpu.memory_space<vmem>>, vector<8x1659xf32>
      tpu.vector_store %arg18[%c16, %c0_32], %47 {strides = array<i32>} : memref<128x1659xf32, #tpu.memory_space<vmem>>, vector<8x1659xf32>,
      %49 = vector.extract_strided_slice %42 {offsets = [0, 3], sizes = [8, 1659], strides = [1, 1]} : vector<8x1760xf32> to vector<8x1659xf32>
      %c24 = arith.constant 24 : index
      %c0_33 = arith.constant 0 : index
      %50 = vector.load %arg18[%c24, %c0_33] : memref<128x1659xf32, #tpu.memory_space<vmem>>, vector<8x1659xf32>
      tpu.vector_store %arg18[%c24, %c0_33], %49 {strides = array<i32>} : memref<128x1659xf32, #tpu.memory_space<vmem>>, vector<8x1659xf32>,
      %51 = vector.extract_strided_slice %42 {offsets = [0, 32], sizes = [8, 1659], strides = [1, 1]} : vector<8x1760xf32> to vector<8x1659xf32>
      %c32 = arith.constant 32 : index
      %c0_34 = arith.constant 0 : index
      %52 = vector.load %arg18[%c32, %c0_34] : memref<128x1659xf32, #tpu.memory_space<vmem>>, vector<8x1659xf32>
      tpu.vector_store %arg18[%c32, %c0_34], %51 {strides = array<i32>} : memref<128x1659xf32, #tpu.memory_space<vmem>>, vector<8x1659xf32>,
      %53 = vector.extract_strided_slice %42 {offsets = [0, 33], sizes = [8, 1659], strides = [1, 1]} : vector<8x1760xf32> to vector<8x1659xf32>
      %c40 = arith.constant 40 : index
      %c0_35 = arith.constant 0 : index
      %54 = vector.load %arg18[%c40, %c0_35] : memref<128x1659xf32, #tpu.memory_space<vmem>>, vector<8x1659xf32>
      tpu.vector_store %arg18[%c40, %c0_35], %53 {strides = array<i32>} : memref<128x1659xf32, #tpu.memory_space<vmem>>, vector<8x1659xf32>,
      %55 = vector.extract_strided_slice %42 {offsets = [0, 34], sizes = [8, 1659], strides = [1, 1]} : vector<8x1760xf32> to vector<8x1659xf32>
      %c48 = arith.constant 48 : index
      %c0_36 = arith.constant 0 : index
      %56 = vector.load %arg18[%c48, %c0_36] : memref<128x1659xf32, #tpu.memory_space<vmem>>, vector<8x1659xf32>
      tpu.vector_store %arg18[%c48, %c0_36], %55 {strides = array<i32>} : memref<128x1659xf32, #tpu.memory_space<vmem>>, vector<8x1659xf32>,
      %57 = vector.extract_strided_slice %42 {offsets = [0, 35], sizes = [8, 1659], strides = [1, 1]} : vector<8x1760xf32> to vector<8x1659xf32>
      %c56 = arith.constant 56 : index
      %c0_37 = arith.constant 0 : index
      %58 = vector.load %arg18[%c56, %c0_37] : memref<128x1659xf32, #tpu.memory_space<vmem>>, vector<8x1659xf32>
      tpu.vector_store %arg18[%c56, %c0_37], %57 {strides = array<i32>} : memref<128x1659xf32, #tpu.memory_space<vmem>>, vector<8x1659xf32>,
      %59 = vector.extract_strided_slice %42 {offsets = [0, 64], sizes = [8, 1659], strides = [1, 1]} : vector<8x1760xf32> to vector<8x1659xf32>
      %c64 = arith.constant 64 : index
      %c0_38 = arith.constant 0 : index
      %60 = vector.load %arg18[%c64, %c0_38] : memref<128x1659xf32, #tpu.memory_space<vmem>>, vector<8x1659xf32>
      tpu.vector_store %arg18[%c64, %c0_38], %59 {strides = array<i32>} : memref<128x1659xf32, #tpu.memory_space<vmem>>, vector<8x1659xf32>,
      %61 = vector.extract_strided_slice %42 {offsets = [0, 65], sizes = [8, 1659], strides = [1, 1]} : vector<8x1760xf32> to vector<8x1659xf32>
      %c72 = arith.constant 72 : index
      %c0_39 = arith.constant 0 : index
      %62 = vector.load %arg18[%c72, %c0_39] : memref<128x1659xf32, #tpu.memory_space<vmem>>, vector<8x1659xf32>
      tpu.vector_store %arg18[%c72, %c0_39], %61 {strides = array<i32>} : memref<128x1659xf32, #tpu.memory_space<vmem>>, vector<8x1659xf32>,
      %63 = vector.extract_strided_slice %42 {offsets = [0, 66], sizes = [8, 1659], strides = [1, 1]} : vector<8x1760xf32> to vector<8x1659xf32>
      %c80 = arith.constant 80 : index
      %c0_40 = arith.constant 0 : index
      %64 = vector.load %arg18[%c80, %c0_40] : memref<128x1659xf32, #tpu.memory_space<vmem>>, vector<8x1659xf32>
      tpu.vector_store %arg18[%c80, %c0_40], %63 {strides = array<i32>} : memref<128x1659xf32, #tpu.memory_space<vmem>>, vector<8x1659xf32>,
      %65 = vector.extract_strided_slice %42 {offsets = [0, 67], sizes = [8, 1659], strides = [1, 1]} : vector<8x1760xf32> to vector<8x1659xf32>
      %c88 = arith.constant 88 : index
      %c0_41 = arith.constant 0 : index
      %66 = vector.load %arg18[%c88, %c0_41] : memref<128x1659xf32, #tpu.memory_space<vmem>>, vector<8x1659xf32>
      tpu.vector_store %arg18[%c88, %c0_41], %65 {strides = array<i32>} : memref<128x1659xf32, #tpu.memory_space<vmem>>, vector<8x1659xf32>,
      %67 = vector.extract_strided_slice %42 {offsets = [0, 96], sizes = [8, 1659], strides = [1, 1]} : vector<8x1760xf32> to vector<8x1659xf32>
      %c96 = arith.constant 96 : index
      %c0_42 = arith.constant 0 : index
      %68 = vector.load %arg18[%c96, %c0_42] : memref<128x1659xf32, #tpu.memory_space<vmem>>, vector<8x1659xf32>
      tpu.vector_store %arg18[%c96, %c0_42], %67 {strides = array<i32>} : memref<128x1659xf32, #tpu.memory_space<vmem>>, vector<8x1659xf32>,
      %69 = vector.extract_strided_slice %42 {offsets = [0, 97], sizes = [8, 1659], strides = [1, 1]} : vector<8x1760xf32> to vector<8x1659xf32>
      %c104 = arith.constant 104 : index
      %c0_43 = arith.constant 0 : index
      %70 = vector.load %arg18[%c104, %c0_43] : memref<128x1659xf32, #tpu.memory_space<vmem>>, vector<8x1659xf32>
      tpu.vector_store %arg18[%c104, %c0_43], %69 {strides = array<i32>} : memref<128x1659xf32, #tpu.memory_space<vmem>>, vector<8x1659xf32>,
      %71 = vector.extract_strided_slice %42 {offsets = [0, 98], sizes = [8, 1659], strides = [1, 1]} : vector<8x1760xf32> to vector<8x1659xf32>
      %c112 = arith.constant 112 : index
      %c0_44 = arith.constant 0 : index
      %72 = vector.load %arg18[%c112, %c0_44] : memref<128x1659xf32, #tpu.memory_space<vmem>>, vector<8x1659xf32>
      tpu.vector_store %arg18[%c112, %c0_44], %71 {strides = array<i32>} : memref<128x1659xf32, #tpu.memory_space<vmem>>, vector<8x1659xf32>,
      %73 = vector.extract_strided_slice %42 {offsets = [0, 99], sizes = [8, 1659], strides = [1, 1]} : vector<8x1760xf32> to vector<8x1659xf32>
      %c120 = arith.constant 120 : index
      %c0_45 = arith.constant 0 : index
      %74 = vector.load %arg18[%c120, %c0_45] : memref<128x1659xf32, #tpu.memory_space<vmem>>, vector<8x1659xf32>
      tpu.vector_store %arg18[%c120, %c0_45], %73 {strides = array<i32>} : memref<128x1659xf32, #tpu.memory_space<vmem>>, vector<8x1659xf32>,
      %c0_46 = arith.constant 0 : index
      %c0_47 = arith.constant 0 : index
      %75 = vector.load %arg2[%c0_46, %c0_47] : memref<16x128xf32, #tpu.memory_space<vmem>>, vector<16x128xf32>
      %c0_48 = arith.constant 0 : index
      %c0_49 = arith.constant 0 : index
      %76 = vector.load %arg18[%c0_48, %c0_49] : memref<128x1659xf32, #tpu.memory_space<vmem>>, vector<128x1659xf32>
      %cst_50 = arith.constant dense<0.000000e+00> : vector<16x1659xf32>
      %77 = tpu.matmul %75, %76, %cst_50 {dimension_numbers = #tpu.dot_dimension_numbers<[1], [0], [0], [1], [0, 0, 1, 1], [], []>} : vector<16x128xf32>, vector<128x1659xf32>, vector<16x1659xf32> -> vector<16x1659xf32>
      %c0_51 = arith.constant 0 : index
      %c0_52 = arith.constant 0 : index
      %78 = vector.load %arg3[%c0_51, %c0_52] : memref<16x1xf32, #tpu.memory_space<vmem>>, vector<16x1xf32>
      %79 = vector.broadcast %78 : vector<16x1xf32> to vector<16x1659xf32>
      %80 = arith.addf %77, %79 : vector<16x1659xf32>
      %81 = vector.extract_strided_slice %80 {offsets = [0, 0], sizes = [16, 1563], strides = [1, 1]} : vector<16x1659xf32> to vector<16x1563xf32>
      %82 = vector.extract_strided_slice %80 {offsets = [0, 32], sizes = [16, 1563], strides = [1, 1]} : vector<16x1659xf32> to vector<16x1563xf32>
      %83 = arith.maximumf %81, %82 : vector<16x1563xf32>
      %84 = vector.extract_strided_slice %80 {offsets = [0, 64], sizes = [16, 1563], strides = [1, 1]} : vector<16x1659xf32> to vector<16x1563xf32>
      %85 = arith.maximumf %83, %84 : vector<16x1563xf32>
      %86 = vector.extract_strided_slice %80 {offsets = [0, 96], sizes = [16, 1563], strides = [1, 1]} : vector<16x1659xf32> to vector<16x1563xf32>
      %87 = arith.maximumf %85, %86 : vector<16x1563xf32>
      %88 = vector.extract_strided_slice %87 {offsets = [0, 0], sizes = [16, 1561], strides = [1, 1]} : vector<16x1563xf32> to vector<16x1561xf32>
      %89 = vector.extract_strided_slice %87 {offsets = [0, 1], sizes = [16, 1561], strides = [1, 1]} : vector<16x1563xf32> to vector<16x1561xf32>
      %90 = arith.maximumf %88, %89 : vector<16x1561xf32>
      %91 = vector.extract_strided_slice %87 {offsets = [0, 2], sizes = [16, 1561], strides = [1, 1]} : vector<16x1563xf32> to vector<16x1561xf32>
      %92 = arith.maximumf %90, %91 : vector<16x1561xf32>
      %93 = vector.extract_strided_slice %92 {offsets = [0, 0], sizes = [16, 1430], strides = [1, 1]} : vector<16x1561xf32> to vector<16x1430xf32>
      %c0_53 = arith.constant 0 : index
      %c0_54 = arith.constant 0 : index
      %94 = vector.load %arg19[%c0_53, %c0_54] : memref<64x1430xf32, #tpu.memory_space<vmem>>, vector<16x1430xf32>
      tpu.vector_store %arg19[%c0_53, %c0_54], %93 {strides = array<i32>} : memref<64x1430xf32, #tpu.memory_space<vmem>>, vector<16x1430xf32>,
      %95 = vector.extract_strided_slice %92 {offsets = [0, 3], sizes = [16, 1430], strides = [1, 1]} : vector<16x1561xf32> to vector<16x1430xf32>
      %c16_55 = arith.constant 16 : index
      %c0_56 = arith.constant 0 : index
      %96 = vector.load %arg19[%c16_55, %c0_56] : memref<64x1430xf32, #tpu.memory_space<vmem>>, vector<16x1430xf32>
      tpu.vector_store %arg19[%c16_55, %c0_56], %95 {strides = array<i32>} : memref<64x1430xf32, #tpu.memory_space<vmem>>, vector<16x1430xf32>,
      %97 = vector.extract_strided_slice %92 {offsets = [0, 128], sizes = [16, 1430], strides = [1, 1]} : vector<16x1561xf32> to vector<16x1430xf32>
      %c32_57 = arith.constant 32 : index
      %c0_58 = arith.constant 0 : index
      %98 = vector.load %arg19[%c32_57, %c0_58] : memref<64x1430xf32, #tpu.memory_space<vmem>>, vector<16x1430xf32>
      tpu.vector_store %arg19[%c32_57, %c0_58], %97 {strides = array<i32>} : memref<64x1430xf32, #tpu.memory_space<vmem>>, vector<16x1430xf32>,
      %99 = vector.extract_strided_slice %92 {offsets = [0, 131], sizes = [16, 1430], strides = [1, 1]} : vector<16x1561xf32> to vector<16x1430xf32>
      %c48_59 = arith.constant 48 : index
      %c0_60 = arith.constant 0 : index
      %100 = vector.load %arg19[%c48_59, %c0_60] : memref<64x1430xf32, #tpu.memory_space<vmem>>, vector<16x1430xf32>
      tpu.vector_store %arg19[%c48_59, %c0_60], %99 {strides = array<i32>} : memref<64x1430xf32, #tpu.memory_space<vmem>>, vector<16x1430xf32>,
      %c0_61 = arith.constant 0 : index
      %c0_62 = arith.constant 0 : index
      %101 = vector.load %arg4[%c0_61, %c0_62] : memref<32x64xf32, #tpu.memory_space<vmem>>, vector<32x64xf32>
      %c0_63 = arith.constant 0 : index
      %c0_64 = arith.constant 0 : index
      %102 = vector.load %arg19[%c0_63, %c0_64] : memref<64x1430xf32, #tpu.memory_space<vmem>>, vector<64x1430xf32>
      %cst_65 = arith.constant dense<0.000000e+00> : vector<32x1430xf32>
      %103 = tpu.matmul %101, %102, %cst_65 {dimension_numbers = #tpu.dot_dimension_numbers<[1], [0], [0], [1], [0, 0, 1, 1], [], []>} : vector<32x64xf32>, vector<64x1430xf32>, vector<32x1430xf32> -> vector<32x1430xf32>
      %c0_66 = arith.constant 0 : index
      %c0_67 = arith.constant 0 : index
      %104 = vector.load %arg5[%c0_66, %c0_67] : memref<32x1xf32, #tpu.memory_space<vmem>>, vector<32x1xf32>
      %105 = vector.broadcast %104 : vector<32x1xf32> to vector<32x1430xf32>
      %106 = arith.addf %103, %105 : vector<32x1430xf32>
      %107 = vector.extract_strided_slice %106 {offsets = [0, 0], sizes = [32, 1174], strides = [1, 1]} : vector<32x1430xf32> to vector<32x1174xf32>
      %108 = vector.extract_strided_slice %106 {offsets = [0, 128], sizes = [32, 1174], strides = [1, 1]} : vector<32x1430xf32> to vector<32x1174xf32>
      %109 = arith.maximumf %107, %108 : vector<32x1174xf32>
      %110 = vector.extract_strided_slice %106 {offsets = [0, 256], sizes = [32, 1174], strides = [1, 1]} : vector<32x1430xf32> to vector<32x1174xf32>
      %111 = arith.maximumf %109, %110 : vector<32x1174xf32>
      %112 = vector.extract_strided_slice %111 {offsets = [0, 0], sizes = [32, 1171], strides = [1, 1]} : vector<32x1174xf32> to vector<32x1171xf32>
      %113 = vector.extract_strided_slice %111 {offsets = [0, 3], sizes = [32, 1171], strides = [1, 1]} : vector<32x1174xf32> to vector<32x1171xf32>
      %114 = arith.maximumf %112, %113 : vector<32x1171xf32>
      %c0_68 = arith.constant 0 : index
      %c0_69 = arith.constant 0 : index
      %115 = vector.load %arg6[%c0_68, %c0_69] : memref<1171x16xf32, #tpu.memory_space<vmem>>, vector<1171x16xf32>
      %cst_70 = arith.constant dense<0.000000e+00> : vector<32x16xf32>
      %116 = tpu.matmul %114, %115, %cst_70 {dimension_numbers = #tpu.dot_dimension_numbers<[1], [0], [0], [1], [0, 0, 1, 1], [], []>} : vector<32x1171xf32>, vector<1171x16xf32>, vector<32x16xf32> -> vector<32x16xf32>
      %c0_71 = arith.constant 0 : index
      %c0_72 = arith.constant 0 : index
      %117 = vector.load %arg7[%c0_71, %c0_72] : memref<16x512xf32, #tpu.memory_space<vmem>>, vector<16x512xf32>
      %cst_73 = arith.constant dense<0.000000e+00> : vector<32x512xf32>
      %118 = tpu.matmul %116, %117, %cst_73 {dimension_numbers = #tpu.dot_dimension_numbers<[1], [0], [0], [1], [0, 0, 1, 1], [], []>} : vector<32x16xf32>, vector<16x512xf32>, vector<32x512xf32> -> vector<32x512xf32>
      %c0_74 = arith.constant 0 : index
      %c0_75 = arith.constant 0 : index
      %119 = vector.load %arg8[%c0_74, %c0_75] : memref<32x512xf32, #tpu.memory_space<vmem>>, vector<32x512xf32>
      %120 = arith.mulf %118, %119 : vector<32x512xf32>
      %cst_76 = arith.constant dense<0.000000e+00> : vector<512xf32>
      %121 = vector.multi_reduction <add>, %120, %cst_76 [0] : vector<32x512xf32> to vector<512xf32>
      %122 = vector.shape_cast %121 : vector<512xf32> to vector<1x512xf32>
      %123 = vector.broadcast %arg20 : i32 to vector<8x512xi32>
      %124 = arith.cmpi eq, %0, %123 : vector<8x512xi32>
      %125 = vector.shape_cast %122 : vector<1x512xf32> to vector<1x512xf32>
      %126 = vector.broadcast %125 : vector<1x512xf32> to vector<8x512xf32>
      %127 = arith.select %124, %126, %arg21 : vector<8x512xi1>, vector<8x512xf32>
      scf.yield %127 : vector<8x512xf32>
    }
    %c8_i32_0 = arith.constant 8 : i32
    %c0 = arith.constant 0 : index
    %c0_1 = arith.constant 0 : index
    %4 = vector.load %arg9[%c0, %c0_1] : memref<512x128xf32, #tpu.memory_space<vmem>>, vector<512x128xf32>
    %cst_2 = arith.constant dense<0.000000e+00> : vector<8x128xf32>
    %5 = tpu.matmul %3, %4, %cst_2 {dimension_numbers = #tpu.dot_dimension_numbers<[1], [0], [0], [1], [0, 0, 1, 1], [], []>} : vector<8x512xf32>, vector<512x128xf32>, vector<8x128xf32> -> vector<8x128xf32>
    %c0_3 = arith.constant 0 : index
    %c0_4 = arith.constant 0 : index
    %6 = vector.load %arg10[%c0_3, %c0_4] : memref<1x128xf32, #tpu.memory_space<vmem>>, vector<1x128xf32>
    %7 = vector.broadcast %6 : vector<1x128xf32> to vector<8x128xf32>
    %8 = arith.addf %5, %7 : vector<8x128xf32>
    %cst_5 = arith.constant 0.000000e+00 : f32
    %9 = vector.broadcast %cst_5 : f32 to vector<8x128xf32>
    %10 = arith.maximumf %8, %9 : vector<8x128xf32>
    %c0_6 = arith.constant 0 : index
    %c0_7 = arith.constant 0 : index
    %11 = vector.load %arg11[%c0_6, %c0_7] : memref<128x32xf32, #tpu.memory_space<vmem>>, vector<128x32xf32>
    %cst_8 = arith.constant dense<0.000000e+00> : vector<8x32xf32>
    %12 = tpu.matmul %10, %11, %cst_8 {dimension_numbers = #tpu.dot_dimension_numbers<[1], [0], [0], [1], [0, 0, 1, 1], [], []>} : vector<8x128xf32>, vector<128x32xf32>, vector<8x32xf32> -> vector<8x32xf32>
    %c0_9 = arith.constant 0 : index
    %c0_10 = arith.constant 0 : index
    %13 = vector.load %arg12[%c0_9, %c0_10] : memref<1x32xf32, #tpu.memory_space<vmem>>, vector<1x32xf32>
    %14 = vector.broadcast %13 : vector<1x32xf32> to vector<8x32xf32>
    %15 = arith.addf %12, %14 : vector<8x32xf32>
    %cst_11 = arith.constant 0.000000e+00 : f32
    %16 = vector.broadcast %cst_11 : f32 to vector<8x32xf32>
    %17 = arith.maximumf %15, %16 : vector<8x32xf32>
    %c0_12 = arith.constant 0 : index
    %c0_13 = arith.constant 0 : index
    %18 = vector.load %arg13[%c0_12, %c0_13] : memref<32x8xf32, #tpu.memory_space<vmem>>, vector<32x8xf32>
    %cst_14 = arith.constant dense<0.000000e+00> : vector<8x8xf32>
    %19 = tpu.matmul %17, %18, %cst_14 {dimension_numbers = #tpu.dot_dimension_numbers<[1], [0], [0], [1], [0, 0, 1, 1], [], []>} : vector<8x32xf32>, vector<32x8xf32>, vector<8x8xf32> -> vector<8x8xf32>
    %c0_15 = arith.constant 0 : index
    %c0_16 = arith.constant 0 : index
    %20 = vector.load %arg14[%c0_15, %c0_16] : memref<1x8xf32, #tpu.memory_space<vmem>>, vector<1x8xf32>
    %21 = vector.broadcast %20 : vector<1x8xf32> to vector<8x8xf32>
    %22 = arith.addf %19, %21 : vector<8x8xf32>
    %cst_17 = arith.constant 0.000000e+00 : f32
    %23 = vector.broadcast %cst_17 : f32 to vector<8x8xf32>
    %24 = arith.maximumf %22, %23 : vector<8x8xf32>
    %c0_18 = arith.constant 0 : index
    %c0_19 = arith.constant 0 : index
    %25 = vector.load %arg15[%c0_18, %c0_19] : memref<8x2xf32, #tpu.memory_space<vmem>>, vector<8x2xf32>
    %cst_20 = arith.constant dense<0.000000e+00> : vector<8x2xf32>
    %26 = tpu.matmul %24, %25, %cst_20 {dimension_numbers = #tpu.dot_dimension_numbers<[1], [0], [0], [1], [0, 0, 1, 1], [], []>} : vector<8x8xf32>, vector<8x2xf32>, vector<8x2xf32> -> vector<8x2xf32>
    %c0_21 = arith.constant 0 : index
    %c0_22 = arith.constant 0 : index
    %27 = vector.load %arg16[%c0_21, %c0_22] : memref<1x2xf32, #tpu.memory_space<vmem>>, vector<1x2xf32>
    %28 = vector.broadcast %27 : vector<1x2xf32> to vector<8x2xf32>
    %29 = arith.addf %26, %28 : vector<8x2xf32>
    %cst_23 = arith.constant dense<0xFF800000> : vector<8xf32>
    %30 = vector.multi_reduction <maximumf>, %29, %cst_23 [1] : vector<8x2xf32> to vector<8xf32>
    %31 = vector.shape_cast %30 : vector<8xf32> to vector<8x1xf32>
    %32 = vector.broadcast %31 : vector<8x1xf32> to vector<8x2xf32>
    %33 = arith.subf %29, %32 : vector<8x2xf32>
    %34 = math.exp %33 : vector<8x2xf32>
    %cst_24 = arith.constant dense<0.000000e+00> : vector<8xf32>
    %35 = vector.multi_reduction <add>, %34, %cst_24 [1] : vector<8x2xf32> to vector<8xf32>
    %36 = vector.shape_cast %35 : vector<8xf32> to vector<8x1xf32>
    %37 = vector.broadcast %36 : vector<8x1xf32> to vector<8x2xf32>
    %38 = arith.divf %34, %37 : vector<8x2xf32>
    %c0_25 = arith.constant 0 : index
    %c0_26 = arith.constant 0 : index
    %39 = vector.load %arg17[%c0_25, %c0_26] : memref<8x2xf32, #tpu.memory_space<vmem>>, vector<8x2xf32>
    tpu.vector_store %arg17[%c0_25, %c0_26], %38 {strides = array<i32>} : memref<8x2xf32, #tpu.memory_space<vmem>>, vector<8x2xf32>,
    return
  }
  func.func @transform_0(%arg0: i32) -> (i32, i32, i32) {
    %c0_i32 = arith.constant 0 : i32
    %c0_i32_0 = arith.constant 0 : i32
    %c0_i32_1 = arith.constant 0 : i32
    return %arg0, %c0_i32, %c0_i32_0 : i32, i32, i32
  }
  func.func @transform_1(%arg0: i32) -> (i32, i32) {
    %c0_i32 = arith.constant 0 : i32
    %c0_i32_0 = arith.constant 0 : i32
    %c0_i32_1 = arith.constant 0 : i32
    return %c0_i32, %c0_i32_0 : i32, i32
  }
  func.func @transform_2(%arg0: i32) -> (i32, i32) {
    %c0_i32 = arith.constant 0 : i32
    %c0_i32_0 = arith.constant 0 : i32
    %c0_i32_1 = arith.constant 0 : i32
    return %c0_i32, %c0_i32_0 : i32, i32
  }
  func.func @transform_3(%arg0: i32) -> (i32, i32) {
    %c0_i32 = arith.constant 0 : i32
    %c0_i32_0 = arith.constant 0 : i32
    %c0_i32_1 = arith.constant 0 : i32
    return %c0_i32, %c0_i32_0 : i32, i32
  }
  func.func @transform_4(%arg0: i32) -> (i32, i32) {
    %c0_i32 = arith.constant 0 : i32
    %c0_i32_0 = arith.constant 0 : i32
    %c0_i32_1 = arith.constant 0 : i32
    return %c0_i32, %c0_i32_0 : i32, i32
  }
  func.func @transform_5(%arg0: i32) -> (i32, i32) {
    %c0_i32 = arith.constant 0 : i32
    %c0_i32_0 = arith.constant 0 : i32
    %c0_i32_1 = arith.constant 0 : i32
    return %c0_i32, %c0_i32_0 : i32, i32
  }
  func.func @transform_6(%arg0: i32) -> (i32, i32) {
    %c0_i32 = arith.constant 0 : i32
    %c0_i32_0 = arith.constant 0 : i32
    %c0_i32_1 = arith.constant 0 : i32
    return %c0_i32, %c0_i32_0 : i32, i32
  }
  func.func @transform_7(%arg0: i32) -> (i32, i32) {
    %c0_i32 = arith.constant 0 : i32
    %c0_i32_0 = arith.constant 0 : i32
    %c0_i32_1 = arith.constant 0 : i32
    return %c0_i32, %c0_i32_0 : i32, i32
  }
  func.func @transform_8(%arg0: i32) -> (i32, i32) {
    %c0_i32 = arith.constant 0 : i32
    %c0_i32_0 = arith.constant 0 : i32
    %c0_i32_1 = arith.constant 0 : i32
    return %c0_i32, %c0_i32_0 : i32, i32
  }
  func.func @transform_9(%arg0: i32) -> (i32, i32) {
    %c0_i32 = arith.constant 0 : i32
    %c0_i32_0 = arith.constant 0 : i32
    %c0_i32_1 = arith.constant 0 : i32
    return %c0_i32, %c0_i32_0 : i32, i32
  }
  func.func @transform_10(%arg0: i32) -> (i32, i32) {
    %c0_i32 = arith.constant 0 : i32
    %c0_i32_0 = arith.constant 0 : i32
    %c0_i32_1 = arith.constant 0 : i32
    return %c0_i32, %c0_i32_0 : i32, i32
  }
  func.func @transform_11(%arg0: i32) -> (i32, i32) {
    %c0_i32 = arith.constant 0 : i32
    %c0_i32_0 = arith.constant 0 : i32
    %c0_i32_1 = arith.constant 0 : i32
    return %c0_i32, %c0_i32_0 : i32, i32
  }
  func.func @transform_12(%arg0: i32) -> (i32, i32) {
    %c0_i32 = arith.constant 0 : i32
    %c0_i32_0 = arith.constant 0 : i32
    %c0_i32_1 = arith.constant 0 : i32
    return %c0_i32, %c0_i32_0 : i32, i32
  }
  func.func @transform_13(%arg0: i32) -> (i32, i32) {
    %c0_i32 = arith.constant 0 : i32
    %c0_i32_0 = arith.constant 0 : i32
    %c0_i32_1 = arith.constant 0 : i32
    return %c0_i32, %c0_i32_0 : i32, i32
  }
  func.func @transform_14(%arg0: i32) -> (i32, i32) {
    %c0_i32 = arith.constant 0 : i32
    %c0_i32_0 = arith.constant 0 : i32
    %c0_i32_1 = arith.constant 0 : i32
    return %c0_i32, %c0_i32_0 : i32, i32
  }
  func.func @transform_15(%arg0: i32) -> (i32, i32) {
    %c0_i32 = arith.constant 0 : i32
    %c0_i32_0 = arith.constant 0 : i32
    %c0_i32_1 = arith.constant 0 : i32
    return %c0_i32, %c0_i32_0 : i32, i32
  }
  func.func @transform_16(%arg0: i32) -> (i32, i32) {
    %c0_i32 = arith.constant 0 : i32
    %c0_i32_0 = arith.constant 0 : i32
    return %arg0, %c0_i32 : i32, i32
  }
}

</mosaic_0001>

<bundles_post_ra>
// kernel: dqn_forward.1
= control target key start
LH: loop header
LB: loop body
LE: loop exit
PB: predicated region body
PF: predicated region fallthrough
CT: control target
= control target key end

     0   :  { %s7006_s21 = smov 0   ;;  %s10264_s0 = inlined_call_operand.vmem [shape: f32[16,8,1760], index: 0, kind: input, shape index: {}]   ;;  %s10265_s1 = inlined_call_operand.vmem [shape: f32[16,128], index: 1, kind: input, shape index: {}]   ;;  %s10266_s2 = inlined_call_operand.vmem [shape: f32[16,1], index: 2, kind: input, shape index: {}]   ;;  %s10267_s3 = inlined_call_operand.vmem [shape: f32[32,64], index: 3, kind: input, shape index: {}]   ;;  %s10268_s4 = inlined_call_operand.vmem [shape: f32[32,1], index: 4, kind: input, shape index: {}]   ;;  %s10269_s5 = inlined_call_operand.vmem [shape: f32[1171,16], index: 5, kind: input, shape index: {}]   ;;  %s10270_s6 = inlined_call_operand.vmem [shape: f32[16,512], index: 6, kind: input, shape index: {}]   ;;  %s10271_s7 = inlined_call_operand.vmem [shape: f32[32,512], index: 7, kind: input, shape index: {}]   ;;  %s10272_s8 = inlined_call_operand.vmem [shape: f32[512,128], index: 8, kind: input, shape index: {}]   ;;  %s10273_s9 = inlined_call_operand.vmem [shape: f32[1,128], index: 9, kind: input, shape index: {}]   ;;  %s10274_s10 = inlined_call_operand.vmem [shape: f32[128,32], index: 10, kind: input, shape index: {}]   ;;  %s10275_s11 = inlined_call_operand.vmem [shape: f32[1,32], index: 11, kind: input, shape index: {}]   ;;  %s10276_s12 = inlined_call_operand.vmem [shape: f32[32,8], index: 12, kind: input, shape index: {}]   ;;  %s10277_s13 = inlined_call_operand.vmem [shape: f32[1,8], index: 13, kind: input, shape index: {}]   ;;  %s10278_s14 = inlined_call_operand.vmem [shape: f32[8,2], index: 14, kind: input, shape index: {}]   ;;  %s10279_s15 = inlined_call_operand.vmem [shape: f32[1,2], index: 15, kind: input, shape index: {}]   ;;  %s10280_s16 = inlined_call_operand.vmem [shape: f32[16,2], index: 16, kind: output, shape index: {}]  }
   0x1   :  { %10325 = sst [smem:[#allocation22_spill]] %s10264_s0 }
   0x2   :  { %10326 = sst [smem:[#allocation23_spill]] %s10279_s15 }
   0x3   :  { %10327 = sst [smem:[#allocation24_spill]] %s10280_s16 }
   0x4 LB: > { %10328 = sst [smem:[#allocation4_spill]] %s6878_s21  ;;  %s5678_s22 = sadd.s32 4294967295, %s6878_s21   ;;  %s6878_s21 = sphi %s7006_s21, %s26_s21  }
   0x5   : > { %p5682_p0 = scmp.ge.s32.totalorder %s6878_s21, 1  ;;  %p464_p1 = scmp.lt.s32.totalorder %s6878_s21, 3 }
   0x7   : > { %p465_p2 = pnand %p5682_p0, %p464_p1 }
   0x9   : > { %468 = sbr.rel (%p465_p2) target bundleno = 3251 (0xcb3), region = 84 }
  0x10   : > { %s5683_s23 = sshll.u32 %s5678_s22, 3  ;;  %p521_p3 = scmp.lt.s32.totalorder %s5678_s22, 1  ;;  %v525_v0 = vlaneseq  ;;  %v7026_v2 = vmov 0.0   ;;  %v7028_v3 = vmov 0.0   ;;  %v7030_v4 = vmov 0.0  }
  0x11   : > { %p515_p4 = scmp.lt.s32.totalorder %s5683_s23, 15  ;;  %s10330_s16 = sld [smem:[#allocation24_spill]]  ;;  %v7032_v5 = vmov 0.0  }
  0x12   : > { %s10393_s22 = smov (!%p521_p3, %s5678_s22), 1  ;;  %v7014_v1 = vshrl.u32 %v525_v0, 7  ;;  %s10332_s0 = sld [smem:[#allocation22_spill]] }
  0x13   : > { %s10395_s23 = smov (!%p515_p4, %s5683_s23), 15  ;;  %s5685_s24 = sshll.u32 %s10393_s22, 3 }
  0x14   : > { %10329 = vst [vmem:[#allocation5_spill] sm:$0xff] %v7014_v1  ;;  %s6684_s25 = smul.u32 112, %s10395_s23  ;;  %s7034_s18 = smov 0  }
  0x17   : > { %s7019_s28 = scalar_lea.vmem %s10330_s16, %s5685_s24 }
  0x18   : > { %10331 = sst [smem:[#allocation6_spill]] %s7019_s28  ;;  %s7024_s17 = scalar_lea.vmem %s10332_s0, %s6684_s25 }
  0x19   : > { %10333 = sst [smem:[#allocation7_spill]] %s7024_s17 }
  0x1a LB: >> { %s10334_s17 = sld [smem:[#allocation7_spill]]  ;;  %10335 = vst [vmem:[#allocation8_spill] sm:$0xff] %v6882_v2  ;;  %10336 = vst [vmem:[#allocation9_spill] sm:$0xff] %v6886_v3  ;;  %s5732_s19 = smul.u32 112, %s6898_s18  ;;  %v10312_v16 = vmov 0.0   ;;  %vm607_vm0 = vcmask 1039360   ;;  %s6898_s18 = sphi %s7034_s18, %s532_s18   ;;  %v6894_v5 = vphi %v7032_v5, %v10388_v5   ;;  %v6890_v4 = vphi %v7030_v4, %v10387_v4   ;;  %v6886_v3 = vphi %v7028_v3, %v10386_v3   ;;  %v6882_v2 = vphi %v7026_v2, %v10385_v2  }
  0x1b   : >> { %10337 = vst [vmem:[#allocation10_spill] sm:$0xff] %v6890_v4  ;;  %10338 = vst [vmem:[#allocation11_spill] sm:$0xff] %v6894_v5  ;;  %s10307_s22 = smov 127   ;;  %s10299_s23 = smov 126   ;;  %1879 = vmatprep.mubr.f32.mxu0 %v10312_v16  ;;  %1956 = vmatprep.mubr.f32.mxu1 %v10312_v16  ;;  %vm672_vm1 = vcmask 1031168   ;;  %vm737_vm2 = vcmask 1022976  }
  0x1c   : >> { %s10297_s24 = smov 125   ;;  %s10291_s25 = smov 96   ;;  %vm805_vm3 = vcmask 785408   ;;  %vm873_vm4 = vcmask 777216   ;;  %vm941_vm5 = vcmask 769024   ;;  %vm1009_vm6 = vcmask 760832  }
  0x1d   : >> { %s10293_s26 = smov 95   ;;  %s10295_s27 = smov 94   ;;  %vm1077_vm7 = vcmask 523264   ;;  %vm1145_vm8 = vcmask 515072   ;;  %vm1213_vm9 = vcmask 506880   ;;  %vm1281_vm10 = vcmask 498688  }
  0x1e   : >> { %s10281_s29 = smov 93   ;;  %s10285_s30 = smov 64   ;;  %vm1349_vm11 = vcmask 261120   ;;  %vm1417_vm12 = vcmask 252928   ;;  %vm1485_vm13 = vcmask 244736   ;;  %vm1553_vm14 = vcmask 236544  }
  0x1f   : >> { %s10283_s0 = smov 63   ;;  %s10349_s16 = smov 32   ;;  %vm566_vm15 = vcmask 1006592  }
  0x20   : >> { %s7053_s20 = scalar_lea.vmem %s10334_s17, %s5732_s19  ;;  %s10289_s19 = smov 62  }
  0x21   : >> { %v7056_v6 = vld [vmem:[%s7053_s20 + $0x8] sm:$0xff]  ;;  %v7059_v7 = vld [vmem:[%s7053_s20] sm:$0xff]  ;;  %v7062_v8 = vld [vmem:[%s7053_s20 + $0x10] sm:$0xff]  ;;  %s10350_s17 = smov 31   ;;  %s10351_s21 = smov 30  }
  0x22   : >> { %583 = vrot.lane.b32.xlu0 %v7056_v6, %s10307_s22  ;;  %581 = vrot.lane.b32.xlu1 %v7059_v7, %s10307_s22  ;;  %v7069_v9 = vld [vmem:[%s7053_s20 + $0x18] sm:$0xff]  ;;  %v7072_v10 = vld [vmem:[%s7053_s20 + $0x20] sm:$0xff]  ;;  %s10352_s28 = smov 29   ;;  %s10353_s15 = smov 127  }
  0x23   : >> { %v7075_v11 = vld [vmem:[%s7053_s20 + $0x28] sm:$0xff]  ;;  %v7078_v12 = vld [vmem:[%s7053_s20 + $0x30] sm:$0xff]  ;;  %v7158_v13 = vld [vmem:[%s7053_s20 + $0x38] sm:$0xff] }
  0x24   : >> { %560 = vst [vmem:[#allocation2 + $0x30] sm:$0xff] %v7078_v12  ;;  %561 = vst [vmem:[#allocation2 + $0x38] sm:$0xff] %v7158_v13  ;;  %v7166_v14 = vld [vmem:[%s7053_s20 + $0x40] sm:$0xff]  ;;  %v7169_v15 = vld [vmem:[%s7053_s20 + $0x48] sm:$0xff] }
  0x25   : >> { %562 = vst [vmem:[#allocation2 + $0x40] sm:$0xff] %v7166_v14  ;;  %563 = vst [vmem:[#allocation2 + $0x48] sm:$0xff] %v7169_v15  ;;  %v7180_v17 = vld [vmem:[%s7053_s20 + $0x50] sm:$0xff] }
  0x26   : >> { %585 = vrot.lane.b32.xlu0 %v7062_v8, %s10307_s22  ;;  %648 = vrot.lane.b32.xlu1 %v7056_v6, %s10299_s23  ;;  %564 = vst [vmem:[#allocation2 + $0x50] sm:$0xff] %v7180_v17 }
  0x2a   : >> { %650 = vrot.lane.b32.xlu0 %v7062_v8, %s10299_s23  ;;  %713 = vrot.lane.b32.xlu1 %v7056_v6, %s10297_s24 }
  0x2e   : >> { %715 = vrot.lane.b32.xlu0 %v7062_v8, %s10297_s24  ;;  %646 = vrot.lane.b32.xlu1 %v7059_v7, %s10299_s23 }
  0x32   : >> { %711 = vrot.lane.b32.xlu0 %v7059_v7, %s10297_s24  ;;  %779 = vrot.lane.b32.xlu1 %v7056_v6, %s10291_s25 }
  0x36   : >> { %781 = vrot.lane.b32.xlu0 %v7062_v8, %s10291_s25  ;;  %847 = vrot.lane.b32.xlu1 %v7056_v6, %s10293_s26 }
  0x3a   : >> { %849 = vrot.lane.b32.xlu0 %v7062_v8, %s10293_s26  ;;  %777 = vrot.lane.b32.xlu1 %v7059_v7, %s10291_s25 }
  0x3e   : >> { %845 = vrot.lane.b32.xlu0 %v7059_v7, %s10293_s26  ;;  %915 = vrot.lane.b32.xlu1 %v7056_v6, %s10295_s27 }
  0x42   : >> { %917 = vrot.lane.b32.xlu0 %v7062_v8, %s10295_s27  ;;  %983 = vrot.lane.b32.xlu1 %v7056_v6, %s10281_s29 }
  0x46   : >> { %985 = vrot.lane.b32.xlu0 %v7062_v8, %s10281_s29  ;;  %913 = vrot.lane.b32.xlu1 %v7059_v7, %s10295_s27 }
  0x4a   : >> { %981 = vrot.lane.b32.xlu0 %v7059_v7, %s10281_s29  ;;  %1051 = vrot.lane.b32.xlu1 %v7056_v6, %s10285_s30  ;;  %s10287_s29 = smov 61  }
  0x4e   : >> { %1053 = vrot.lane.b32.xlu0 %v7062_v8, %s10285_s30  ;;  %1119 = vrot.lane.b32.xlu1 %v7056_v6, %s10283_s0 }
  0x52   : >> { %1121 = vrot.lane.b32.xlu0 %v7062_v8, %s10283_s0  ;;  %1049 = vrot.lane.b32.xlu1 %v7059_v7, %s10285_s30  ;;  %s10303_s30 = smov 31  }
  0x56   : >> { %1117 = vrot.lane.b32.xlu0 %v7059_v7, %s10283_s0  ;;  %1187 = vrot.lane.b32.xlu1 %v7056_v6, %s10289_s19  ;;  %s10309_s0 = smov 32  }
  0x5a   : >> { %1189 = vrot.lane.b32.xlu0 %v7062_v8, %s10289_s19  ;;  %1255 = vrot.lane.b32.xlu1 %v7056_v6, %s10287_s29 }
  0x5e   : >> { %1257 = vrot.lane.b32.xlu0 %v7062_v8, %s10287_s29  ;;  %1185 = vrot.lane.b32.xlu1 %v7059_v7, %s10289_s19  ;;  %s10305_s19 = smov 29  }
  0x62   : >> { %1253 = vrot.lane.b32.xlu0 %v7059_v7, %s10287_s29  ;;  %1323 = vrot.lane.b32.xlu1 %v7056_v6, %s10309_s0  ;;  %s10301_s29 = smov 30  }
  0x66   : >> { %1325 = vrot.lane.b32.xlu0 %v7062_v8, %s10309_s0  ;;  %1391 = vrot.lane.b32.xlu1 %v7056_v6, %s10303_s30 }
  0x6a   : >> { %1393 = vrot.lane.b32.xlu0 %v7062_v8, %s10303_s30  ;;  %1321 = vrot.lane.b32.xlu1 %v7059_v7, %s10309_s0 }
  0x6e   : >> { %1389 = vrot.lane.b32.xlu0 %v7059_v7, %s10303_s30  ;;  %1459 = vrot.lane.b32.xlu1 %v7056_v6, %s10301_s29 }
  0x72   : >> { %1461 = vrot.lane.b32.xlu0 %v7062_v8, %s10301_s29  ;;  %1527 = vrot.lane.b32.xlu1 %v7056_v6, %s10305_s19 }
  0x76   : >> { %1529 = vrot.lane.b32.xlu0 %v7062_v8, %s10305_s19  ;;  %587 = vrot.lane.b32.xlu1 %v7069_v9, %s10307_s22 }
  0x7a   : >> { %589 = vrot.lane.b32.xlu0 %v7072_v10, %s10307_s22  ;;  %1457 = vrot.lane.b32.xlu1 %v7059_v7, %s10301_s29 }
  0x7e   : >> { %1525 = vrot.lane.b32.xlu0 %v7059_v7, %s10305_s19  ;;  %591 = vrot.lane.b32.xlu1 %v7075_v11, %s10307_s22 }
  0x82   : >> { %593 = vrot.lane.b32.xlu0 %v7078_v12, %s10307_s22  ;;  %652 = vrot.lane.b32.xlu1 %v7069_v9, %s10299_s23 }
  0x86   : >> { %654 = vrot.lane.b32.xlu0 %v7072_v10, %s10299_s23  ;;  %717 = vrot.lane.b32.xlu1 %v7069_v9, %s10297_s24 }
  0x8a   : >> { %719 = vrot.lane.b32.xlu0 %v7072_v10, %s10297_s24  ;;  %656 = vrot.lane.b32.xlu1 %v7075_v11, %s10299_s23 }
  0x8e   : >> { %658 = vrot.lane.b32.xlu0 %v7078_v12, %s10299_s23  ;;  %721 = vrot.lane.b32.xlu1 %v7075_v11, %s10297_s24  ;;  %s10343_s23 = smov 61  }
  0x92   : >> { %723 = vrot.lane.b32.xlu0 %v7078_v12, %s10297_s24  ;;  %783 = vrot.lane.b32.xlu1 %v7069_v9, %s10291_s25  ;;  %s10342_s24 = smov 62  }
  0x94   : >> { %v584_v18 = vpop.permute.xlu0 %583  ;;  %v582_v19 = vpop.permute.xlu1 %581 }
  0x95   : >> { %v608_v20 = vsel %vm607_vm0, %v582_v19, %v584_v18 }
  0x96   : >> { %785 = vrot.lane.b32.xlu0 %v7072_v10, %s10291_s25  ;;  %851 = vrot.lane.b32.xlu1 %v7069_v9, %s10293_s26  ;;  %v6109_v25 = vpack.c.bf16 %v608_v20, %v7059_v7 }
  0x98   : >> { %v7216_v21 = vpop.permute.xlu0 %585  ;;  %v649_v22 = vpop.permute.xlu1 %648 }
  0x99   : >> { %v609_v23 = vsel %vm607_vm0, %v584_v18, %v7216_v21 }
  0x9a   : >> { %853 = vrot.lane.b32.xlu0 %v7072_v10, %s10293_s26  ;;  %787 = vrot.lane.b32.xlu1 %v7075_v11, %s10291_s25  ;;  %v6107_v24 = vpack.c.bf16 %v609_v23, %v7056_v6 }
  0x9c   : >> { %v7226_v26 = vpop.permute.xlu0 %650  ;;  %v714_v27 = vpop.permute.xlu1 %713  ;;  %6108 = vmatprep.subr.bf16.mxu0 %v6107_v24 }
  0x9d   : >> { %v674_v28 = vsel %vm672_vm1, %v649_v22, %v7226_v26  ;;  %6110 = vmatpush1.bf16.msra.mxu0 %v6109_v25 }
  0x9e   : >> { %789 = vrot.lane.b32.xlu0 %v7078_v12, %s10291_s25  ;;  %855 = vrot.lane.b32.xlu1 %v7075_v11, %s10293_s26  ;;  %s10339_s25 = smov 93  }
  0xa0   : >> { %v7234_v29 = vpop.permute.xlu0 %715  ;;  %v647_v30 = vpop.permute.xlu1 %646 }
  0xa1   : >> { %v739_v31 = vsel %vm737_vm2, %v714_v27, %v7234_v29  ;;  %v673_v32 = vsel %vm672_vm1, %v647_v30, %v649_v22 }
  0xa2   : >> { %857 = vrot.lane.b32.xlu0 %v7078_v12, %s10293_s26  ;;  %919 = vrot.lane.b32.xlu1 %v7069_v9, %s10295_s27  ;;  %v6111_v33 = vpack.c.bf16 %v739_v31, %v674_v28  ;;  %s10340_s26 = smov 64  }
  0xa4   : >> { %v712_v34 = vpop.permute.xlu0 %711  ;;  %v780_v35 = vpop.permute.xlu1 %779  ;;  %6112 = vmatprep.subr.bf16.mxu0 %v6111_v33 }
  0xa5   : >> { %v738_v36 = vsel %vm737_vm2, %v712_v34, %v714_v27 }
  0xa6   : >> { %921 = vrot.lane.b32.xlu0 %v7072_v10, %s10295_s27  ;;  %987 = vrot.lane.b32.xlu1 %v7069_v9, %s10339_s25  ;;  %v6113_v37 = vpack.c.bf16 %v738_v36, %v673_v32 }
  0xa8   : >> { %v7248_v38 = vpop.permute.xlu0 %781  ;;  %v848_v39 = vpop.permute.xlu1 %847  ;;  %6114 = vmatpush1.bf16.msra.mxu0 %v6113_v37 }
  0xa9   : >> { %v807_v40 = vsel %vm805_vm3, %v780_v35, %v7248_v38 }
  0xaa   : >> { %989 = vrot.lane.b32.xlu0 %v7072_v10, %s10339_s25  ;;  %923 = vrot.lane.b32.xlu1 %v7075_v11, %s10295_s27 }
  0xac   : >> { %v7256_v41 = vpop.permute.xlu0 %849  ;;  %v778_v42 = vpop.permute.xlu1 %777 }
  0xad   : >> { %v875_v43 = vsel %vm873_vm4, %v848_v39, %v7256_v41  ;;  %v806_v44 = vsel %vm805_vm3, %v778_v42, %v780_v35 }
  0xae   : >> { %925 = vrot.lane.b32.xlu0 %v7078_v12, %s10295_s27  ;;  %991 = vrot.lane.b32.xlu1 %v7075_v11, %s10339_s25  ;;  %v6115_v45 = vpack.c.bf16 %v875_v43, %v807_v40  ;;  %s10341_s27 = smov 63  }
  0xb0   : >> { %v846_v46 = vpop.permute.xlu0 %845  ;;  %v916_v47 = vpop.permute.xlu1 %915  ;;  %6116 = vmatprep.subr.bf16.mxu0 %v6115_v45 }
  0xb1   : >> { %v874_v48 = vsel %vm873_vm4, %v846_v46, %v848_v39 }
  0xb2   : >> { %993 = vrot.lane.b32.xlu0 %v7078_v12, %s10339_s25  ;;  %1055 = vrot.lane.b32.xlu1 %v7069_v9, %s10340_s26  ;;  %v6117_v49 = vpack.c.bf16 %v874_v48, %v806_v44 }
  0xb4   : >> { %v7270_v50 = vpop.permute.xlu0 %917  ;;  %v984_v51 = vpop.permute.xlu1 %983  ;;  %6118 = vmatpush1.bf16.msra.mxu0 %v6117_v49 }
  0xb5   : >> { %v943_v52 = vsel %vm941_vm5, %v916_v47, %v7270_v50 }
  0xb6   : >> { %1057 = vrot.lane.b32.xlu0 %v7072_v10, %s10340_s26  ;;  %1123 = vrot.lane.b32.xlu1 %v7069_v9, %s10341_s27 }
  0xb8   : >> { %v7278_v53 = vpop.permute.xlu0 %985  ;;  %v914_v54 = vpop.permute.xlu1 %913 }
  0xb9   : >> { %v1011_v55 = vsel %vm1009_vm6, %v984_v51, %v7278_v53  ;;  %v942_v56 = vsel %vm941_vm5, %v914_v54, %v916_v47 }
  0xba   : >> { %1125 = vrot.lane.b32.xlu0 %v7072_v10, %s10341_s27  ;;  %1059 = vrot.lane.b32.xlu1 %v7075_v11, %s10340_s26  ;;  %v6119_v57 = vpack.c.bf16 %v1011_v55, %v943_v52 }
  0xbc   : >> { %v982_v58 = vpop.permute.xlu0 %981  ;;  %v1052_v59 = vpop.permute.xlu1 %1051  ;;  %6120 = vmatprep.subr.bf16.mxu0 %v6119_v57 }
  0xbd   : >> { %v1010_v60 = vsel %vm1009_vm6, %v982_v58, %v984_v51 }
  0xbe   : >> { %1061 = vrot.lane.b32.xlu0 %v7078_v12, %s10340_s26  ;;  %1127 = vrot.lane.b32.xlu1 %v7075_v11, %s10341_s27  ;;  %v6121_v61 = vpack.c.bf16 %v1010_v60, %v942_v56 }
  0xc0   : >> { %v7292_v62 = vpop.permute.xlu0 %1053  ;;  %v1120_v63 = vpop.permute.xlu1 %1119  ;;  %6122 = vmatpush1.bf16.msra.mxu0 %v6121_v61 }
  0xc1   : >> { %v1079_v0 = vsel %vm1077_vm7, %v1052_v59, %v7292_v62 }
  0xc2   : >> { %1129 = vrot.lane.b32.xlu0 %v7078_v12, %s10341_s27  ;;  %1191 = vrot.lane.b32.xlu1 %v7069_v9, %s10342_s24 }
  0xc4   : >> { %v7300_v6 = vpop.permute.xlu0 %1121  ;;  %v1050_v7 = vpop.permute.xlu1 %1049 }
  0xc5   : >> { %v1147_v18 = vsel %vm1145_vm8, %v1120_v63, %v7300_v6  ;;  %v1078_v19 = vsel %vm1077_vm7, %v1050_v7, %v1052_v59 }
  0xc6   : >> { %1193 = vrot.lane.b32.xlu0 %v7072_v10, %s10342_s24  ;;  %1259 = vrot.lane.b32.xlu1 %v7069_v9, %s10343_s23  ;;  %v6123_v20 = vpack.c.bf16 %v1147_v18, %v1079_v0  ;;  %v7373_v0 = vld [vmem:[%s7053_s20 + $0x58] sm:$0xff] }
  0xc7   : >> { %565 = vst [vmem:[#allocation2 + $0x58] sm:$0xff] %v7373_v0 }
  0xc8   : >> { %v1118_v22 = vpop.permute.xlu0 %1117  ;;  %v1188_v23 = vpop.permute.xlu1 %1187  ;;  %6124 = vmatprep.subr.bf16.mxu0 %v6123_v20 }
  0xc9   : >> { %v1146_v24 = vsel %vm1145_vm8, %v1118_v22, %v1120_v63 }
  0xca   : >> { %1261 = vrot.lane.b32.xlu0 %v7072_v10, %s10343_s23  ;;  %1195 = vrot.lane.b32.xlu1 %v7075_v11, %s10342_s24  ;;  %v6125_v25 = vpack.c.bf16 %v1146_v24, %v1078_v19 }
  0xcc   : >> { %v7314_v27 = vpop.permute.xlu0 %1189  ;;  %v1256_v28 = vpop.permute.xlu1 %1255  ;;  %6126 = vmatpush1.bf16.msra.mxu0 %v6125_v25 }
  0xcd   : >> { %v1215_v30 = vsel %vm1213_vm9, %v1188_v23, %v7314_v27 }
  0xce   : >> { %1197 = vrot.lane.b32.xlu0 %v7078_v12, %s10342_s24  ;;  %1263 = vrot.lane.b32.xlu1 %v7075_v11, %s10343_s23 }
  0xd0   : >> { %v7322_v31 = vpop.permute.xlu0 %1257  ;;  %v1186_v32 = vpop.permute.xlu1 %1185 }
  0xd1   : >> { %v1283_v33 = vsel %vm1281_vm10, %v1256_v28, %v7322_v31  ;;  %v1214_v34 = vsel %vm1213_vm9, %v1186_v32, %v1188_v23 }
  0xd2   : >> { %1265 = vrot.lane.b32.xlu0 %v7078_v12, %s10343_s23  ;;  %1327 = vrot.lane.b32.xlu1 %v7069_v9, %s10309_s0  ;;  %v6127_v35 = vpack.c.bf16 %v1283_v33, %v1215_v30 }
  0xd4   : >> { %v1254_v36 = vpop.permute.xlu0 %1253  ;;  %v1324_v37 = vpop.permute.xlu1 %1323  ;;  %6128 = vmatprep.subr.bf16.mxu0 %v6127_v35 }
  0xd5   : >> { %v1282_v39 = vsel %vm1281_vm10, %v1254_v36, %v1256_v28 }
  0xd6   : >> { %1329 = vrot.lane.b32.xlu0 %v7072_v10, %s10309_s0  ;;  %1395 = vrot.lane.b32.xlu1 %v7069_v9, %s10303_s30  ;;  %v6129_v40 = vpack.c.bf16 %v1282_v39, %v1214_v34 }
  0xd8   : >> { %v7336_v42 = vpop.permute.xlu0 %1325  ;;  %v1392_v43 = vpop.permute.xlu1 %1391  ;;  %6130 = vmatpush1.bf16.msra.mxu0 %v6129_v40 }
  0xd9   : >> { %v1351_v44 = vsel %vm1349_vm11, %v1324_v37, %v7336_v42 }
  0xda   : >> { %1397 = vrot.lane.b32.xlu0 %v7072_v10, %s10303_s30  ;;  %1331 = vrot.lane.b32.xlu1 %v7075_v11, %s10309_s0 }
  0xdc   : >> { %v7344_v45 = vpop.permute.xlu0 %1393  ;;  %v1322_v46 = vpop.permute.xlu1 %1321 }
  0xdd   : >> { %v1419_v47 = vsel %vm1417_vm12, %v1392_v43, %v7344_v45  ;;  %v1350_v48 = vsel %vm1349_vm11, %v1322_v46, %v1324_v37 }
  0xde   : >> { %1333 = vrot.lane.b32.xlu0 %v7078_v12, %s10309_s0  ;;  %1399 = vrot.lane.b32.xlu1 %v7075_v11, %s10303_s30  ;;  %v6131_v49 = vpack.c.bf16 %v1419_v47, %v1351_v44  ;;  %s10348_s0 = smov 94  }
  0xe0   : >> { %v1390_v51 = vpop.permute.xlu0 %1389  ;;  %v1460_v52 = vpop.permute.xlu1 %1459  ;;  %6132 = vmatprep.subr.bf16.mxu0 %v6131_v49 }
  0xe1   : >> { %v1418_v54 = vsel %vm1417_vm12, %v1390_v51, %v1392_v43 }
  0xe2   : >> { %1401 = vrot.lane.b32.xlu0 %v7078_v12, %s10303_s30  ;;  %1463 = vrot.lane.b32.xlu1 %v7069_v9, %s10301_s29  ;;  %v6133_v55 = vpack.c.bf16 %v1418_v54, %v1350_v48  ;;  %s10346_s30 = smov 96  }
  0xe4   : >> { %v7358_v56 = vpop.permute.xlu0 %1461  ;;  %v1528_v57 = vpop.permute.xlu1 %1527  ;;  %6134 = vmatpush1.bf16.msra.mxu0 %v6133_v55 }
  0xe5   : >> { %v1487_v58 = vsel %vm1485_vm13, %v1460_v52, %v7358_v56 }
  0xe6   : >> { %1465 = vrot.lane.b32.xlu0 %v7072_v10, %s10301_s29  ;;  %1531 = vrot.lane.b32.xlu1 %v7069_v9, %s10305_s19 }
  0xe8   : >> { %v7366_v59 = vpop.permute.xlu0 %1529  ;;  %v588_v60 = vpop.permute.xlu1 %587 }
  0xe9   : >> { %v1555_v61 = vsel %vm1553_vm14, %v1528_v57, %v7366_v59  ;;  %v610_v63 = vsel %vm607_vm0, %v7216_v21, %v588_v60 }
  0xea   : >> { %1533 = vrot.lane.b32.xlu0 %v7072_v10, %s10305_s19  ;;  %1467 = vrot.lane.b32.xlu1 %v7075_v11, %s10301_s29  ;;  %v6135_v7 = vpack.c.bf16 %v1555_v61, %v1487_v58  ;;  %v6141_v23 = vpack.c.bf16 %v610_v63, %v7062_v8  ;;  %v7399_v8 = vld [vmem:[%s10265_s1] sm:$0xff] }
  0xec   : >> { %v590_v18 = vpop.permute.xlu0 %589  ;;  %v1458_v19 = vpop.permute.xlu1 %1457  ;;  %6136 = vmatprep.subr.bf16.mxu0 %v6135_v7 }
  0xed   : >> { %v611_v20 = vsel %vm607_vm0, %v588_v60, %v590_v18  ;;  %v1486_v22 = vsel %vm1485_vm13, %v1458_v19, %v1460_v52 }
  0xee   : >> { %1469 = vrot.lane.b32.xlu0 %v7078_v12, %s10301_s29  ;;  %1535 = vrot.lane.b32.xlu1 %v7075_v11, %s10305_s19  ;;  %v6139_v21 = vpack.c.bf16 %v611_v20, %v7069_v9  ;;  %s10345_s29 = smov 125  }
  0xf0   : >> { %v1526_v24 = vpop.permute.xlu0 %1525  ;;  %v592_v25 = vpop.permute.xlu1 %591  ;;  %6140 = vmatprep.subr.bf16.mxu1 %v6139_v21 }
  0xf1   : >> { %v1554_v28 = vsel %vm1553_vm14, %v1526_v24, %v1528_v57  ;;  %v612_v30 = vsel %vm607_vm0, %v590_v18, %v592_v25  ;;  %6142 = vmatpush1.bf16.msra.mxu1 %v6141_v23 }
  0xf2   : >> { %1537 = vrot.lane.b32.xlu0 %v7078_v12, %s10305_s19  ;;  %595 = vrot.lane.b32.xlu1 %v7158_v13, %s10307_s22  ;;  %v6137_v32 = vpack.c.bf16 %v1554_v28, %v1486_v22  ;;  %v6173_v36 = vpack.c.bf16 %v612_v30, %v7072_v10  ;;  %s10344_s19 = smov 126  }
  0xf4   : >> { %v7394_v33 = vpop.permute.xlu0 %593  ;;  %v653_v9 = vpop.permute.xlu1 %652  ;;  %6138 = vmatpush1.bf16.msra.mxu0 %v6137_v32 }
  0xf5   : >> { %v613_v34 = vsel %vm607_vm0, %v592_v25, %v7394_v33  ;;  %v675_v35 = vsel %vm672_vm1, %v7226_v26, %v653_v9  ;;  %v7416_v26 = vld [vmem:[%s10265_s1 + $0x8] sm:$0xff] }
  0xf6   : >> { %597 = vrot.lane.b32.xlu0 %v7166_v14, %s10307_s22  ;;  %599 = vrot.lane.b32.xlu1 %v7169_v15, %s10307_s22  ;;  %v6171_v12 = vpack.c.bf16 %v613_v34, %v7075_v11 }
  0xf7   : >> { %1880 = vmatmul.mubr.f32.vlgmr.msra.gmra.mrb[0].mxu0 %v7399_v8 }
  0xf8   : >> { %v655_v37 = vpop.permute.xlu0 %654  ;;  %v718_v39 = vpop.permute.xlu1 %717  ;;  %6172 = vmatprep.subr.bf16.mxu0 %v6171_v12  ;;  %1885 = vmatprep.mubr.f32.mxu0 %v10312_v16 }
  0xf9   : >> { %v676_v40 = vsel %vm672_vm1, %v653_v9, %v655_v37  ;;  %v740_v43 = vsel %vm737_vm2, %v7234_v29, %v718_v39  ;;  %6174 = vmatpush1.bf16.msra.mxu0 %v6173_v36 }
  0xfa   : >> { %601 = vrot.lane.b32.xlu0 %v7180_v17, %s10307_s22  ;;  %660 = vrot.lane.b32.xlu1 %v7158_v13, %s10344_s19  ;;  %v6145_v47 = vpack.c.bf16 %v740_v43, %v675_v35  ;;  %s10347_s22 = smov 95  }
  0xfb   : >> { %1886 = vmatmul.mubr.f32.gmra.mrb[2].mxu0 %v7416_v26 }
  0xfc   : >> { %v720_v10 = vpop.permute.xlu0 %719  ;;  %v657_v11 = vpop.permute.xlu1 %656  ;;  %2033 = vmatprep.mubr.f32.mxu0 %v10312_v16 }
  0xfd   : >> { %v741_v44 = vsel %vm737_vm2, %v718_v39, %v720_v10  ;;  %v677_v46 = vsel %vm672_vm1, %v655_v37, %v657_v11 }
  0xfe   : >> { %662 = vrot.lane.b32.xlu0 %v7166_v14, %s10344_s19  ;;  %725 = vrot.lane.b32.xlu1 %v7158_v13, %s10345_s29  ;;  %v6143_v29 = vpack.c.bf16 %v741_v44, %v676_v40 }
 0x100   : >> { %v7433_v48 = vpop.permute.xlu0 %658  ;;  %v722_v49 = vpop.permute.xlu1 %721  ;;  %6144 = vmatprep.subr.bf16.mxu1 %v6143_v29 }
 0x101   : >> { %v678_v51 = vsel %vm672_vm1, %v657_v11, %v7433_v48  ;;  %v742_v52 = vsel %vm737_vm2, %v720_v10, %v722_v49  ;;  %6146 = vmatpush1.bf16.msra.mxu1 %v6145_v47 }
 0x102   : >> { %727 = vrot.lane.b32.xlu0 %v7166_v14, %s10345_s29  ;;  %664 = vrot.lane.b32.xlu1 %v7169_v15, %s10344_s19  ;;  %v6177_v61 = vpack.c.bf16 %v742_v52, %v677_v46 }
 0x104   : >> { %v7442_v54 = vpop.permute.xlu0 %723  ;;  %v784_v55 = vpop.permute.xlu1 %783 }
 0x105   : >> { %v743_v57 = vsel %vm737_vm2, %v722_v49, %v7442_v54  ;;  %v808_v58 = vsel %vm805_vm3, %v7248_v38, %v784_v55 }
 0x106   : >> { %666 = vrot.lane.b32.xlu0 %v7180_v17, %s10344_s19  ;;  %729 = vrot.lane.b32.xlu1 %v7169_v15, %s10345_s29  ;;  %v6175_v60 = vpack.c.bf16 %v743_v57, %v678_v51 }
 0x108   : >> { %v786_v63 = vpop.permute.xlu0 %785  ;;  %v852_v7 = vpop.permute.xlu1 %851  ;;  %6176 = vmatprep.subr.bf16.mxu0 %v6175_v60 }
 0x109   : >> { %v809_v18 = vsel %vm805_vm3, %v784_v55, %v786_v63  ;;  %v876_v19 = vsel %vm873_vm4, %v7256_v41, %v852_v7  ;;  %6178 = vmatpush1.bf16.msra.mxu0 %v6177_v61 }
 0x10a   : >> { %731 = vrot.lane.b32.xlu0 %v7180_v17, %s10345_s29  ;;  %791 = vrot.lane.b32.xlu1 %v7158_v13, %s10346_s30  ;;  %v6149_v23 = vpack.c.bf16 %v876_v19, %v808_v58 }
 0x10c   : >> { %v854_v38 = vpop.permute.xlu0 %853  ;;  %v788_v20 = vpop.permute.xlu1 %787 }
 0x10d   : >> { %v877_v22 = vsel %vm873_vm4, %v852_v7, %v854_v38  ;;  %v810_v21 = vsel %vm805_vm3, %v786_v63, %v788_v20 }
 0x10e   : >> { %793 = vrot.lane.b32.xlu0 %v7166_v14, %s10346_s30  ;;  %859 = vrot.lane.b32.xlu1 %v7158_v13, %s10347_s22  ;;  %v6147_v41 = vpack.c.bf16 %v877_v22, %v809_v18 }
 0x110   : >> { %v7465_v24 = vpop.permute.xlu0 %789  ;;  %v856_v25 = vpop.permute.xlu1 %855  ;;  %6148 = vmatprep.subr.bf16.mxu1 %v6147_v41 }
 0x111   : >> { %v811_v28 = vsel %vm805_vm3, %v788_v20, %v7465_v24  ;;  %v878_v30 = vsel %vm873_vm4, %v854_v38, %v856_v25  ;;  %6150 = vmatpush1.bf16.msra.mxu1 %v6149_v23 }
 0x112   : >> { %861 = vrot.lane.b32.xlu0 %v7166_v14, %s10347_s22  ;;  %795 = vrot.lane.b32.xlu1 %v7169_v15, %s10346_s30  ;;  %v6181_v36 = vpack.c.bf16 %v878_v30, %v810_v21 }
 0x114   : >> { %v7474_v32 = vpop.permute.xlu0 %857  ;;  %v920_v9 = vpop.permute.xlu1 %919 }
 0x115   : >> { %v879_v34 = vsel %vm873_vm4, %v856_v25, %v7474_v32  ;;  %v944_v35 = vsel %vm941_vm5, %v7270_v50, %v920_v9 }
 0x116   : >> { %797 = vrot.lane.b32.xlu0 %v7180_v17, %s10346_s30  ;;  %863 = vrot.lane.b32.xlu1 %v7169_v15, %s10347_s22  ;;  %v6179_v12 = vpack.c.bf16 %v879_v34, %v811_v28 }
 0x118   : >> { %v922_v37 = vpop.permute.xlu0 %921  ;;  %v988_v39 = vpop.permute.xlu1 %987  ;;  %6180 = vmatprep.subr.bf16.mxu0 %v6179_v12 }
 0x119   : >> { %v945_v40 = vsel %vm941_vm5, %v920_v9, %v922_v37  ;;  %v1012_v43 = vsel %vm1009_vm6, %v7278_v53, %v988_v39  ;;  %6182 = vmatpush1.bf16.msra.mxu0 %v6181_v36 }
 0x11a   : >> { %865 = vrot.lane.b32.xlu0 %v7180_v17, %s10347_s22  ;;  %927 = vrot.lane.b32.xlu1 %v7158_v13, %s10348_s0  ;;  %v6153_v46 = vpack.c.bf16 %v1012_v43, %v944_v35 }
 0x11c   : >> { %v990_v50 = vpop.permute.xlu0 %989  ;;  %v924_v10 = vpop.permute.xlu1 %923 }
 0x11d   : >> { %v1013_v11 = vsel %vm1009_vm6, %v988_v39, %v990_v50  ;;  %v946_v44 = vsel %vm941_vm5, %v922_v37, %v924_v10 }
 0x11e   : >> { %929 = vrot.lane.b32.xlu0 %v7166_v14, %s10348_s0  ;;  %995 = vrot.lane.b32.xlu1 %v7158_v13, %s10339_s25  ;;  %v6151_v53 = vpack.c.bf16 %v1013_v11, %v945_v40 }
 0x120   : >> { %v7497_v29 = vpop.permute.xlu0 %925  ;;  %v992_v47 = vpop.permute.xlu1 %991  ;;  %6152 = vmatprep.subr.bf16.mxu1 %v6151_v53 }
 0x121   : >> { %v947_v49 = vsel %vm941_vm5, %v924_v10, %v7497_v29  ;;  %v1014_v51 = vsel %vm1009_vm6, %v990_v50, %v992_v47  ;;  %6154 = vmatpush1.bf16.msra.mxu1 %v6153_v46 }
 0x122   : >> { %997 = vrot.lane.b32.xlu0 %v7166_v14, %s10339_s25  ;;  %931 = vrot.lane.b32.xlu1 %v7169_v15, %s10348_s0  ;;  %v6185_v61 = vpack.c.bf16 %v1014_v51, %v946_v44  ;;  %v6916_v44 = vmov 0  }
 0x123   : >> { %6754 = vset.pattern.permute.xlu1 %v6916_v44  ;;  %6755 = vset.pattern.permute.xlu0 %v6916_v44  ;;  %v7625_v44 = vld [vmem:[%s7053_s20 + $0x60] sm:$0xff] }
 0x124   : >> { %v7506_v52 = vpop.permute.xlu0 %993  ;;  %v1056_v55 = vpop.permute.xlu1 %1055  ;;  %567 = vst.msk [vmem:[#allocation2 + $0x60] sm:$0xff] %vm566_vm15, %v7625_v44 }
 0x125   : >> { %v1015_v57 = vsel %vm1009_vm6, %v992_v47, %v7506_v52  ;;  %v1080_v58 = vsel %vm1077_vm7, %v7292_v62, %v1056_v55 }
 0x126   : >> { %933 = vrot.lane.b32.xlu0 %v7180_v17, %s10348_s0  ;;  %999 = vrot.lane.b32.xlu1 %v7169_v15, %s10339_s25  ;;  %v6183_v60 = vpack.c.bf16 %v1015_v57, %v947_v49 }
 0x128   : >> { %v1058_v63 = vpop.permute.xlu0 %1057  ;;  %v1124_v7 = vpop.permute.xlu1 %1123  ;;  %6184 = vmatprep.subr.bf16.mxu0 %v6183_v60 }
 0x129   : >> { %v1081_v18 = vsel %vm1077_vm7, %v1056_v55, %v1058_v63  ;;  %v1148_v19 = vsel %vm1145_vm8, %v7300_v6, %v1124_v7  ;;  %6186 = vmatpush1.bf16.msra.mxu0 %v6185_v61 }
 0x12a   : >> { %1001 = vrot.lane.b32.xlu0 %v7180_v17, %s10339_s25  ;;  %1063 = vrot.lane.b32.xlu1 %v7158_v13, %s10340_s26  ;;  %v6157_v21 = vpack.c.bf16 %v1148_v19, %v1080_v58 }
 0x12c   : >> { %v1126_v62 = vpop.permute.xlu0 %1125  ;;  %v1060_v38 = vpop.permute.xlu1 %1059 }
 0x12d   : >> { %v1149_v20 = vsel %vm1145_vm8, %v1124_v7, %v1126_v62  ;;  %v1082_v22 = vsel %vm1077_vm7, %v1058_v63, %v1060_v38 }
 0x12e   : >> { %1065 = vrot.lane.b32.xlu0 %v7166_v14, %s10340_s26  ;;  %1131 = vrot.lane.b32.xlu1 %v7158_v13, %s10341_s27  ;;  %v6155_v6 = vpack.c.bf16 %v1149_v20, %v1081_v18 }
 0x130   : >> { %v7529_v41 = vpop.permute.xlu0 %1061  ;;  %v1128_v23 = vpop.permute.xlu1 %1127  ;;  %6156 = vmatprep.subr.bf16.mxu1 %v6155_v6 }
 0x131   : >> { %v1083_v25 = vsel %vm1077_vm7, %v1060_v38, %v7529_v41  ;;  %v1150_v28 = vsel %vm1145_vm8, %v1126_v62, %v1128_v23  ;;  %6158 = vmatpush1.bf16.msra.mxu1 %v6157_v21 }
 0x132   : >> { %1133 = vrot.lane.b32.xlu0 %v7166_v14, %s10341_s27  ;;  %1067 = vrot.lane.b32.xlu1 %v7169_v15, %s10340_s26  ;;  %v6189_v36 = vpack.c.bf16 %v1150_v28, %v1082_v22 }
 0x134   : >> { %v7538_v30 = vpop.permute.xlu0 %1129  ;;  %v1192_v9 = vpop.permute.xlu1 %1191 }
 0x135   : >> { %v1151_v34 = vsel %vm1145_vm8, %v1128_v23, %v7538_v30  ;;  %v1216_v35 = vsel %vm1213_vm9, %v7314_v27, %v1192_v9 }
 0x136   : >> { %1069 = vrot.lane.b32.xlu0 %v7180_v17, %s10340_s26  ;;  %1135 = vrot.lane.b32.xlu1 %v7169_v15, %s10341_s27  ;;  %v6187_v12 = vpack.c.bf16 %v1151_v34, %v1083_v25 }
 0x138   : >> { %v1194_v37 = vpop.permute.xlu0 %1193  ;;  %v1260_v39 = vpop.permute.xlu1 %1259  ;;  %6188 = vmatprep.subr.bf16.mxu0 %v6187_v12 }
 0x139   : >> { %v1217_v40 = vsel %vm1213_vm9, %v1192_v9, %v1194_v37  ;;  %v1284_v43 = vsel %vm1281_vm10, %v7322_v31, %v1260_v39  ;;  %6190 = vmatpush1.bf16.msra.mxu0 %v6189_v36 }
 0x13a   : >> { %1137 = vrot.lane.b32.xlu0 %v7180_v17, %s10341_s27  ;;  %1199 = vrot.lane.b32.xlu1 %v7158_v13, %s10342_s24  ;;  %v6161_v53 = vpack.c.bf16 %v1284_v43, %v1216_v35 }
 0x13c   : >> { %v1262_v27 = vpop.permute.xlu0 %1261  ;;  %v1196_v50 = vpop.permute.xlu1 %1195 }
 0x13d   : >> { %v1285_v10 = vsel %vm1281_vm10, %v1260_v39, %v1262_v27  ;;  %v1218_v11 = vsel %vm1213_vm9, %v1194_v37, %v1196_v50 }
 0x13e   : >> { %1201 = vrot.lane.b32.xlu0 %v7166_v14, %s10342_s24  ;;  %1267 = vrot.lane.b32.xlu1 %v7158_v13, %s10343_s23  ;;  %v6159_v31 = vpack.c.bf16 %v1285_v10, %v1217_v40 }
 0x140   : >> { %v7561_v46 = vpop.permute.xlu0 %1197  ;;  %v1264_v47 = vpop.permute.xlu1 %1263  ;;  %6160 = vmatprep.subr.bf16.mxu1 %v6159_v31 }
 0x141   : >> { %v1219_v49 = vsel %vm1213_vm9, %v1196_v50, %v7561_v46  ;;  %v1286_v51 = vsel %vm1281_vm10, %v1262_v27, %v1264_v47  ;;  %6162 = vmatpush1.bf16.msra.mxu1 %v6161_v53 }
 0x142   : >> { %1269 = vrot.lane.b32.xlu0 %v7166_v14, %s10343_s23  ;;  %1203 = vrot.lane.b32.xlu1 %v7169_v15, %s10342_s24  ;;  %v6193_v63 = vpack.c.bf16 %v1286_v51, %v1218_v11  ;;  %v6841_v11 = vld [vmem:[#allocation2 + $0x38] sm:$0xff] }
 0x144   : >> { %v7570_v55 = vpop.permute.xlu0 %1265  ;;  %v1328_v57 = vpop.permute.xlu1 %1327 }
 0x145   : >> { %v1287_v58 = vsel %vm1281_vm10, %v1264_v47, %v7570_v55  ;;  %v1352_v60 = vsel %vm1349_vm11, %v7336_v42, %v1328_v57  ;;  %v6842_v47 = vld [vmem:[#allocation2 + $0x40] sm:$0xff] }
 0x146   : >> { %1205 = vrot.lane.b32.xlu0 %v7180_v17, %s10342_s24  ;;  %1271 = vrot.lane.b32.xlu1 %v7169_v15, %s10343_s23  ;;  %v6191_v61 = vpack.c.bf16 %v1287_v58, %v1219_v49  ;;  %v6843_v49 = vld [vmem:[#allocation2 + $0x48] sm:$0xff] }
 0x148   : >> { %v1330_v7 = vpop.permute.xlu0 %1329  ;;  %v1396_v18 = vpop.permute.xlu1 %1395  ;;  %6192 = vmatprep.subr.bf16.mxu0 %v6191_v61  ;;  %v6844_v61 = vld [vmem:[#allocation2 + $0x50] sm:$0xff] }
 0x149   : >> { %v1353_v19 = vsel %vm1349_vm11, %v1328_v57, %v1330_v7  ;;  %v1420_v62 = vsel %vm1417_vm12, %v7344_v45, %v1396_v18  ;;  %6194 = vmatpush1.bf16.msra.mxu0 %v6193_v63 }
 0x14a   : >> { %1273 = vrot.lane.b32.xlu0 %v7180_v17, %s10343_s23  ;;  %1335 = vrot.lane.b32.xlu1 %v7158_v13, %s10349_s16  ;;  %v6165_v6 = vpack.c.bf16 %v1420_v62, %v1352_v60  ;;  %v1601_v62 = vld [vmem:[#allocation2 + $0x30] sm:$0xff] }
 0x14c   : >> { %v1398_v42 = vpop.permute.xlu0 %1397  ;;  %v1332_v38 = vpop.permute.xlu1 %1331 }
 0x14d   : >> { %v1421_v20 = vsel %vm1417_vm12, %v1396_v18, %v1398_v42  ;;  %v1354_v22 = vsel %vm1349_vm11, %v1330_v7, %v1332_v38 }
 0x14e   : >> { %1337 = vrot.lane.b32.xlu0 %v7166_v14, %s10349_s16  ;;  %1403 = vrot.lane.b32.xlu1 %v7158_v13, %s10350_s17  ;;  %v6163_v45 = vpack.c.bf16 %v1421_v20, %v1353_v19 }
 0x150   : >> { %v7593_v21 = vpop.permute.xlu0 %1333  ;;  %v1400_v23 = vpop.permute.xlu1 %1399  ;;  %6164 = vmatprep.subr.bf16.mxu1 %v6163_v45 }
 0x151   : >> { %v1355_v25 = vsel %vm1349_vm11, %v1332_v38, %v7593_v21  ;;  %v1422_v28 = vsel %vm1417_vm12, %v1398_v42, %v1400_v23  ;;  %6166 = vmatpush1.bf16.msra.mxu1 %v6165_v6 }
 0x152   : >> { %1405 = vrot.lane.b32.xlu0 %v7166_v14, %s10350_s17  ;;  %1339 = vrot.lane.b32.xlu1 %v7169_v15, %s10349_s16  ;;  %v6197_v37 = vpack.c.bf16 %v1422_v28, %v1354_v22 }
 0x154   : >> { %v7602_v9 = vpop.permute.xlu0 %1401  ;;  %v1464_v34 = vpop.permute.xlu1 %1463 }
 0x155   : >> { %v1423_v35 = vsel %vm1417_vm12, %v1400_v23, %v7602_v9  ;;  %v1488_v12 = vsel %vm1485_vm13, %v7358_v56, %v1464_v34 }
 0x156   : >> { %1341 = vrot.lane.b32.xlu0 %v7180_v17, %s10349_s16  ;;  %1407 = vrot.lane.b32.xlu1 %v7169_v15, %s10350_s17  ;;  %v6195_v36 = vpack.c.bf16 %v1423_v35, %v1355_v25 }
 0x158   : >> { %v1466_v39 = vpop.permute.xlu0 %1465  ;;  %v1532_v40 = vpop.permute.xlu1 %1531  ;;  %6196 = vmatprep.subr.bf16.mxu0 %v6195_v36 }
 0x159   : >> { %v1489_v43 = vsel %vm1485_vm13, %v1464_v34, %v1466_v39  ;;  %v1556_v27 = vsel %vm1553_vm14, %v7366_v59, %v1532_v40  ;;  %6198 = vmatpush1.bf16.msra.mxu0 %v6197_v37 }
 0x15a   : >> { %1409 = vrot.lane.b32.xlu0 %v7180_v17, %s10350_s17  ;;  %1471 = vrot.lane.b32.xlu1 %v7158_v13, %s10351_s21  ;;  %v6169_v17 = vpack.c.bf16 %v1556_v27, %v1488_v12 }
 0x15c   : >> { %v1534_v56 = vpop.permute.xlu0 %1533  ;;  %v1468_v15 = vpop.permute.xlu1 %1467 }
 0x15d   : >> { %v1557_v50 = vsel %vm1553_vm14, %v1532_v40, %v1534_v56  ;;  %v1490_v10 = vsel %vm1485_vm13, %v1466_v39, %v1468_v15 }
 0x15e   : >> { %1473 = vrot.lane.b32.xlu0 %v7166_v14, %s10351_s21  ;;  %1539 = vrot.lane.b32.xlu1 %v6841_v11, %s10352_s28  ;;  %v6167_v59 = vpack.c.bf16 %v1557_v50, %v1489_v43 }
 0x160   : >> { %v7629_v13 = vpop.permute.xlu0 %1469  ;;  %v1536_v31 = vpop.permute.xlu1 %1535  ;;  %6168 = vmatprep.subr.bf16.mxu1 %v6167_v59 }
 0x161   : >> { %v1491_v53 = vsel %vm1485_vm13, %v1468_v15, %v7629_v13  ;;  %v1558_v14 = vsel %vm1553_vm14, %v1534_v56, %v1536_v31  ;;  %6170 = vmatpush1.bf16.msra.mxu1 %v6169_v17 }
 0x162   : >> { %1541 = vrot.lane.b32.xlu0 %v6842_v47, %s10352_s28  ;;  %1475 = vrot.lane.b32.xlu1 %v6843_v49, %s10351_s21  ;;  %v6201_v7 = vpack.c.bf16 %v1558_v14, %v1490_v10 }
 0x164   : >> { %v7636_v51 = vpop.permute.xlu0 %1537  ;;  %v596_v57 = vpop.permute.xlu1 %595  ;;  %1957 = vmatmul.mubr.f32.vlgmr.msra.gmra.mrb[0].mxu1 %v7399_v8 }
 0x165   : >> { %v1559_v58 = vsel %vm1553_vm14, %v1536_v31, %v7636_v51  ;;  %v614_v60 = vsel %vm607_vm0, %v7394_v33, %v596_v57  ;;  %1962 = vmatprep.mubr.f32.mxu1 %v10312_v16 }
 0x166   : >> { %1477 = vrot.lane.b32.xlu0 %v6844_v61, %s10351_s21  ;;  %1543 = vrot.lane.b32.xlu1 %v6843_v49, %s10352_s28  ;;  %v6199_v63 = vpack.c.bf16 %v1559_v58, %v1491_v53  ;;  %v6205_v20 = vpack.c.bf16 %v614_v60, %v1601_v62 }
 0x168   : >> { %v598_v18 = vpop.permute.xlu0 %597  ;;  %v600_v19 = vpop.permute.xlu1 %599  ;;  %6200 = vmatprep.subr.bf16.mxu0 %v6199_v63  ;;  %1963 = vmatmul.mubr.f32.gmra.mrb[2].mxu1 %v7416_v26 }
 0x169   : >> { %v615_v42 = vsel %vm607_vm0, %v596_v57, %v598_v18  ;;  %v616_v38 = vsel %vm607_vm0, %v598_v18, %v600_v19  ;;  %6202 = vmatpush1.bf16.msra.mxu0 %v6201_v7  ;;  %2110 = vmatprep.mubr.f32.mxu1 %v10312_v16 }
 0x16a   : >> { %1545 = vrot.lane.b32.xlu0 %v6844_v61, %s10352_s28  ;;  %603 = vrot.lane.b32.xlu1 %v7373_v0, %s10353_s15  ;;  %v6203_v33 = vpack.c.bf16 %v615_v42, %v6841_v11  ;;  %v6237_v28 = vpack.c.bf16 %v616_v38, %v6842_v47 }
 0x16c   : >> { %v7653_v22 = vpop.permute.xlu0 %601  ;;  %v661_v45 = vpop.permute.xlu1 %660  ;;  %6204 = vmatprep.subr.bf16.mxu1 %v6203_v33  ;;  %2034 = vmatmul.mubr.f32.vlgmr.msra.gmra.mrb[4].mxu0 %v7399_v8 }
 0x16d   : >> { %v617_v6 = vsel %vm607_vm0, %v600_v19, %v7653_v22  ;;  %v679_v23 = vsel %vm672_vm1, %v7433_v48, %v661_v45  ;;  %6206 = vmatpush1.bf16.msra.mxu1 %v6205_v20  ;;  %2039 = vmatprep.mubr.f32.mxu0 %v10312_v16 }
 0x16e   : >> { %605 = vrot.lane.b32.xlu0 %v7625_v44, %s10353_s15  ;;  %668 = vrot.lane.b32.xlu1 %v7373_v0, %s10344_s19  ;;  %v6235_v25 = vpack.c.bf16 %v617_v6, %v6843_v49 }
 0x170   : >> { %v663_v34 = vpop.permute.xlu0 %662  ;;  %v726_v35 = vpop.permute.xlu1 %725  ;;  %6236 = vmatprep.subr.bf16.mxu0 %v6235_v25  ;;  %2040 = vmatmul.mubr.f32.gmra.mrb[6].mxu0 %v7416_v26 }
 0x171   : >> { %v680_v8 = vsel %vm672_vm1, %v661_v45, %v663_v34  ;;  %v744_v48 = vsel %vm737_vm2, %v7442_v54, %v726_v35  ;;  %6238 = vmatpush1.bf16.msra.mxu0 %v6237_v28  ;;  %2187 = vmatprep.mubr.f32.mxu0 %v10312_v16 }
 0x172   : >> { %670 = vrot.lane.b32.xlu0 %v7625_v44, %s10344_s19  ;;  %733 = vrot.lane.b32.xlu1 %v7373_v0, %s10345_s29  ;;  %v6209_v39 = vpack.c.bf16 %v744_v48, %v679_v23 }
 0x174   : >> { %v728_v12 = vpop.permute.xlu0 %727  ;;  %v665_v36 = vpop.permute.xlu1 %664 }
 0x175   : >> { %v745_v37 = vsel %vm737_vm2, %v726_v35, %v728_v12  ;;  %v681_v26 = vsel %vm672_vm1, %v663_v34, %v665_v36 }
 0x176   : >> { %735 = vrot.lane.b32.xlu0 %v7625_v44, %s10345_s29  ;;  %799 = vrot.lane.b32.xlu1 %v7373_v0, %s10346_s30  ;;  %v6207_v54 = vpack.c.bf16 %v745_v37, %v680_v8 }
 0x178   : >> { %v7680_v40 = vpop.permute.xlu0 %666  ;;  %v730_v43 = vpop.permute.xlu1 %729  ;;  %6208 = vmatprep.subr.bf16.mxu1 %v6207_v54 }
 0x179   : >> { %v682_v27 = vsel %vm672_vm1, %v665_v36, %v7680_v40  ;;  %v746_v56 = vsel %vm737_vm2, %v728_v12, %v730_v43  ;;  %6210 = vmatpush1.bf16.msra.mxu1 %v6209_v39 }
 0x17a   : >> { %801 = vrot.lane.b32.xlu0 %v7625_v44, %s10346_s30  ;;  %867 = vrot.lane.b32.xlu1 %v7373_v0, %s10347_s22  ;;  %v6241_v17 = vpack.c.bf16 %v746_v56, %v681_v26 }
 0x17c   : >> { %v7689_v15 = vpop.permute.xlu0 %731  ;;  %v792_v50 = vpop.permute.xlu1 %791 }
 0x17d   : >> { %v747_v10 = vsel %vm737_vm2, %v730_v43, %v7689_v15  ;;  %v812_v11 = vsel %vm805_vm3, %v7465_v24, %v792_v50  ;;  %v7707_v24 = vld [vmem:[%s7053_s20 + $0x68] sm:$0xff] }
 0x17e   : >> { %869 = vrot.lane.b32.xlu0 %v7625_v44, %s10347_s22  ;;  %935 = vrot.lane.b32.xlu1 %v7373_v0, %s10348_s0  ;;  %v6239_v59 = vpack.c.bf16 %v747_v10, %v682_v27 }
 0x180   : >> { %v794_v31 = vpop.permute.xlu0 %793  ;;  %v860_v53 = vpop.permute.xlu1 %859  ;;  %6240 = vmatprep.subr.bf16.mxu0 %v6239_v59 }
 0x181   : >> { %v813_v14 = vsel %vm805_vm3, %v792_v50, %v794_v31  ;;  %v880_v47 = vsel %vm873_vm4, %v7474_v32, %v860_v53  ;;  %6242 = vmatpush1.bf16.msra.mxu0 %v6241_v17 }
 0x182   : >> { %937 = vrot.lane.b32.xlu0 %v7625_v44, %s10348_s0  ;;  %1003 = vrot.lane.b32.xlu1 %v7373_v0, %s10339_s25  ;;  %v6213_v61 = vpack.c.bf16 %v880_v47, %v812_v11 }
 0x184   : >> { %v862_v49 = vpop.permute.xlu0 %861  ;;  %v796_v57 = vpop.permute.xlu1 %795 }
 0x185   : >> { %v881_v58 = vsel %vm873_vm4, %v860_v53, %v862_v49  ;;  %v814_v60 = vsel %vm805_vm3, %v794_v31, %v796_v57 }
 0x186   : >> { %1005 = vrot.lane.b32.xlu0 %v7625_v44, %s10339_s25  ;;  %803 = vrot.lane.b32.xlu1 %v7707_v24, %s10346_s30  ;;  %v6211_v32 = vpack.c.bf16 %v881_v58, %v813_v14 }
 0x188   : >> { %v7715_v63 = vpop.permute.xlu0 %797  ;;  %v864_v7 = vpop.permute.xlu1 %863  ;;  %6212 = vmatprep.subr.bf16.mxu1 %v6211_v32 }
 0x189   : >> { %v815_v18 = vsel %vm805_vm3, %v796_v57, %v7715_v63  ;;  %v882_v19 = vsel %vm873_vm4, %v862_v49, %v864_v7  ;;  %6214 = vmatpush1.bf16.msra.mxu1 %v6213_v61 }
 0x18a   : >> { %871 = vrot.lane.b32.xlu0 %v7707_v24, %s10347_s22  ;;  %1071 = vrot.lane.b32.xlu1 %v7373_v0, %s10340_s26  ;;  %v6245_v45 = vpack.c.bf16 %v882_v19, %v814_v60 }
 0x18c   : >> { %v7724_v62 = vpop.permute.xlu0 %865  ;;  %v928_v42 = vpop.permute.xlu1 %927 }
 0x18d   : >> { %v883_v38 = vsel %vm873_vm4, %v864_v7, %v7724_v62  ;;  %v948_v33 = vsel %vm941_vm5, %v7497_v29, %v928_v42 }
 0x18e   : >> { %1073 = vrot.lane.b32.xlu0 %v7625_v44, %s10340_s26  ;;  %1139 = vrot.lane.b32.xlu1 %v7373_v0, %s10341_s27  ;;  %v6243_v20 = vpack.c.bf16 %v883_v38, %v815_v18  ;;  %v7796_v18 = vld [vmem:[#allocation2 + $0x58] sm:$0xff] }
 0x190   : >> { %v930_v6 = vpop.permute.xlu0 %929  ;;  %v996_v23 = vpop.permute.xlu1 %995  ;;  %6244 = vmatprep.subr.bf16.mxu0 %v6243_v20 }
 0x191   : >> { %v949_v25 = vsel %vm941_vm5, %v928_v42, %v930_v6  ;;  %v1016_v28 = vsel %vm1009_vm6, %v7506_v52, %v996_v23  ;;  %6246 = vmatpush1.bf16.msra.mxu0 %v6245_v45 }
 0x192   : >> { %1141 = vrot.lane.b32.xlu0 %v7625_v44, %s10341_s27  ;;  %939 = vrot.lane.b32.xlu1 %v7707_v24, %s10348_s0  ;;  %v6217_v48 = vpack.c.bf16 %v1016_v28, %v948_v33 }
 0x194   : >> { %v998_v29 = vpop.permute.xlu0 %997  ;;  %v932_v34 = vpop.permute.xlu1 %931 }
 0x195   : >> { %v1017_v35 = vsel %vm1009_vm6, %v996_v23, %v998_v29  ;;  %v950_v8 = vsel %vm941_vm5, %v930_v6, %v932_v34 }
 0x196   : >> { %1007 = vrot.lane.b32.xlu0 %v7707_v24, %s10339_s25  ;;  %1207 = vrot.lane.b32.xlu1 %v7373_v0, %s10342_s24  ;;  %v6215_v52 = vpack.c.bf16 %v1017_v35, %v949_v25 }
 0x198   : >> { %v7747_v12 = vpop.permute.xlu0 %933  ;;  %v1000_v36 = vpop.permute.xlu1 %999  ;;  %6216 = vmatprep.subr.bf16.mxu1 %v6215_v52 }
 0x199   : >> { %v951_v37 = vsel %vm941_vm5, %v932_v34, %v7747_v12  ;;  %v1018_v26 = vsel %vm1009_vm6, %v998_v29, %v1000_v36  ;;  %6218 = vmatpush1.bf16.msra.mxu1 %v6217_v48 }
 0x19a   : >> { %1209 = vrot.lane.b32.xlu0 %v7625_v44, %s10342_s24  ;;  %1275 = vrot.lane.b32.xlu1 %v7373_v0, %s10343_s23  ;;  %v6249_v50 = vpack.c.bf16 %v1018_v26, %v950_v8 }
 0x19c   : >> { %v7756_v54 = vpop.permute.xlu0 %1001  ;;  %v1064_v39 = vpop.permute.xlu1 %1063 }
 0x19d   : >> { %v1019_v43 = vsel %vm1009_vm6, %v1000_v36, %v7756_v54  ;;  %v1084_v27 = vsel %vm1077_vm7, %v7529_v41, %v1064_v39 }
 0x19e   : >> { %1277 = vrot.lane.b32.xlu0 %v7625_v44, %s10343_s23  ;;  %1075 = vrot.lane.b32.xlu1 %v7707_v24, %s10340_s26  ;;  %v6247_v56 = vpack.c.bf16 %v1019_v43, %v951_v37 }
 0x1a0   : >> { %v1066_v10 = vpop.permute.xlu0 %1065  ;;  %v1132_v11 = vpop.permute.xlu1 %1131  ;;  %6248 = vmatprep.subr.bf16.mxu0 %v6247_v56 }
 0x1a1   : >> { %v1085_v59 = vsel %vm1077_vm7, %v1064_v39, %v1066_v10  ;;  %v1152_v17 = vsel %vm1145_vm8, %v7538_v30, %v1132_v11  ;;  %6250 = vmatpush1.bf16.msra.mxu0 %v6249_v50  ;;  %v1804_v39 = vld [vmem:[%s10266_s2 + $0x8] sm:$0xff] }
 0x1a2   : >> { %1143 = vrot.lane.b32.xlu0 %v7707_v24, %s10341_s27  ;;  %1343 = vrot.lane.b32.xlu1 %v7373_v0, %s10349_s16  ;;  %v6221_v47 = vpack.c.bf16 %v1152_v17, %v1084_v27 }
 0x1a4   : >> { %v1134_v41 = vpop.permute.xlu0 %1133  ;;  %v1068_v31 = vpop.permute.xlu1 %1067 }
 0x1a5   : >> { %v1153_v53 = vsel %vm1145_vm8, %v1132_v11, %v1134_v41  ;;  %v1086_v14 = vsel %vm1077_vm7, %v1066_v10, %v1068_v31 }
 0x1a6   : >> { %1345 = vrot.lane.b32.xlu0 %v7625_v44, %s10349_s16  ;;  %1411 = vrot.lane.b32.xlu1 %v7373_v0, %s10350_s17  ;;  %v6219_v30 = vpack.c.bf16 %v1153_v53, %v1085_v59 }
 0x1a8   : >> { %v7779_v49 = vpop.permute.xlu0 %1069  ;;  %v1136_v57 = vpop.permute.xlu1 %1135  ;;  %6220 = vmatprep.subr.bf16.mxu1 %v6219_v30 }
 0x1a9   : >> { %v1087_v58 = vsel %vm1077_vm7, %v1068_v31, %v7779_v49  ;;  %v1154_v60 = vsel %vm1145_vm8, %v1134_v41, %v1136_v57  ;;  %6222 = vmatpush1.bf16.msra.mxu1 %v6221_v47 }
 0x1aa   : >> { %1413 = vrot.lane.b32.xlu0 %v7625_v44, %s10350_s17  ;;  %1211 = vrot.lane.b32.xlu1 %v7707_v24, %s10342_s24  ;;  %v6253_v42 = vpack.c.bf16 %v1154_v60, %v1086_v14 }
 0x1ac   : >> { %v7788_v32 = vpop.permute.xlu0 %1137  ;;  %v1200_v0 = vpop.permute.xlu1 %1199 }
 0x1ad   : >> { %v1155_v61 = vsel %vm1145_vm8, %v1136_v57, %v7788_v32  ;;  %v1220_v7 = vsel %vm1213_vm9, %v7561_v46, %v1200_v0 }
 0x1ae   : >> { %1279 = vrot.lane.b32.xlu0 %v7707_v24, %s10343_s23  ;;  %1479 = vrot.lane.b32.xlu1 %v7796_v18, %s10351_s21  ;;  %v6251_v19 = vpack.c.bf16 %v1155_v61, %v1087_v58 }
 0x1b0   : >> { %v1202_v38 = vpop.permute.xlu0 %1201  ;;  %v1268_v33 = vpop.permute.xlu1 %1267  ;;  %6252 = vmatprep.subr.bf16.mxu0 %v6251_v19 }
 0x1b1   : >> { %v1221_v20 = vsel %vm1213_vm9, %v1200_v0, %v1202_v38  ;;  %v1288_v45 = vsel %vm1281_vm10, %v7570_v55, %v1268_v33  ;;  %6254 = vmatpush1.bf16.msra.mxu0 %v6253_v42 }
 0x1b2   : >> { %1481 = vrot.lane.b32.xlu0 %v7625_v44, %s10351_s21  ;;  %1547 = vrot.lane.b32.xlu1 %v7796_v18, %s10352_s28  ;;  %v6225_v28 = vpack.c.bf16 %v1288_v45, %v1220_v7 }
 0x1b4   : >> { %v1270_v46 = vpop.permute.xlu0 %1269  ;;  %v1204_v6 = vpop.permute.xlu1 %1203 }
 0x1b5   : >> { %v1289_v23 = vsel %vm1281_vm10, %v1268_v33, %v1270_v46  ;;  %v1222_v25 = vsel %vm1213_vm9, %v1202_v38, %v1204_v6 }
 0x1b6   : >> { %1549 = vrot.lane.b32.xlu0 %v7625_v44, %s10352_s28  ;;  %1347 = vrot.lane.b32.xlu1 %v7707_v24, %s10349_s16  ;;  %v6223_v55 = vpack.c.bf16 %v1289_v23, %v1221_v20  ;;  %v1803_v44 = vld [vmem:[%s10266_s2] sm:$0xff] }
 0x1b8   : >> { %v7813_v29 = vpop.permute.xlu0 %1205  ;;  %v1272_v34 = vpop.permute.xlu1 %1271  ;;  %6224 = vmatprep.subr.bf16.mxu1 %v6223_v55 }
 0x1b9   : >> { %v1223_v35 = vsel %vm1213_vm9, %v1204_v6, %v7813_v29  ;;  %v1290_v8 = vsel %vm1281_vm10, %v1270_v46, %v1272_v34  ;;  %6226 = vmatpush1.bf16.msra.mxu1 %v6225_v28 }
 0x1ba   : >> { %1415 = vrot.lane.b32.xlu0 %v7707_v24, %s10350_s17  ;;  %1483 = vrot.lane.b32.xlu1 %v7707_v24, %s10351_s21  ;;  %v6257_v43 = vpack.c.bf16 %v1290_v8, %v1222_v25 }
 0x1bc   : >> { %v7825_v52 = vpop.permute.xlu0 %1273  ;;  %v1336_v48 = vpop.permute.xlu1 %1335 }
 0x1bd   : >> { %v1291_v36 = vsel %vm1281_vm10, %v1272_v34, %v7825_v52  ;;  %v1356_v37 = vsel %vm1349_vm11, %v7593_v21, %v1336_v48 }
 0x1be   : >> { %1551 = vrot.lane.b32.xlu0 %v7707_v24, %s10352_s28  ;;  %1807 = vperm.xlu1 %6754, %v1803_v44   ;;  %v6255_v26 = vpack.c.bf16 %v1291_v36, %v1223_v35 }
 0x1c0   : >> { %v1338_v27 = vpop.permute.xlu0 %1337  ;;  %v1404_v56 = vpop.permute.xlu1 %1403  ;;  %6256 = vmatprep.subr.bf16.mxu0 %v6255_v26 }
 0x1c1   : >> { %v1357_v50 = vsel %vm1349_vm11, %v1336_v48, %v1338_v27  ;;  %v1424_v10 = vsel %vm1417_vm12, %v7602_v9, %v1404_v56  ;;  %6258 = vmatpush1.bf16.msra.mxu0 %v6257_v43  ;;  %v7875_v48 = vld [vmem:[%s10265_s1] sm:$0xff] }
 0x1c2   : >> { %1812 = vperm.xlu0 %6755, %v1804_v39   ;;  %v6229_v41 = vpack.c.bf16 %v1424_v10, %v1356_v37 }
 0x1c4   : >> { %v1406_v21 = vpop.permute.xlu0 %1405  ;;  %v1340_v11 = vpop.permute.xlu1 %1339 }
 0x1c5   : >> { %v1425_v24 = vsel %vm1417_vm12, %v1404_v56, %v1406_v21  ;;  %v1358_v59 = vsel %vm1349_vm11, %v1338_v27, %v1340_v11  ;;  %v7886_v56 = vld [vmem:[%s10265_s1 + $0x8] sm:$0xff] }
 0x1c6   : >> { %v6227_v17 = vpack.c.bf16 %v1425_v24, %v1357_v50  ;;  %v1605_v50 = vld [vmem:[#allocation2 + $0x50] sm:$0xff] }
 0x1c8   : >> { %v7841_v31 = vpop.permute.xlu0 %1341  ;;  %v1408_v53 = vpop.permute.xlu1 %1407  ;;  %6228 = vmatprep.subr.bf16.mxu1 %v6227_v17 }
 0x1c9   : >> { %v1359_v14 = vsel %vm1349_vm11, %v1340_v11, %v7841_v31  ;;  %v1426_v30 = vsel %vm1417_vm12, %v1406_v21, %v1408_v53  ;;  %6230 = vmatpush1.bf16.msra.mxu1 %v6229_v41 }
 0x1ca   : >> { %v7846_v9 = vpop.f32.mrb[0].mxu0  ;;  %v6261_v19 = vpack.c.bf16 %v1426_v30, %v1358_v59 }
 0x1cb   : >> { %v7848_v47 = vpop.f32.mrb[1].mxu0 }
 0x1cc   : >> { %v7850_v57 = vpop.permute.xlu0 %1409  ;;  %v1472_v58 = vpop.permute.xlu1 %1471 }
 0x1cd   : >> { %v1427_v60 = vsel %vm1417_vm12, %v1408_v53, %v7850_v57  ;;  %v1492_v0 = vsel %vm1485_vm13, %v7629_v13, %v1472_v58 }
 0x1ce   : >> { %v6259_v61 = vpack.c.bf16 %v1427_v60, %v1359_v14  ;;  %v7856_v7 = vpop.f32.mrb[2].mxu0 }
 0x1cf   : >> { %v7858_v42 = vpop.f32.mrb[3].mxu0 }
 0x1d0   : >> { %v1474_v38 = vpop.permute.xlu0 %1473  ;;  %v1540_v33 = vpop.permute.xlu1 %1539  ;;  %6260 = vmatprep.subr.bf16.mxu0 %v6259_v61 }
 0x1d1   : >> { %v1493_v20 = vsel %vm1485_vm13, %v1472_v58, %v1474_v38  ;;  %v1560_v45 = vsel %vm1553_vm14, %v7636_v51, %v1540_v33  ;;  %6262 = vmatpush1.bf16.msra.mxu0 %v6261_v19 }
 0x1d2   : >> { %v6233_v55 = vpack.c.bf16 %v1560_v45, %v1492_v0 }
 0x1d4   : >> { %v1542_v46 = vpop.permute.xlu0 %1541  ;;  %v1476_v6 = vpop.permute.xlu1 %1475 }
 0x1d5   : >> { %v1561_v23 = vsel %vm1553_vm14, %v1540_v33, %v1542_v46  ;;  %v1494_v13 = vsel %vm1485_vm13, %v1474_v38, %v1476_v6 }
 0x1d6   : >> { %v6231_v25 = vpack.c.bf16 %v1561_v23, %v1493_v20 }
 0x1d8   : >> { %v7865_v28 = vpop.permute.xlu0 %1477  ;;  %v1544_v34 = vpop.permute.xlu1 %1543  ;;  %6232 = vmatprep.subr.bf16.mxu1 %v6231_v25 }
 0x1d9   : >> { %v1495_v35 = vsel %vm1485_vm13, %v1476_v6, %v7865_v28  ;;  %v1562_v8 = vsel %vm1553_vm14, %v1542_v46, %v1544_v34  ;;  %6234 = vmatpush1.bf16.msra.mxu1 %v6233_v55 }
 0x1da   : >> { %v6265_v39 = vpack.c.bf16 %v1562_v8, %v1494_v13 }
 0x1dc   : >> { %v7870_v51 = vpop.permute.xlu0 %1545  ;;  %v604_v44 = vpop.permute.xlu1 %603  ;;  %2111 = vmatmul.mubr.f32.vlgmr.msra.gmra.mrb[4].mxu1 %v7875_v48 }
 0x1dd   : >> { %v1563_v36 = vsel %vm1553_vm14, %v1544_v34, %v7870_v51  ;;  %v618_v37 = vsel %vm607_vm0, %v7653_v22, %v604_v44  ;;  %2116 = vmatprep.mubr.f32.mxu1 %v10312_v16 }
 0x1de   : >> { %v6263_v26 = vpack.c.bf16 %v1563_v36, %v1495_v35  ;;  %v6269_v11 = vpack.c.bf16 %v618_v37, %v1605_v50 }
 0x1e0   : >> { %v606_v43 = vpop.permute.xlu0 %605  ;;  %v669_v27 = vpop.permute.xlu1 %668  ;;  %2117 = vmatmul.mubr.f32.gmra.mrb[6].mxu1 %v7886_v56  ;;  %6264 = vmatprep.subr.bf16.mxu0 %v6263_v26 }
 0x1e1   : >> { %v619_v10 = vsel %vm607_vm0, %v604_v44, %v606_v43  ;;  %645 = vst.msk [vmem:[#allocation2 + $0xc8] sm:$0xff] %vm566_vm15, %v606_v43  ;;  %v683_v22 = vsel %vm672_vm1, %v7680_v40, %v669_v27  ;;  %6266 = vmatpush1.bf16.msra.mxu0 %v6265_v39  ;;  %2264 = vmatprep.mubr.f32.mxu1 %v10312_v16  ;;  %v1607_v40 = vld [vmem:[#allocation2 + $0x60] sm:$0xff] }
 0x1e2   : >> { %v6267_v21 = vpack.c.bf16 %v619_v10, %v7796_v18 }
 0x1e4   : >> { %v671_v24 = vpop.permute.xlu0 %670  ;;  %v734_v59 = vpop.permute.xlu1 %733  ;;  %6268 = vmatprep.subr.bf16.mxu1 %v6267_v21  ;;  %2188 = vmatmul.mubr.f32.vlgmr.msra.gmra.mrb[8].mxu0 %v7875_v48 }
 0x1e5   : >> { %v684_v17 = vsel %vm672_vm1, %v669_v27, %v671_v24  ;;  %710 = vst.msk [vmem:[#allocation2 + $0x130] sm:$0xff] %vm566_vm15, %v671_v24  ;;  %v748_v41 = vsel %vm737_vm2, %v7689_v15, %v734_v59  ;;  %6270 = vmatpush1.bf16.msra.mxu1 %v6269_v11  ;;  %2193 = vmatprep.mubr.f32.mxu0 %v10312_v16 }
 0x1e6   : >> { %v6273_v0 = vpack.c.bf16 %v748_v41, %v683_v22 }
 0x1e8   : >> { %v736_v53 = vpop.permute.xlu0 %735  ;;  %v800_v14 = vpop.permute.xlu1 %799  ;;  %v1620_v18 = vld [vmem:[#allocation2 + $0xc8] sm:$0xff]  ;;  %2194 = vmatmul.mubr.f32.gmra.mrb[10].mxu0 %v7886_v56 }
 0x1e9   : >> { %v749_v30 = vsel %vm737_vm2, %v734_v59, %v736_v53  ;;  %775 = vst.msk [vmem:[#allocation2 + $0x198] sm:$0xff] %vm566_vm15, %v736_v53  ;;  %v816_v58 = vsel %vm805_vm3, %v7715_v63, %v800_v14  ;;  %v6299_v60 = vpack.c.bf16 %v1620_v18, %v1607_v40  ;;  %6053 = vmatprep.mubr.f32.mxu0 %v7875_v48 }
 0x1ea   : >> { %v6271_v15 = vpack.c.bf16 %v749_v30, %v684_v17 }
 0x1eb   : >> { %6300 = vmatprep.subr.bf16.mxu0 %v6299_v60 }
 0x1ec   : >> { %v802_v61 = vpop.permute.xlu0 %801  ;;  %v868_v19 = vpop.permute.xlu1 %867  ;;  %6302 = vmatpush3.bf16.msra.mxu0 %v6299_v60  ;;  %6272 = vmatprep.subr.bf16.mxu1 %v6271_v15  ;;  %v1633_v46 = vld [vmem:[#allocation2 + $0x130] sm:$0xff] }
 0x1ed   : >> { %v817_v38 = vsel %vm805_vm3, %v800_v14, %v802_v61  ;;  %v884_v33 = vsel %vm873_vm4, %v7724_v62, %v868_v19  ;;  %6274 = vmatpush1.bf16.msra.mxu1 %v6273_v0 }
 0x1ee   : >> { %v6277_v55 = vpack.c.bf16 %v884_v33, %v816_v58 }
 0x1f0   : >> { %v870_v20 = vpop.permute.xlu0 %869  ;;  %v936_v45 = vpop.permute.xlu1 %935  ;;  %v1646_v63 = vld [vmem:[#allocation2 + $0x198] sm:$0xff] }
 0x1f1   : >> { %v885_v6 = vsel %vm873_vm4, %v868_v19, %v870_v20  ;;  %v952_v23 = vsel %vm941_vm5, %v7747_v12, %v936_v45  ;;  %v6303_v13 = vpack.c.bf16 %v1646_v63, %v1633_v46 }
 0x1f2   : >> { %v6275_v25 = vpack.c.bf16 %v885_v6, %v817_v38 }
 0x1f3   : >> { %6304 = vmatprep.subr.bf16.mxu0 %v6303_v13 }
 0x1f4   : >> { %v938_v34 = vpop.permute.xlu0 %937  ;;  %v1004_v35 = vpop.permute.xlu1 %1003  ;;  %6306 = vmatpush3.bf16.msra.mxu0 %v6303_v13  ;;  %6276 = vmatprep.subr.bf16.mxu1 %v6275_v25 }
 0x1f5   : >> { %v953_v62 = vsel %vm941_vm5, %v936_v45, %v938_v34  ;;  %v1020_v8 = vsel %vm1009_vm6, %v7756_v54, %v1004_v35  ;;  %6278 = vmatpush1.bf16.msra.mxu1 %v6277_v55 }
 0x1f6   : >> { %v6281_v39 = vpack.c.bf16 %v1020_v8, %v952_v23 }
 0x1f8   : >> { %v1006_v44 = vpop.permute.xlu0 %1005  ;;  %v804_v36 = vpop.permute.xlu1 %803 }
 0x1f9   : >> { %v1021_v37 = vsel %vm1009_vm6, %v1004_v35, %v1006_v44  ;;  %v818_v12 = vsel %vm805_vm3, %v802_v61, %v804_v36 }
 0x1fa   : >> { %844 = vst.msk [vmem:[#allocation2 + $0x200] sm:$0xff] %vm566_vm15, %v818_v12  ;;  %v6279_v26 = vpack.c.bf16 %v1021_v37, %v953_v62 }
 0x1fc   : >> { %v872_v43 = vpop.permute.xlu0 %871  ;;  %v1072_v27 = vpop.permute.xlu1 %1071  ;;  %6280 = vmatprep.subr.bf16.mxu1 %v6279_v26 }
 0x1fd   : >> { %v886_v50 = vsel %vm873_vm4, %v870_v20, %v872_v43  ;;  %v1088_v10 = vsel %vm1077_vm7, %v7779_v49, %v1072_v27  ;;  %6282 = vmatpush1.bf16.msra.mxu1 %v6281_v39 }
 0x1fe   : >> { %912 = vst.msk [vmem:[#allocation2 + $0x268] sm:$0xff] %vm566_vm15, %v886_v50 }
 0x200   : >> { %v1074_v54 = vpop.permute.xlu0 %1073  ;;  %v1140_v22 = vpop.permute.xlu1 %1139 }
 0x201   : >> { %v1089_v21 = vsel %vm1077_vm7, %v1072_v27, %v1074_v54  ;;  %v1156_v11 = vsel %vm1145_vm8, %v7788_v32, %v1140_v22  ;;  %v1659_v40 = vld [vmem:[#allocation2 + $0x200] sm:$0xff] }
 0x202   : >> { %v6285_v18 = vpack.c.bf16 %v1156_v11, %v1088_v10 }
 0x204   : >> { %v1142_v24 = vpop.permute.xlu0 %1141  ;;  %v940_v59 = vpop.permute.xlu1 %939 }
 0x205   : >> { %v1157_v17 = vsel %vm1145_vm8, %v1140_v22, %v1142_v24  ;;  %v954_v41 = vsel %vm941_vm5, %v938_v34, %v940_v59  ;;  %v1672_v53 = vld [vmem:[#allocation2 + $0x268] sm:$0xff] }
 0x206   : >> { %980 = vst.msk [vmem:[#allocation2 + $0x2d0] sm:$0xff] %vm566_vm15, %v954_v41  ;;  %v6307_v49 = vpack.c.bf16 %v1672_v53, %v1659_v40  ;;  %v6283_v14 = vpack.c.bf16 %v1157_v17, %v1089_v21 }
 0x208   : >> { %v1008_v30 = vpop.permute.xlu0 %1007  ;;  %v1208_v58 = vpop.permute.xlu1 %1207  ;;  %6308 = vmatprep.subr.bf16.mxu0 %v6307_v49  ;;  %6284 = vmatprep.subr.bf16.mxu1 %v6283_v14 }
 0x209   : >> { %v1022_v60 = vsel %vm1009_vm6, %v1006_v44, %v1008_v30  ;;  %v1224_v32 = vsel %vm1213_vm9, %v7813_v29, %v1208_v58  ;;  %6310 = vmatpush3.bf16.msra.mxu0 %v6307_v49  ;;  %6286 = vmatpush1.bf16.msra.mxu1 %v6285_v18 }
 0x20a   : >> { %1048 = vst.msk [vmem:[#allocation2 + $0x338] sm:$0xff] %vm566_vm15, %v1022_v60 }
 0x20c   : >> { %v1210_v15 = vpop.permute.xlu0 %1209  ;;  %v1276_v0 = vpop.permute.xlu1 %1275 }
 0x20d   : >> { %v1225_v61 = vsel %vm1213_vm9, %v1208_v58, %v1210_v15  ;;  %v1292_v19 = vsel %vm1281_vm10, %v7825_v52, %v1276_v0  ;;  %v1685_v46 = vld [vmem:[#allocation2 + $0x2d0] sm:$0xff] }
 0x20e   : >> { %v6289_v23 = vpack.c.bf16 %v1292_v19, %v1224_v32 }
 0x210   : >> { %v1278_v38 = vpop.permute.xlu0 %1277  ;;  %v1076_v33 = vpop.permute.xlu1 %1075 }
 0x211   : >> { %v1293_v20 = vsel %vm1281_vm10, %v1276_v0, %v1278_v38  ;;  %v1090_v45 = vsel %vm1077_vm7, %v1074_v54, %v1076_v33  ;;  %v1698_v63 = vld [vmem:[#allocation2 + $0x338] sm:$0xff] }
 0x212   : >> { %1116 = vst.msk [vmem:[#allocation2 + $0x3a0] sm:$0xff] %vm566_vm15, %v1090_v45  ;;  %v6311_v29 = vpack.c.bf16 %v1698_v63, %v1685_v46  ;;  %v6287_v6 = vpack.c.bf16 %v1293_v20, %v1225_v61 }
 0x214   : >> { %v1144_v13 = vpop.permute.xlu0 %1143  ;;  %v1344_v25 = vpop.permute.xlu1 %1343  ;;  %6312 = vmatprep.subr.bf16.mxu0 %v6311_v29  ;;  %6288 = vmatprep.subr.bf16.mxu1 %v6287_v6 }
 0x215   : >> { %v1158_v55 = vsel %vm1145_vm8, %v1142_v24, %v1144_v13  ;;  %v1360_v52 = vsel %vm1349_vm11, %v7841_v31, %v1344_v25  ;;  %6314 = vmatpush3.bf16.msra.mxu0 %v6311_v29  ;;  %6290 = vmatpush1.bf16.msra.mxu1 %v6289_v23 }
 0x216   : >> { %1184 = vst.msk [vmem:[#allocation2 + $0x408] sm:$0xff] %vm566_vm15, %v1158_v55 }
 0x218   : >> { %v1346_v34 = vpop.permute.xlu0 %1345  ;;  %v1412_v35 = vpop.permute.xlu1 %1411 }
 0x219   : >> { %v1361_v62 = vsel %vm1349_vm11, %v1344_v25, %v1346_v34  ;;  %v1428_v8 = vsel %vm1417_vm12, %v7850_v57, %v1412_v35  ;;  %v1711_v26 = vld [vmem:[#allocation2 + $0x3a0] sm:$0xff] }
 0x21a   : >> { %v6293_v27 = vpack.c.bf16 %v1428_v8, %v1360_v52 }
 0x21c   : >> { %v1414_v44 = vpop.permute.xlu0 %1413  ;;  %v1212_v36 = vpop.permute.xlu1 %1211 }
 0x21d   : >> { %v1429_v37 = vsel %vm1417_vm12, %v1412_v35, %v1414_v44  ;;  %v1226_v12 = vsel %vm1213_vm9, %v1210_v15, %v1212_v36  ;;  %v1724_v39 = vld [vmem:[#allocation2 + $0x408] sm:$0xff] }
 0x21e   : >> { %1252 = vst.msk [vmem:[#allocation2 + $0x470] sm:$0xff] %vm566_vm15, %v1226_v12  ;;  %v6315_v31 = vpack.c.bf16 %v1724_v39, %v1711_v26  ;;  %v6291_v43 = vpack.c.bf16 %v1429_v37, %v1361_v62 }
 0x220   : >> { %v1280_v50 = vpop.permute.xlu0 %1279  ;;  %v1480_v10 = vpop.permute.xlu1 %1479  ;;  %6316 = vmatprep.subr.bf16.mxu0 %v6315_v31  ;;  %6292 = vmatprep.subr.bf16.mxu1 %v6291_v43 }
 0x221   : >> { %v1294_v54 = vsel %vm1281_vm10, %v1278_v38, %v1280_v50  ;;  %v1496_v57 = vsel %vm1485_vm13, %v7865_v28, %v1480_v10  ;;  %6318 = vmatpush3.bf16.msra.mxu0 %v6315_v31  ;;  %6294 = vmatpush1.bf16.msra.mxu1 %v6293_v27 }
 0x222   : >> { %1320 = vst.msk [vmem:[#allocation2 + $0x4d8] sm:$0xff] %vm566_vm15, %v1294_v54 }
 0x224   : >> { %v1482_v22 = vpop.permute.xlu0 %1481  ;;  %v1548_v21 = vpop.permute.xlu1 %1547 }
 0x225   : >> { %v1497_v11 = vsel %vm1485_vm13, %v1480_v10, %v1482_v22  ;;  %v1564_v24 = vsel %vm1553_vm14, %v7870_v51, %v1548_v21  ;;  %v1737_v53 = vld [vmem:[#allocation2 + $0x470] sm:$0xff] }
 0x226   : >> { %v6297_v18 = vpack.c.bf16 %v1564_v24, %v1496_v57 }
 0x228   : >> { %v1550_v59 = vpop.permute.xlu0 %1549  ;;  %v1348_v17 = vpop.permute.xlu1 %1347 }
 0x229   : >> { %v1565_v41 = vsel %vm1553_vm14, %v1548_v21, %v1550_v59  ;;  %v1362_v40 = vsel %vm1349_vm11, %v1346_v34, %v1348_v17  ;;  %v1750_v49 = vld [vmem:[#allocation2 + $0x4d8] sm:$0xff] }
 0x22a   : >> { %1388 = vst.msk [vmem:[#allocation2 + $0x540] sm:$0xff] %vm566_vm15, %v1362_v40  ;;  %v6319_v28 = vpack.c.bf16 %v1750_v49, %v1737_v53  ;;  %v6295_v14 = vpack.c.bf16 %v1565_v41, %v1497_v11 }
 0x22c   : >> { %v1416_v30 = vpop.permute.xlu0 %1415  ;;  %v1484_v58 = vpop.permute.xlu1 %1483  ;;  %6320 = vmatprep.subr.bf16.mxu0 %v6319_v28  ;;  %6296 = vmatprep.subr.bf16.mxu1 %v6295_v14 }
 0x22d   : >> { %v1430_v60 = vsel %vm1417_vm12, %v1414_v44, %v1416_v30  ;;  %v1498_v51 = vsel %vm1485_vm13, %v1482_v22, %v1484_v58  ;;  %6322 = vmatpush3.bf16.msra.mxu0 %v6319_v28  ;;  %6298 = vmatpush1.bf16.msra.mxu1 %v6297_v18 }
 0x22e   : >> { %1456 = vst.msk [vmem:[#allocation2 + $0x5a8] sm:$0xff] %vm566_vm15, %v1430_v60  ;;  %1524 = vst.msk [vmem:[#allocation2 + $0x610] sm:$0xff] %vm566_vm15, %v1498_v51 }
 0x230   : >> { %v1552_v32 = vpop.permute.xlu0 %1551  ;;  %2265 = vmatmul.mubr.f32.vlgmr.msra.gmra.mrb[8].mxu1 %v7875_v48 }
 0x231   : >> { %v1566_v15 = vsel %vm1553_vm14, %v1550_v59, %v1552_v32  ;;  %2270 = vmatprep.mubr.f32.mxu1 %v10312_v16  ;;  %v1763_v0 = vld [vmem:[#allocation2 + $0x540] sm:$0xff] }
 0x232   : >> { %1592 = vst.msk [vmem:[#allocation2 + $0x678] sm:$0xff] %vm566_vm15, %v1566_v15 }
 0x234   : >> { %2271 = vmatmul.mubr.f32.gmra.mrb[10].mxu1 %v7886_v56 }
 0x235   : >> { %v1776_v61 = vld [vmem:[#allocation2 + $0x5a8] sm:$0xff]  ;;  %3471 = vmatprep.mubr.f32.mxu1 %v10312_v16  ;;  %v1789_v20 = vld [vmem:[#allocation2 + $0x610] sm:$0xff] }
 0x236   : >> { %v6323_v19 = vpack.c.bf16 %v1776_v61, %v1763_v0 }
 0x237   : >> { %v1958_v38 = vpop.f32.mrb[0].mxu1 }
 0x238   : >> { %6324 = vmatprep.subr.bf16.mxu0 %v6323_v19  ;;  %v1960_v33 = vpop.f32.mrb[1].mxu1 }
 0x239   : >> { %6326 = vmatpush3.bf16.msra.mxu0 %v6323_v19  ;;  %v1802_v45 = vld [vmem:[#allocation2 + $0x678] sm:$0xff] }
 0x23a   : >> { %v6327_v48 = vpack.c.bf16 %v1802_v45, %v1789_v20 }
 0x23b   : >> { %v1964_v46 = vpop.f32.mrb[2].mxu1 }
 0x23c   : >> { %6328 = vmatprep.subr.bf16.mxu0 %v6327_v48  ;;  %v1966_v63 = vpop.f32.mrb[3].mxu1 }
 0x23d   : >> { %v7969_v29 = vpop.permute.xlu1 %1807  ;;  %6330 = vmatpush3.bf16.msra.mxu0 %v6327_v48 }
 0x23e   : >> { %v7973_v6 = vadd.f32 %v7848_v47, %v7969_v29  ;;  %v7976_v23 = vadd.f32 %v1960_v33, %v7969_v29  ;;  %v7979_v25 = vadd.f32 %v1958_v38, %v7969_v29 }
 0x23f   : >> { %v2035_v13 = vpop.f32.mrb[4].mxu0 }
 0x240   : >> { %6054 = vmatmul.mubr.f32.vlgmr.msra.gmra.mrb[12].mxu0 %v7886_v56  ;;  %2380 = vrot.lane.b32.xlu1 %v7973_v6, %s10346_s30  ;;  %v2037_v55 = vpop.f32.mrb[5].mxu0  ;;  %v7996_v56 = vadd.f32 %v2035_v13, %v7969_v29 }
 0x241   : >> { %2384 = vrot.lane.b32.xlu0 %v7976_v23, %s10346_s30  ;;  %v7986_v52 = vpop.permute.xlu0 %1812  ;;  %3649 = vmatprep.mubr.f32.mxu0 %v10312_v16 }
 0x242   : >> { %v7991_v47 = vadd.f32 %v7858_v42, %v7986_v52  ;;  %v8001_v62 = vadd.f32 %v1966_v63, %v7986_v52  ;;  %v8004_v8 = vadd.f32 %v1964_v46, %v7986_v52  ;;  %v8012_v42 = vadd.f32 %v7846_v9, %v7969_v29 }
 0x243   : >> { %v2041_v34 = vpop.f32.mrb[6].mxu0  ;;  %v8025_v36 = vadd.f32 %v7856_v7, %v7986_v52  ;;  %v8064_v9 = vadd.f32 %v2037_v55, %v7969_v29 }
 0x244   : >> { %2382 = vrot.lane.b32.xlu1 %v7979_v25, %s10346_s30  ;;  %v2043_v35 = vpop.f32.mrb[7].mxu0  ;;  %v8017_v44 = vadd.f32 %v2041_v34, %v7986_v52 }
 0x245   : >> { %2406 = vrot.lane.b32.xlu0 %v7991_v47, %s10346_s30  ;;  %v8075_v7 = vadd.f32 %v2043_v35, %v7986_v52 }
 0x248   : >> { %2386 = vrot.lane.b32.xlu1 %v7996_v56, %s10346_s30 }
 0x249   : >> { %2410 = vrot.lane.b32.xlu0 %v8001_v62, %s10346_s30 }
 0x24c   : >> { %2408 = vrot.lane.b32.xlu1 %v8004_v8, %s10346_s30 }
 0x24d   : >> { %2378 = vrot.lane.b32.xlu0 %v8012_v42, %s10346_s30 }
 0x250   : >> { %2412 = vrot.lane.b32.xlu1 %v8017_v44, %s10346_s30 }
 0x251   : >> { %2508 = vrot.lane.b32.xlu0 %v7973_v6, %s10340_s26 }
 0x254   : >> { %2404 = vrot.lane.b32.xlu1 %v8025_v36, %s10346_s30 }
 0x255   : >> { %2512 = vrot.lane.b32.xlu0 %v7976_v23, %s10340_s26 }
 0x258   : >> { %2510 = vrot.lane.b32.xlu1 %v7979_v25, %s10340_s26 }
 0x259   : >> { %2534 = vrot.lane.b32.xlu0 %v7991_v47, %s10340_s26 }
 0x25c   : >> { %2514 = vrot.lane.b32.xlu1 %v7996_v56, %s10340_s26 }
 0x25d   : >> { %2538 = vrot.lane.b32.xlu0 %v8001_v62, %s10340_s26 }
 0x260   : >> { %2536 = vrot.lane.b32.xlu1 %v8004_v8, %s10340_s26 }
 0x261   : >> { %2506 = vrot.lane.b32.xlu0 %v8012_v42, %s10340_s26 }
 0x264   : >> { %2540 = vrot.lane.b32.xlu1 %v8017_v44, %s10340_s26 }
 0x265   : >> { %2636 = vrot.lane.b32.xlu0 %v7973_v6, %s10349_s16 }
 0x268   : >> { %2532 = vrot.lane.b32.xlu1 %v8025_v36, %s10340_s26 }
 0x269   : >> { %2640 = vrot.lane.b32.xlu0 %v7976_v23, %s10349_s16 }
 0x26c   : >> { %2638 = vrot.lane.b32.xlu1 %v7979_v25, %s10349_s16 }
 0x26d   : >> { %2662 = vrot.lane.b32.xlu0 %v7991_v47, %s10349_s16 }
 0x270   : >> { %2642 = vrot.lane.b32.xlu1 %v7996_v56, %s10349_s16 }
 0x271   : >> { %2666 = vrot.lane.b32.xlu0 %v8001_v62, %s10349_s16 }
 0x274   : >> { %2664 = vrot.lane.b32.xlu1 %v8004_v8, %s10349_s16 }
 0x275   : >> { %2634 = vrot.lane.b32.xlu0 %v8012_v42, %s10349_s16 }
 0x278   : >> { %2668 = vrot.lane.b32.xlu1 %v8017_v44, %s10349_s16 }
 0x279   : >> { %2388 = vrot.lane.b32.xlu0 %v8064_v9, %s10346_s30 }
 0x27c   : >> { %2660 = vrot.lane.b32.xlu1 %v8025_v36, %s10349_s16 }
 0x27d   : >> { %2516 = vrot.lane.b32.xlu0 %v8064_v9, %s10340_s26 }
 0x280   : >> { %2414 = vrot.lane.b32.xlu1 %v8075_v7, %s10346_s30 }
 0x281   : >> { %2644 = vrot.lane.b32.xlu0 %v8064_v9, %s10349_s16 }
 0x284   : >> { %2542 = vrot.lane.b32.xlu1 %v8075_v7, %s10340_s26 }
 0x288   : >> { %2670 = vrot.lane.b32.xlu1 %v8075_v7, %s10349_s16 }
 0x2af   : >> { %v2112_v37 = vpop.f32.mrb[4].mxu1 }
 0x2b0   : >> { %v8088_v12 = vadd.f32 %v2112_v37, %v7969_v29  ;;  %v2114_v26 = vpop.f32.mrb[5].mxu1 }
 0x2b1   : >> { %v8100_v50 = vadd.f32 %v2114_v26, %v7969_v29 }
 0x2b2   : >> { %2390 = vrot.lane.b32.xlu0 %v8088_v12, %s10346_s30  ;;  %v8102_v54 = vpop.permute.xlu1 %2380 }
 0x2b3   : >> { %v2118_v39 = vpop.f32.mrb[6].mxu1  ;;  %10354 = vst [vmem:[#allocation12_spill] sm:$0xff] %v8100_v50  ;;  %v8120_v59 = vpop.permute.xlu0 %2384 }
 0x2b4   : >> { %v8093_v31 = vadd.f32 %v2118_v39, %v7986_v52  ;;  %v2120_v43 = vpop.f32.mrb[7].mxu1 }
 0x2b5   : >> { %v8109_v22 = vadd.f32 %v2120_v43, %v7986_v52 }
 0x2b6   : >> { %2416 = vrot.lane.b32.xlu1 %v8093_v31, %s10346_s30  ;;  %2518 = vrot.lane.b32.xlu0 %v8088_v12, %s10340_s26  ;;  %v8118_v24 = vpop.permute.xlu1 %2382 }
 0x2b7   : >> { %v2189_v27 = vpop.f32.mrb[8].mxu0  ;;  %10355 = vst [vmem:[#allocation13_spill] sm:$0xff] %v8109_v22  ;;  %v8131_v40 = vpop.permute.xlu0 %2406 }
 0x2b8   : >> { %v2191_v10 = vpop.f32.mrb[9].mxu0  ;;  %v8112_v21 = vadd.f32 %v2189_v27, %v7969_v29 }
 0x2b9   : >> { %v8158_v18 = vadd.f32 %v2191_v10, %v7969_v29 }
 0x2ba   : >> { %2544 = vrot.lane.b32.xlu1 %v8093_v31, %s10340_s26  ;;  %2392 = vrot.lane.b32.xlu0 %v8100_v50, %s10346_s30  ;;  %10356 = vst [vmem:[#allocation14_spill] sm:$0xff] %v8112_v21  ;;  %v8129_v41 = vpop.permute.xlu1 %2386 }
 0x2bb   : >> { %v2195_v57 = vpop.f32.mrb[10].mxu0  ;;  %v8143_v49 = vpop.permute.xlu0 %2410  ;;  %10358 = vst [vmem:[#allocation16_spill] sm:$0xff] %v8158_v18 }
 0x2bc   : >> { %v2197_v11 = vpop.f32.mrb[11].mxu0  ;;  %v8123_v17 = vadd.f32 %v2195_v57, %v7986_v52 }
 0x2bd   : >> { %v8167_v58 = vadd.f32 %v2197_v11, %v7986_v52 }
 0x2be   : >> { %2394 = vrot.lane.b32.xlu1 %v8112_v21, %s10346_s30  ;;  %2418 = vrot.lane.b32.xlu0 %v8109_v22, %s10346_s30  ;;  %10357 = vst [vmem:[#allocation15_spill] sm:$0xff] %v8123_v17  ;;  %v8141_v53 = vpop.permute.xlu1 %2408 }
 0x2bf   : >> { %v8151_v14 = vpop.permute.xlu0 %2378  ;;  %10359 = vst [vmem:[#allocation17_spill] sm:$0xff] %v8167_v58 }
 0x2c2   : >> { %2420 = vrot.lane.b32.xlu1 %v8123_v17, %s10346_s30  ;;  %2646 = vrot.lane.b32.xlu0 %v8088_v12, %s10349_s16  ;;  %v8149_v28 = vpop.permute.xlu1 %2412 }
 0x2c3   : >> { %v8169_v60 = vpop.permute.xlu0 %2508 }
 0x2c6   : >> { %2672 = vrot.lane.b32.xlu1 %v8093_v31, %s10349_s16  ;;  %2520 = vrot.lane.b32.xlu0 %v8100_v50, %s10340_s26  ;;  %v8164_v30 = vpop.permute.xlu1 %2404 }
 0x2c7   : >> { %v8177_v32 = vpop.permute.xlu0 %2512 }
 0x2ca   : >> { %2522 = vrot.lane.b32.xlu1 %v8112_v21, %s10340_s26  ;;  %2546 = vrot.lane.b32.xlu0 %v8109_v22, %s10340_s26  ;;  %v8175_v51 = vpop.permute.xlu1 %2510 }
 0x2cb   : >> { %v8187_v0 = vpop.permute.xlu0 %2534 }
 0x2ce   : >> { %2548 = vrot.lane.b32.xlu1 %v8123_v17, %s10340_s26  ;;  %2648 = vrot.lane.b32.xlu0 %v8100_v50, %s10349_s16  ;;  %v8185_v15 = vpop.permute.xlu1 %2514 }
 0x2cf   : >> { %v8191_v19 = vpop.permute.xlu0 %2538 }
 0x2d2   : >> { %2650 = vrot.lane.b32.xlu1 %v8112_v21, %s10349_s16  ;;  %2674 = vrot.lane.b32.xlu0 %v8109_v22, %s10349_s16  ;;  %v8189_v61 = vpop.permute.xlu1 %2536  ;;  %v2432_v22 = vsel %vm805_vm3, %v8118_v24, %v8120_v59 }
 0x2d3   : >> { %v8195_v33 = vpop.permute.xlu0 %2506 }
 0x2d6   : >> { %2676 = vrot.lane.b32.xlu1 %v8123_v17, %s10349_s16  ;;  %2396 = vrot.lane.b32.xlu0 %v8158_v18, %s10346_s30  ;;  %v8193_v38 = vpop.permute.xlu1 %2540 }
 0x2d7   : >> { %v8199_v45 = vpop.permute.xlu0 %2636 }
 0x2da   : >> { %2422 = vrot.lane.b32.xlu1 %v8167_v58, %s10346_s30  ;;  %2524 = vrot.lane.b32.xlu0 %v8158_v18, %s10340_s26  ;;  %v8197_v20 = vpop.permute.xlu1 %2532 }
 0x2db   : >> { %v8203_v46 = vpop.permute.xlu0 %2640 }
 0x2de   : >> { %2550 = vrot.lane.b32.xlu1 %v8167_v58, %s10340_s26  ;;  %2652 = vrot.lane.b32.xlu0 %v8158_v18, %s10349_s16  ;;  %v8201_v48 = vpop.permute.xlu1 %2638 }
 0x2df   : >> { %v8207_v13 = vpop.permute.xlu0 %2662 }
 0x2e2   : >> { %2678 = vrot.lane.b32.xlu1 %v8167_v58, %s10349_s16  ;;  %v8205_v63 = vpop.permute.xlu1 %2642  ;;  %v2687_v58 = vsel %vm1349_vm11, %v8199_v45, %v8201_v48 }
 0x2e3   : >> { %v8216_v39 = vpop.permute.xlu0 %2666 }
 0x2e6   : >> { %v8214_v37 = vpop.permute.xlu1 %2664 }
 0x2e7   : >> { %v8230_v11 = vpop.permute.xlu0 %2634 }
 0x2ea   : >> { %v8228_v57 = vpop.permute.xlu1 %2668 }
 0x2eb   : >> { %v8243_v16 = vpop.permute.xlu0 %2388 }
 0x2ef   : >> { %v8257_v5 = vpop.permute.xlu0 %2516 }
 0x303   : >> { %v2266_v55 = vpop.f32.mrb[8].mxu1 }
 0x304   : >> { %v8210_v34 = vadd.f32 %v2266_v55, %v7969_v29  ;;  %v2268_v35 = vpop.f32.mrb[9].mxu1 }
 0x305   : >> { %v8226_v10 = vadd.f32 %v2268_v35, %v7969_v29 }
 0x306   : >> { %10360 = vst [vmem:[#allocation18_spill] sm:$0xff] %v8210_v34  ;;  %2398 = vrot.lane.b32.xlu0 %v8210_v34, %s10346_s30 }
 0x307   : >> { %v2272_v26 = vpop.f32.mrb[10].mxu1  ;;  %10362 = vst [vmem:[#allocation20_spill] sm:$0xff] %v8226_v10 }
 0x308   : >> { %v8219_v43 = vadd.f32 %v2272_v26, %v7986_v52  ;;  %v2274_v27 = vpop.f32.mrb[11].mxu1  ;;  %v8241_v26 = vpop.permute.xlu1 %2660 }
 0x309   : >> { %v8237_v55 = vadd.f32 %v2274_v27, %v7986_v52 }
 0x30a   : >> { %10361 = vst [vmem:[#allocation19_spill] sm:$0xff] %v8219_v43  ;;  %2424 = vrot.lane.b32.xlu1 %v8219_v43, %s10346_s30  ;;  %2526 = vrot.lane.b32.xlu0 %v8210_v34, %s10340_s26 }
 0x30b   : >> { %10363 = vst [vmem:[#allocation21_spill] sm:$0xff] %v8237_v55 }
 0x30c   : >> { %v8252_v27 = vpop.permute.xlu1 %2414 }
 0x30e   : >> { %2552 = vrot.lane.b32.xlu1 %v8219_v43, %s10340_s26  ;;  %2400 = vrot.lane.b32.xlu0 %v8226_v10, %s10346_s30 }
 0x312   : >> { %2426 = vrot.lane.b32.xlu0 %v8237_v55, %s10346_s30 }
 0x313   : >> { %v6055_v35 = vpop.f32.mrb[12].mxu0 }
 0x314   : >> { %v2343_v2 = vpop.f32.mrb[13].mxu0  ;;  %v8255_v4 = vadd.f32 %v6055_v35, %v7986_v52  ;;  %v2431_v52 = vsel %vm805_vm3, %v8102_v54, %v8118_v24  ;;  %v2559_v35 = vsel %vm1077_vm7, %v8169_v60, %v8175_v51 }
 0x315   : >> { %v8246_v3 = vadd.f32 %v2343_v2, %v7969_v29  ;;  %v8265_v2 = vpop.permute.xlu1 %2542  ;;  %v8269_v29 = vpop.permute.xlu0 %2644  ;;  %v2481_v1 = vmax.f32 %v7973_v6, %v2431_v52  ;;  %v2561_v6 = vsel %vm1077_vm7, %v8177_v32, %v8185_v15 }
 0x316   : >> { %2654 = vrot.lane.b32.xlu0 %v8210_v34, %s10349_s16 }
 0x317   : >> { %2402 = vrot.lane.b32.xlu1 %v8246_v3, %s10346_s30  ;;  %v2609_v18 = vmax.f32 %v2481_v1, %v2559_v35  ;;  %v2444_v1 = vsel %vm805_vm3, %v8141_v53, %v8143_v49  ;;  %v2689_v35 = vsel %vm1349_vm11, %v8203_v46, %v8205_v63 }
 0x319   : >> { %v8300_v17 = vmax.f32 %v2609_v18, %v2687_v58  ;;  %v2495_v18 = vmax.f32 %v8004_v8, %v2444_v1  ;;  %v2560_v58 = vsel %vm1077_vm7, %v8175_v51, %v8177_v32  ;;  %v2443_v8 = vsel %vm805_vm3, %v8131_v40, %v8141_v53 }
 0x31a   : >> { %2528 = vrot.lane.b32.xlu0 %v8226_v10, %s10340_s26  ;;  %v2494_v32 = vmax.f32 %v7991_v47, %v2443_v8 }
 0x31b   : >> { %2428 = vrot.lane.b32.xlu1 %v8255_v4, %s10346_s30 }
 0x31e   : >> { %2554 = vrot.lane.b32.xlu0 %v8237_v55, %s10340_s26 }
 0x31f   : >> { %2680 = vrot.lane.b32.xlu1 %v8219_v43, %s10349_s16  ;;  %v2433_v43 = vsel %vm805_vm3, %v8120_v59, %v8129_v41  ;;  %v2482_v59 = vmax.f32 %v7979_v25, %v2432_v22 }
 0x320   : >> { %v2483_v52 = vmax.f32 %v7976_v23, %v2433_v43  ;;  %v2572_v23 = vsel %vm1077_vm7, %v8189_v61, %v8191_v19 }
 0x321   : >> { %v2623_v1 = vmax.f32 %v2495_v18, %v2572_v23  ;;  %v2610_v25 = vmax.f32 %v2482_v59, %v2560_v58  ;;  %v2442_v23 = vsel %vm805_vm3, %v8164_v30, %v8131_v40  ;;  %v2701_v18 = vsel %vm1349_vm11, %v8216_v39, %v8228_v57 }
 0x322   : >> { %2656 = vrot.lane.b32.xlu0 %v8226_v10, %s10349_s16  ;;  %v8290_v10 = vpop.permute.xlu1 %2670  ;;  %v2611_v50 = vmax.f32 %v2483_v52, %v2561_v6  ;;  %v2430_v6 = vsel %vm805_vm3, %v8151_v14, %v8102_v54  ;;  %v2700_v52 = vsel %vm1349_vm11, %v8214_v37, %v8216_v39  ;;  %v2558_v54 = vsel %vm1077_vm7, %v8195_v33, %v8169_v60 }
 0x323   : >> { %2530 = vrot.lane.b32.xlu1 %v8246_v3, %s10340_s26  ;;  %v2480_v53 = vmax.f32 %v8012_v42, %v2430_v6  ;;  %v2571_v14 = vsel %vm1077_vm7, %v8187_v0, %v8189_v61  ;;  %v8356_v51 = vmax.f32 %v2623_v1, %v2700_v52  ;;  %v2686_v60 = vsel %vm1349_vm11, %v8230_v11, %v8199_v45 }
 0x324   : >> { %v8282_v34 = vpop.permute.xlu0 %2390  ;;  %v8326_v43 = vmax.f32 %v2611_v50, %v2689_v35  ;;  %v2688_v50 = vsel %vm1349_vm11, %v8201_v48, %v8203_v46  ;;  %v2445_v33 = vsel %vm805_vm3, %v8143_v49, %v8149_v28  ;;  %v2699_v42 = vsel %vm1349_vm11, %v8207_v13, %v8214_v37 }
 0x325   : >> { %v8359_v48 = vmax.f32 %v2610_v25, %v2688_v50  ;;  %v2608_v46 = vmax.f32 %v2480_v53, %v2558_v54  ;;  %v2622_v47 = vmax.f32 %v2494_v32, %v2571_v14  ;;  %v2573_v45 = vsel %vm1077_vm7, %v8191_v19, %v8193_v38 }
 0x326   : >> { %2682 = vrot.lane.b32.xlu0 %v8237_v55, %s10349_s16  ;;  %v2496_v49 = vmax.f32 %v8001_v62, %v2445_v33  ;;  %v2570_v62 = vsel %vm1077_vm7, %v8197_v20, %v8187_v0  ;;  %v2493_v59 = vmax.f32 %v8025_v36, %v2442_v23  ;;  %v2698_v40 = vsel %vm1349_vm11, %v8241_v26, %v8207_v13 }
 0x327   : >> { %2556 = vrot.lane.b32.xlu1 %v8255_v4, %s10340_s26  ;;  %v8379_v11 = vmax.f32 %v2608_v46, %v2686_v60  ;;  %v8382_v35 = vmax.f32 %v2622_v47, %v2699_v42  ;;  %v2434_v36 = vsel %vm805_vm3, %v8129_v41, %v8243_v16  ;;  %v2562_v13 = vsel %vm1077_vm7, %v8185_v15, %v8257_v5 }
 0x328   : >> { %v8302_v21 = vpop.permute.xlu0 %2518  ;;  %v8310_v55 = vpop.permute.xlu1 %2416  ;;  %v2624_v19 = vmax.f32 %v2496_v49, %v2573_v45  ;;  %v2621_v30 = vmax.f32 %v2493_v59, %v2570_v62  ;;  %v2484_v26 = vmax.f32 %v7996_v56, %v2434_v36  ;;  %v2690_v1 = vsel %vm1349_vm11, %v8205_v63, %v8269_v29 }
 0x329   : >> { %v2435_v56 = vsel %vm805_vm3, %v8243_v16, %v8282_v34  ;;  %v2446_v25 = vsel %vm805_vm3, %v8149_v28, %v8252_v27  ;;  %v2563_v54 = vsel %vm1077_vm7, %v8257_v5, %v8302_v21  ;;  %v2574_v53 = vsel %vm1077_vm7, %v8193_v38, %v8265_v2 }
 0x32a   : >> { %2790 = vrot.lane.b32.xlu0 %v8300_v17, %s10353_s15  ;;  %v8400_v6 = vmax.f32 %v2624_v19, %v2701_v18  ;;  %v8411_v52 = vmax.f32 %v2621_v30, %v2698_v40  ;;  %v2612_v41 = vmax.f32 %v2484_v26, %v2562_v13  ;;  %v2485_v16 = vmax.f32 %v8064_v9, %v2435_v56  ;;  %v10364_v30 = vld [vmem:[#allocation12_spill] sm:$0xff] }
 0x32b   : >> { %2658 = vrot.lane.b32.xlu1 %v8246_v3, %s10349_s16  ;;  %v2497_v14 = vmax.f32 %v8017_v44, %v2446_v25  ;;  %v2702_v5 = vsel %vm1349_vm11, %v8228_v57, %v8290_v10  ;;  %v2447_v57 = vsel %vm805_vm3, %v8252_v27, %v8310_v55 }
 0x32c   : >> { %v8328_v24 = vpop.permute.xlu0 %2392  ;;  %v8350_v22 = vpop.permute.xlu1 %2544  ;;  %v8441_v15 = vmax.f32 %v2612_v41, %v2690_v1  ;;  %v2613_v60 = vmax.f32 %v2485_v16, %v2563_v54  ;;  %v2498_v45 = vmax.f32 %v8075_v7, %v2447_v57  ;;  %v10365_v1 = vld [vmem:[#allocation13_spill] sm:$0xff] }
 0x32d   : >> { %v2625_v33 = vmax.f32 %v2497_v14, %v2574_v53  ;;  %v2575_v47 = vsel %vm1077_vm7, %v8265_v2, %v8350_v22 }
 0x32e   : >> { %2794 = vrot.lane.b32.xlu0 %v8326_v43, %s10353_s15  ;;  %v2626_v19 = vmax.f32 %v2498_v45, %v2575_v47 }
 0x32f   : >> { %2684 = vrot.lane.b32.xlu1 %v8255_v4, %s10349_s16  ;;  %v8474_v38 = vmax.f32 %v2625_v33, %v2702_v5 }
 0x330   : >> { %v8370_v61 = vpop.permute.xlu0 %2418  ;;  %v8384_v37 = vpop.permute.xlu1 %2394 }
 0x331   : >> { %v2448_v27 = vsel %vm805_vm3, %v8310_v55, %v8370_v61 }
 0x332   : >> { %2818 = vrot.lane.b32.xlu0 %v8356_v51, %s10353_s15  ;;  %v2499_v7 = vmax.f32 %v8093_v31, %v2448_v27 }
 0x333   : >> { %2792 = vrot.lane.b32.xlu1 %v8359_v48, %s10353_s15 }
 0x334   : >> { %v2647_v58 = vpop.permute.xlu0 %2646  ;;  %v8407_v39 = vpop.permute.xlu1 %2420 }
 0x335   : >> { %v2691_v28 = vsel %vm1349_vm11, %v8269_v29, %v2647_v58  ;;  %v2436_v29 = vsel %vm805_vm3, %v8282_v34, %v8328_v24 }
 0x336   : >> { %2788 = vrot.lane.b32.xlu0 %v8379_v11, %s10353_s15  ;;  %v8472_v9 = vmax.f32 %v2613_v60, %v2691_v28  ;;  %v2486_v34 = vmax.f32 %v8088_v12, %v2436_v29  ;;  %v10367_v29 = vld [vmem:[#allocation15_spill] sm:$0xff] }
 0x337   : >> { %2816 = vrot.lane.b32.xlu1 %v8382_v35, %s10353_s15 }
 0x338   : >> { %v8413_v0 = vpop.permute.xlu0 %2520  ;;  %v2673_v20 = vpop.permute.xlu1 %2672 }
 0x339   : >> { %v2564_v46 = vsel %vm1077_vm7, %v8302_v21, %v8413_v0  ;;  %v2703_v21 = vsel %vm1349_vm11, %v8290_v10, %v2673_v20 }
 0x33a   : >> { %2918 = vrot.lane.b32.xlu0 %v8300_v17, %s10344_s19  ;;  %v2614_v23 = vmax.f32 %v2486_v34, %v2564_v46  ;;  %v8510_v2 = vmax.f32 %v2626_v19, %v2703_v21  ;;  %v10368_v19 = vld [vmem:[#allocation16_spill] sm:$0xff] }
 0x33b   : >> { %2820 = vrot.lane.b32.xlu1 %v8400_v6, %s10353_s15 }
 0x33c   : >> { %v8430_v8 = vpop.permute.xlu0 %2546  ;;  %v8437_v50 = vpop.permute.xlu1 %2522 }
 0x33d   : >> { %v2576_v12 = vsel %vm1077_vm7, %v8350_v22, %v8430_v8  ;;  %v2565_v31 = vsel %vm1077_vm7, %v8413_v0, %v8437_v50 }
 0x33e   : >> { %2922 = vrot.lane.b32.xlu0 %v8326_v43, %s10344_s19  ;;  %v2627_v59 = vmax.f32 %v2499_v7, %v2576_v12 }
 0x33f   : >> { %2814 = vrot.lane.b32.xlu1 %v8411_v52, %s10353_s15 }
 0x340   : >> { %v2649_v63 = vpop.permute.xlu0 %2648  ;;  %v8463_v32 = vpop.permute.xlu1 %2548 }
 0x341   : >> { %v2692_v49 = vsel %vm1349_vm11, %v2647_v58, %v2649_v63  ;;  %v2437_v58 = vsel %vm805_vm3, %v8328_v24, %v8384_v37  ;;  %v2449_v24 = vsel %vm805_vm3, %v8370_v61, %v8407_v39  ;;  %v2577_v0 = vsel %vm1077_vm7, %v8430_v8, %v8463_v32  ;;  %v10366_v8 = vld [vmem:[#allocation14_spill] sm:$0xff] }
 0x342   : >> { %2946 = vrot.lane.b32.xlu0 %v8356_v51, %s10344_s19  ;;  %v8508_v55 = vmax.f32 %v2614_v23, %v2692_v49  ;;  %v2487_v36 = vmax.f32 %v10364_v30, %v2437_v58  ;;  %v2500_v41 = vmax.f32 %v10365_v1, %v2449_v24 }
 0x343   : >> { %2920 = vrot.lane.b32.xlu1 %v8359_v48, %s10344_s19 }
 0x344   : >> { %v2675_v44 = vpop.permute.xlu0 %2674  ;;  %v2651_v42 = vpop.permute.xlu1 %2650  ;;  %v2615_v13 = vmax.f32 %v2487_v36, %v2565_v31  ;;  %v2628_v54 = vmax.f32 %v2500_v41, %v2577_v0 }
 0x345   : >> { %v2704_v10 = vsel %vm1349_vm11, %v2673_v20, %v2675_v44  ;;  %v2693_v20 = vsel %vm1349_vm11, %v2649_v63, %v2651_v42 }
 0x346   : >> { %2916 = vrot.lane.b32.xlu0 %v8379_v11, %s10344_s19  ;;  %v8523_v22 = vmax.f32 %v2627_v59, %v2704_v10  ;;  %v8538_v56 = vmax.f32 %v2615_v13, %v2693_v20 }
 0x347   : >> { %2944 = vrot.lane.b32.xlu1 %v8382_v35, %s10344_s19 }
 0x348   : >> { %v2397_v18 = vpop.permute.xlu0 %2396  ;;  %v2677_v62 = vpop.permute.xlu1 %2676 }
 0x349   : >> { %v2438_v61 = vsel %vm805_vm3, %v8384_v37, %v2397_v18  ;;  %v2705_v25 = vsel %vm1349_vm11, %v2675_v44, %v2677_v62 }
 0x34a   : >> { %2796 = vrot.lane.b32.xlu0 %v8441_v15, %s10353_s15  ;;  %v2488_v16 = vmax.f32 %v10366_v8, %v2438_v61  ;;  %v8550_v14 = vmax.f32 %v2628_v54, %v2705_v25 }
 0x34b   : >> { %2948 = vrot.lane.b32.xlu1 %v8400_v6, %s10344_s19 }
 0x34c   : >> { %v2525_v40 = vpop.permute.xlu0 %2524  ;;  %v2423_v26 = vpop.permute.xlu1 %2422 }
 0x34d   : >> { %v2566_v53 = vsel %vm1077_vm7, %v8437_v50, %v2525_v40  ;;  %v2450_v50 = vsel %vm805_vm3, %v8407_v39, %v2423_v26 }
 0x34e   : >> { %2924 = vrot.lane.b32.xlu0 %v8441_v15, %s10344_s19  ;;  %v2616_v5 = vmax.f32 %v2488_v16, %v2566_v53  ;;  %v2501_v57 = vmax.f32 %v10367_v29, %v2450_v50 }
 0x34f   : >> { %2942 = vrot.lane.b32.xlu1 %v8411_v52, %s10344_s19 }
 0x350   : >> { %v2653_v63 = vpop.permute.xlu0 %2652  ;;  %v2551_v28 = vpop.permute.xlu1 %2550 }
 0x351   : >> { %v2694_v37 = vsel %vm1349_vm11, %v2651_v42, %v2653_v63  ;;  %v2578_v44 = vsel %vm1077_vm7, %v8463_v32, %v2551_v28 }
 0x352   : >> { %2798 = vrot.lane.b32.xlu0 %v8472_v9, %s10353_s15  ;;  %v8557_v60 = vmax.f32 %v2616_v5, %v2694_v37  ;;  %v2629_v42 = vmax.f32 %v2501_v57, %v2578_v44  ;;  %v10371_v5 = vld [vmem:[#allocation19_spill] sm:$0xff] }
 0x353   : >> { %2822 = vrot.lane.b32.xlu1 %v8474_v38, %s10353_s15 }
 0x354   : >> { %v2679_v33 = vpop.permute.xlu1 %2678 }
 0x355   : >> { %v2706_v46 = vsel %vm1349_vm11, %v2677_v62, %v2679_v33 }
 0x356   : >> { %2926 = vrot.lane.b32.xlu0 %v8472_v9, %s10344_s19  ;;  %v8573_v39 = vmax.f32 %v2629_v42, %v2706_v46 }
 0x357   : >> { %2950 = vrot.lane.b32.xlu1 %v8474_v38, %s10344_s19 }
 0x35a   : >> { %2800 = vrot.lane.b32.xlu0 %v8508_v55, %s10353_s15 }
 0x35b   : >> { %2824 = vrot.lane.b32.xlu1 %v8510_v2, %s10353_s15 }
 0x35e   : >> { %2826 = vrot.lane.b32.xlu0 %v8523_v22, %s10353_s15 }
 0x35f   : >> { %2952 = vrot.lane.b32.xlu1 %v8510_v2, %s10344_s19 }
 0x362   : >> { %2928 = vrot.lane.b32.xlu0 %v8508_v55, %s10344_s19 }
 0x363   : >> { %2802 = vrot.lane.b32.xlu1 %v8538_v56, %s10353_s15 }
 0x366   : >> { %2954 = vrot.lane.b32.xlu0 %v8523_v22, %s10344_s19 }
 0x367   : >> { %2828 = vrot.lane.b32.xlu1 %v8550_v14, %s10353_s15 }
 0x36a   : >> { %2804 = vrot.lane.b32.xlu0 %v8557_v60, %s10353_s15 }
 0x36b   : >> { %2930 = vrot.lane.b32.xlu1 %v8538_v56, %s10344_s19 }
 0x36e   : >> { %2932 = vrot.lane.b32.xlu0 %v8557_v60, %s10344_s19 }
 0x36f   : >> { %2956 = vrot.lane.b32.xlu1 %v8550_v14, %s10344_s19 }
 0x373   : >> { %2830 = vrot.lane.b32.xlu1 %v8573_v39, %s10353_s15 }
 0x377   : >> { %2958 = vrot.lane.b32.xlu1 %v8573_v39, %s10344_s19 }
 0x378   : >> { %v2399_v32 = vpop.permute.xlu0 %2398 }
 0x379   : >> { %v2439_v27 = vsel %vm805_vm3, %v2397_v18, %v2399_v32 }
 0x37a   : >> { %v2489_v12 = vmax.f32 %v10368_v19, %v2439_v27 }
 0x37c   : >> { %v2527_v47 = vpop.permute.xlu0 %2526  ;;  %v2425_v34 = vpop.permute.xlu1 %2424 }
 0x37d   : >> { %v2567_v21 = vsel %vm1077_vm7, %v2525_v40, %v2527_v47  ;;  %v2451_v31 = vsel %vm805_vm3, %v2423_v26, %v2425_v34  ;;  %v10369_v40 = vld [vmem:[#allocation17_spill] sm:$0xff]  ;;  %v10370_v26 = vld [vmem:[#allocation18_spill] sm:$0xff] }
 0x37e   : >> { %v2617_v7 = vmax.f32 %v2489_v12, %v2567_v21  ;;  %v2502_v24 = vmax.f32 %v10369_v40, %v2451_v31 }
 0x380   : >> { %v2401_v45 = vpop.permute.xlu0 %2400  ;;  %v2553_v23 = vpop.permute.xlu1 %2552 }
 0x381   : >> { %v2579_v36 = vsel %vm1077_vm7, %v2551_v28, %v2553_v23  ;;  %v2440_v20 = vsel %vm805_vm3, %v2399_v32, %v2401_v45 }
 0x382   : >> { %v2630_v0 = vmax.f32 %v2502_v24, %v2579_v36  ;;  %v2490_v61 = vmax.f32 %v10370_v26, %v2440_v20 }
 0x384   : >> { %v2427_v49 = vpop.permute.xlu0 %2426 }
 0x388   : >> { %v2655_v10 = vpop.permute.xlu0 %2654 }
 0x389   : >> { %v2403_v62 = vpop.permute.xlu1 %2402  ;;  %v2695_v58 = vsel %vm1349_vm11, %v2653_v63, %v2655_v10  ;;  %v2452_v63 = vsel %vm805_vm3, %v2425_v34, %v2427_v49  ;;  %v10372_v34 = vld [vmem:[#allocation20_spill] sm:$0xff] }
 0x38a   : >> { %v8583_v59 = vmax.f32 %v2617_v7, %v2695_v58  ;;  %v2503_v50 = vmax.f32 %v10371_v5, %v2452_v63  ;;  %v2492_v40 = vmax.f32 %v8246_v3, %v2403_v62 }
 0x38c   : >> { %2806 = vrot.lane.b32.xlu0 %v8583_v59, %s10353_s15  ;;  %v2529_v30 = vpop.permute.xlu0 %2528 }
 0x38d   : >> { %v2429_v18 = vpop.permute.xlu1 %2428  ;;  %v2568_v41 = vsel %vm1077_vm7, %v2527_v47, %v2529_v30 }
 0x38e   : >> { %v2618_v53 = vmax.f32 %v2490_v61, %v2568_v41  ;;  %v2453_v21 = vsel %vm805_vm3, %v2427_v49, %v2429_v18 }
 0x390   : >> { %2934 = vrot.lane.b32.xlu0 %v8583_v59, %s10344_s19  ;;  %v2555_v13 = vpop.permute.xlu0 %2554 }
 0x391   : >> { %v2681_v1 = vpop.permute.xlu1 %2680  ;;  %v2580_v28 = vsel %vm1077_vm7, %v2553_v23, %v2555_v13 }
 0x392   : >> { %v2707_v25 = vsel %vm1349_vm11, %v2679_v33, %v2681_v1  ;;  %v2441_v33 = vsel %vm805_vm3, %v2401_v45, %v2403_v62  ;;  %v2631_v29 = vmax.f32 %v2503_v50, %v2580_v28  ;;  %v2505_v62 = vmax.f32 %v8255_v4, %v2429_v18 }
 0x393   : >> { %v8597_v54 = vmax.f32 %v2630_v0, %v2707_v25  ;;  %v2491_v27 = vmax.f32 %v10372_v34, %v2441_v33  ;;  %vm3055_vm3 = vcmask 179200  }
 0x394   : >> { %v2657_v8 = vpop.permute.xlu0 %2656 }
 0x395   : >> { %v2531_v16 = vpop.permute.xlu1 %2530  ;;  %2832 = vrot.lane.b32.xlu1 %v8597_v54, %s10353_s15  ;;  %v2696_v37 = vsel %vm1349_vm11, %v2655_v10, %v2657_v8  ;;  %v10373_v10 = vld [vmem:[#allocation21_spill] sm:$0xff] }
 0x396   : >> { %v8604_v44 = vmax.f32 %v2618_v53, %v2696_v37  ;;  %v2569_v32 = vsel %vm1077_vm7, %v2529_v30, %v2531_v16  ;;  %v2504_v58 = vmax.f32 %v10373_v10, %v2453_v21 }
 0x397   : >> { %v2619_v23 = vmax.f32 %v2491_v27, %v2569_v32 }
 0x398   : >> { %2808 = vrot.lane.b32.xlu0 %v8604_v44, %s10353_s15  ;;  %v2683_v57 = vpop.permute.xlu0 %2682 }
 0x399   : >> { %v2557_v46 = vpop.permute.xlu1 %2556  ;;  %2960 = vrot.lane.b32.xlu1 %v8597_v54, %s10344_s19  ;;  %v2708_v42 = vsel %vm1349_vm11, %v2681_v1, %v2683_v57 }
 0x39a   : >> { %v8613_v47 = vmax.f32 %v2631_v29, %v2708_v42  ;;  %v2581_v12 = vsel %vm1077_vm7, %v2555_v13, %v2557_v46  ;;  %v2620_v13 = vmax.f32 %v2492_v40, %v2531_v16  ;;  %v2633_v25 = vmax.f32 %v2505_v62, %v2557_v46 }
 0x39b   : >> { %v2632_v36 = vmax.f32 %v2504_v58, %v2581_v12 }
 0x39c   : >> { %2834 = vrot.lane.b32.xlu0 %v8613_v47, %s10353_s15  ;;  %v2791_v45 = vpop.permute.xlu0 %2790 }
 0x39d   : >> { %v2659_v19 = vpop.permute.xlu1 %2658 }
 0x39e   : >> { %v2697_v7 = vsel %vm1349_vm11, %v2657_v8, %v2659_v19  ;;  %v8636_v41 = vmax.f32 %v2620_v13, %v2659_v19 }
 0x39f   : >> { %v8622_v31 = vmax.f32 %v2619_v23, %v2697_v7 }
 0x3a0   : >> { %2936 = vrot.lane.b32.xlu0 %v8604_v44, %s10344_s19  ;;  %v2795_v30 = vpop.permute.xlu0 %2794 }
 0x3a1   : >> { %v2685_v49 = vpop.permute.xlu1 %2684  ;;  %2810 = vrot.lane.b32.xlu1 %v8622_v31, %s10353_s15 }
 0x3a2   : >> { %v2709_v24 = vsel %vm1349_vm11, %v2683_v57, %v2685_v49  ;;  %v8647_v53 = vmax.f32 %v2633_v25, %v2685_v49 }
 0x3a3   : >> { %v8630_v20 = vmax.f32 %v2632_v36, %v2709_v24 }
 0x3a4   : >> { %2962 = vrot.lane.b32.xlu0 %v8613_v47, %s10344_s19  ;;  %v2819_v0 = vpop.permute.xlu0 %2818 }
 0x3a5   : >> { %v2793_v1 = vpop.permute.xlu1 %2792  ;;  %2836 = vrot.lane.b32.xlu1 %v8630_v20, %s10353_s15 }
 0x3a6   : >> { %v2841_v28 = vsel %vm607_vm0, %v2791_v45, %v2793_v1  ;;  %v2842_v4 = vsel %vm607_vm0, %v2793_v1, %v2795_v30 }
 0x3a7   : >> { %v2891_v37 = vmax.f32 %v8300_v17, %v2841_v28  ;;  %v2892_v5 = vmax.f32 %v8359_v48, %v2842_v4 }
 0x3a8   : >> { %2812 = vrot.lane.b32.xlu0 %v8636_v41, %s10353_s15  ;;  %v2789_v26 = vpop.permute.xlu0 %2788 }
 0x3a9   : >> { %v2817_v3 = vpop.permute.xlu1 %2816  ;;  %2938 = vrot.lane.b32.xlu1 %v8622_v31, %s10344_s19  ;;  %v2840_v50 = vsel %vm607_vm0, %v2789_v26, %v2791_v45 }
 0x3aa   : >> { %v2853_v29 = vsel %vm607_vm0, %v2817_v3, %v2819_v0  ;;  %v2890_v34 = vmax.f32 %v8379_v11, %v2840_v50 }
 0x3ab   : >> { %v2904_v17 = vmax.f32 %v8382_v35, %v2853_v29 }
 0x3ac   : >> { %2940 = vrot.lane.b32.xlu0 %v8636_v41, %s10344_s19  ;;  %v2919_v61 = vpop.permute.xlu0 %2918 }
 0x3ad   : >> { %v2821_v63 = vpop.permute.xlu1 %2820  ;;  %2964 = vrot.lane.b32.xlu1 %v8630_v20, %s10344_s19 }
 0x3ae   : >> { %v2854_v45 = vsel %vm607_vm0, %v2819_v0, %v2821_v63 }
 0x3af   : >> { %v2905_v10 = vmax.f32 %v8356_v51, %v2854_v45 }
 0x3b0   : >> { %v2923_v8 = vpop.permute.xlu0 %2922 }
 0x3b1   : >> { %v2815_v16 = vpop.permute.xlu1 %2814  ;;  %2838 = vrot.lane.b32.xlu1 %v8647_v53, %s10353_s15 }
 0x3b2   : >> { %v2852_v36 = vsel %vm607_vm0, %v2815_v16, %v2817_v3 }
 0x3b3   : >> { %v2903_v0 = vmax.f32 %v8411_v52, %v2852_v36 }
 0x3b4   : >> { %v2947_v18 = vpop.permute.xlu0 %2946 }
 0x3b5   : >> { %v2921_v33 = vpop.permute.xlu1 %2920  ;;  %2966 = vrot.lane.b32.xlu1 %v8647_v53, %s10344_s19 }
 0x3b6   : >> { %v2969_v57 = vsel %vm672_vm1, %v2919_v61, %v2921_v33  ;;  %v2970_v46 = vsel %vm672_vm1, %v2921_v33, %v2923_v8 }
 0x3b7   : >> { %v3019_v42 = vmax.f32 %v2891_v37, %v2969_v57  ;;  %v3020_v32 = vmax.f32 %v2892_v5, %v2970_v46 }
 0x3b8   : >> { %v2917_v27 = vpop.permute.xlu0 %2916 }
 0x3b9   : >> { %v2945_v48 = vpop.permute.xlu1 %2944  ;;  %3095 = vrot.lane.b32.xlu0 %v3019_v42, %s10345_s29  ;;  %3097 = vrot.lane.b32.xlu1 %v3020_v32, %s10345_s29  ;;  %v2968_v21 = vsel %vm672_vm1, %v2917_v27, %v2919_v61 }
 0x3ba   : >> { %v2981_v23 = vsel %vm672_vm1, %v2945_v48, %v2947_v18  ;;  %v3018_v19 = vmax.f32 %v2890_v34, %v2968_v21 }
 0x3bb   : >> { %v3032_v12 = vmax.f32 %v2904_v17, %v2981_v23 }
 0x3bc   : >> { %v2797_v7 = vpop.permute.xlu0 %2796 }
 0x3bd   : >> { %v2949_v11 = vpop.permute.xlu1 %2948  ;;  %3119 = vrot.lane.b32.xlu0 %v3032_v12, %s10345_s29  ;;  %v2843_v35 = vsel %vm607_vm0, %v2795_v30, %v2797_v7  ;;  %v8671_v58 = vpack.c.bf16 %v3032_v12, %v3019_v42 }
 0x3be   : >> { %v2982_v49 = vsel %vm672_vm1, %v2947_v18, %v2949_v11  ;;  %v2893_v24 = vmax.f32 %v8326_v43, %v2843_v35 }
 0x3bf   : >> { %v3033_v40 = vmax.f32 %v2905_v10, %v2982_v49  ;;  %6332 = vmatprep.subr.bf16.mxu1 %v8671_v58 }
 0x3c0   : >> { %v2925_v13 = vpop.permute.xlu0 %2924 }
 0x3c1   : >> { %v2943_v51 = vpop.permute.xlu1 %2942  ;;  %3121 = vrot.lane.b32.xlu1 %v3033_v40, %s10345_s29  ;;  %3093 = vrot.lane.b32.xlu0 %v3018_v19, %s10345_s29  ;;  %v2971_v30 = vsel %vm672_vm1, %v2923_v8, %v2925_v13  ;;  %v8681_v1 = vpack.c.bf16 %v3033_v40, %v3020_v32 }
 0x3c2   : >> { %v2980_v26 = vsel %vm672_vm1, %v2943_v51, %v2945_v48  ;;  %v3021_v3 = vmax.f32 %v2893_v24, %v2971_v30 }
 0x3c3   : >> { %v3031_v62 = vmax.f32 %v2903_v0, %v2980_v26 }
 0x3c4   : >> { %v2799_v61 = vpop.permute.xlu0 %2798 }
 0x3c5   : >> { %v2823_v25 = vpop.permute.xlu1 %2822  ;;  %3117 = vrot.lane.b32.xlu1 %v3031_v62, %s10345_s29  ;;  %3099 = vrot.lane.b32.xlu0 %v3021_v3, %s10345_s29  ;;  %v2844_v43 = vsel %vm607_vm0, %v2797_v7, %v2799_v61  ;;  %v6333_v52 = vpack.c.bf16 %v3031_v62, %v3018_v19 }
 0x3c6   : >> { %v2855_v16 = vsel %vm607_vm0, %v2821_v63, %v2823_v25  ;;  %v2894_v8 = vmax.f32 %v8441_v15, %v2844_v43 }
 0x3c7   : >> { %6334 = vmatpush1.bf16.msra.mxu1 %v6333_v52  ;;  %v2906_v4 = vmax.f32 %v8400_v6, %v2855_v16 }
 0x3c8   : >> { %v2927_v28 = vpop.permute.xlu0 %2926 }
 0x3c9   : >> { %v2951_v18 = vpop.permute.xlu1 %2950  ;;  %v2972_v37 = vsel %vm672_vm1, %v2925_v13, %v2927_v28 }
 0x3ca   : >> { %v2983_v5 = vsel %vm672_vm1, %v2949_v11, %v2951_v18  ;;  %v3022_v50 = vmax.f32 %v2894_v8, %v2972_v37 }
 0x3cb   : >> { %v3034_v33 = vmax.f32 %v2906_v4, %v2983_v5 }
 0x3cc   : >> { %3101 = vrot.lane.b32.xlu0 %v3022_v50, %s10345_s29  ;;  %v2801_v29 = vpop.permute.xlu0 %2800 }
 0x3cd   : >> { %v2825_v57 = vpop.permute.xlu1 %2824  ;;  %3123 = vrot.lane.b32.xlu1 %v3034_v33, %s10345_s29  ;;  %v8694_v63 = vpack.c.bf16 %v3034_v33, %v3021_v3  ;;  %v2845_v32 = vsel %vm607_vm0, %v2799_v61, %v2801_v29 }
 0x3ce   : >> { %v2856_v15 = vsel %vm607_vm0, %v2823_v25, %v2825_v57  ;;  %v2895_v17 = vmax.f32 %v8472_v9, %v2845_v32 }
 0x3cf   : >> { %v2907_v6 = vmax.f32 %v8474_v38, %v2856_v15 }
 0x3d0   : >> { %v2827_v46 = vpop.permute.xlu0 %2826 }
 0x3d1   : >> { %v2953_v42 = vpop.permute.xlu1 %2952  ;;  %v2857_v45 = vsel %vm607_vm0, %v2825_v57, %v2827_v46 }
 0x3d2   : >> { %v2984_v34 = vsel %vm672_vm1, %v2951_v18, %v2953_v42  ;;  %v2908_v12 = vmax.f32 %v8510_v2, %v2857_v45 }
 0x3d3   : >> { %v3035_v27 = vmax.f32 %v2907_v6, %v2984_v34 }
 0x3d4   : >> { %v2929_v48 = vpop.permute.xlu0 %2928 }
 0x3d5   : >> { %v2803_v21 = vpop.permute.xlu1 %2802  ;;  %3125 = vrot.lane.b32.xlu1 %v3035_v27, %s10345_s29  ;;  %v2973_v23 = vsel %vm672_vm1, %v2927_v28, %v2929_v48  ;;  %v8713_v2 = vpack.c.bf16 %v3035_v27, %v3022_v50 }
 0x3d6   : >> { %v3023_v19 = vmax.f32 %v2895_v17, %v2973_v23  ;;  %v2846_v11 = vsel %vm607_vm0, %v2801_v29, %v2803_v21 }
 0x3d7   : >> { %v2896_v49 = vmax.f32 %v8508_v55, %v2846_v11 }
 0x3d8   : >> { %3103 = vrot.lane.b32.xlu0 %v3023_v19, %s10345_s29  ;;  %v2955_v38 = vpop.permute.xlu0 %2954 }
 0x3d9   : >> { %v2829_v7 = vpop.permute.xlu1 %2828  ;;  %v2985_v10 = vsel %vm672_vm1, %v2953_v42, %v2955_v38 }
 0x3da   : >> { %v3036_v9 = vmax.f32 %v2908_v12, %v2985_v10  ;;  %v2858_v13 = vsel %vm607_vm0, %v2827_v46, %v2829_v7 }
 0x3db   : >> { %v2909_v3 = vmax.f32 %v8523_v22, %v2858_v13 }
 0x3dc   : >> { %3127 = vrot.lane.b32.xlu0 %v3036_v9, %s10345_s29  ;;  %v2805_v35 = vpop.permute.xlu0 %2804  ;;  %v8709_v36 = vpack.c.bf16 %v3036_v9, %v3023_v19 }
 0x3dd   : >> { %v2931_v40 = vpop.permute.xlu1 %2930  ;;  %v2847_v24 = vsel %vm607_vm0, %v2803_v21, %v2805_v35 }
 0x3de   : >> { %v2974_v0 = vsel %vm672_vm1, %v2929_v48, %v2931_v40  ;;  %6364 = vmatprep.subr.bf16.mxu0 %v8709_v36  ;;  %v2897_v30 = vmax.f32 %v8538_v56, %v2847_v24 }
 0x3df   : >> { %v3024_v51 = vmax.f32 %v2896_v49, %v2974_v0  ;;  %6366 = vmatpush1.bf16.msra.mxu0 %v8713_v2 }
 0x3e0   : >> { %v2933_v26 = vpop.permute.xlu0 %2932 }
 0x3e1   : >> { %v2957_v55 = vpop.permute.xlu1 %2956  ;;  %3105 = vrot.lane.b32.xlu1 %v3024_v51, %s10345_s29  ;;  %v2975_v62 = vsel %vm672_vm1, %v2931_v40, %v2933_v26 }
 0x3e2   : >> { %v2986_v61 = vsel %vm672_vm1, %v2955_v38, %v2957_v55  ;;  %v3025_v25 = vmax.f32 %v2897_v30, %v2975_v62 }
 0x3e3   : >> { %v3037_v43 = vmax.f32 %v2909_v3, %v2986_v61 }
 0x3e4   : >> { %3107 = vrot.lane.b32.xlu0 %v3025_v25, %s10345_s29 }
 0x3e5   : >> { %v2831_v52 = vpop.permute.xlu1 %2830  ;;  %3129 = vrot.lane.b32.xlu1 %v3037_v43, %s10345_s29  ;;  %v8726_v16 = vpack.c.bf16 %v3037_v43, %v3024_v51 }
 0x3e6   : >> { %v2859_v56 = vsel %vm607_vm0, %v2829_v7, %v2831_v52 }
 0x3e7   : >> { %v2910_v22 = vmax.f32 %v8550_v14, %v2859_v56 }
 0x3e9   : >> { %v2959_v8 = vpop.permute.xlu1 %2958 }
 0x3ea   : >> { %v2987_v28 = vsel %vm672_vm1, %v2957_v55, %v2959_v8 }
 0x3eb   : >> { %v3038_v4 = vmax.f32 %v2910_v22, %v2987_v28 }
 0x3ed   : >> { %3131 = vrot.lane.b32.xlu1 %v3038_v4, %s10345_s29  ;;  %v8732_v18 = vpack.c.bf16 %v3038_v4, %v3025_v25 }
 0x3fe   : >> { %v2807_v37 = vpop.permute.xlu0 %2806 }
 0x3ff   : >> { %v2848_v5 = vsel %vm607_vm0, %v2805_v35, %v2807_v37 }
 0x400   : >> { %v2898_v50 = vmax.f32 %v8557_v60, %v2848_v5  ;;  %v3373_v5 = vld [vmem:[%s10268_s4 + $0x10] sm:$0xff] }
 0x402   : >> { %v2935_v33 = vpop.permute.xlu0 %2934 }
 0x403   : >> { %v2976_v29 = vsel %vm672_vm1, %v2933_v26, %v2935_v33 }
 0x404   : >> { %v3026_v57 = vmax.f32 %v2898_v50, %v2976_v29 }
 0x406   : >> { %3109 = vrot.lane.b32.xlu0 %v3026_v57, %s10345_s29 }
 0x407   : >> { %v2833_v14 = vpop.permute.xlu1 %2832 }
 0x408   : >> { %v2860_v15 = vsel %vm607_vm0, %v2831_v52, %v2833_v14 }
 0x409   : >> { %v2911_v6 = vmax.f32 %v8573_v39, %v2860_v15 }
 0x40a   : >> { %v2809_v46 = vpop.permute.xlu0 %2808 }
 0x40b   : >> { %v2961_v42 = vpop.permute.xlu1 %2960  ;;  %v2849_v60 = vsel %vm607_vm0, %v2807_v37, %v2809_v46 }
 0x40c   : >> { %v2988_v32 = vsel %vm672_vm1, %v2959_v8, %v2961_v42  ;;  %v2899_v48 = vmax.f32 %v8583_v59, %v2849_v60  ;;  %v3371_v8 = vld [vmem:[%s10268_s4] sm:$0xff] }
 0x40d   : >> { %v3039_v34 = vmax.f32 %v2911_v6, %v2988_v32 }
 0x40e   : >> { %v2835_v27 = vpop.permute.xlu0 %2834 }
 0x40f   : >> { %3133 = vrot.lane.b32.xlu1 %v3039_v34, %s10345_s29  ;;  %v8743_v17 = vpack.c.bf16 %v3039_v34, %v3026_v57  ;;  %v2861_v23 = vsel %vm607_vm0, %v2833_v14, %v2835_v27  ;;  %v3372_v57 = vld [vmem:[%s10268_s4 + $0x8] sm:$0xff] }
 0x410   : >> { %v2912_v12 = vmax.f32 %v8597_v54, %v2861_v23 }
 0x412   : >> { %v2937_v21 = vpop.permute.xlu0 %2936 }
 0x413   : >> { %v2811_v45 = vpop.permute.xlu1 %2810  ;;  %v2977_v19 = vsel %vm672_vm1, %v2935_v33, %v2937_v21 }
 0x414   : >> { %v3027_v39 = vmax.f32 %v2899_v48, %v2977_v19  ;;  %v2850_v11 = vsel %vm607_vm0, %v2809_v46, %v2811_v45 }
 0x415   : >> { %v2900_v49 = vmax.f32 %v8604_v44, %v2850_v11  ;;  %v8825_v11 = vld [vmem:[%s10267_s3 + $0x8] sm:$0xff] }
 0x416   : >> { %3111 = vrot.lane.b32.xlu0 %v3027_v39, %s10345_s29  ;;  %v2963_v38 = vpop.permute.xlu0 %2962 }
 0x417   : >> { %v2837_v7 = vpop.permute.xlu1 %2836  ;;  %v2989_v10 = vsel %vm672_vm1, %v2961_v42, %v2963_v38  ;;  %v3374_v42 = vld [vmem:[%s10268_s4 + $0x18] sm:$0xff] }
 0x418   : >> { %v3040_v9 = vmax.f32 %v2912_v12, %v2989_v10  ;;  %v2862_v54 = vsel %vm607_vm0, %v2835_v27, %v2837_v7 }
 0x419   : >> { %v2913_v3 = vmax.f32 %v8613_v47, %v2862_v54  ;;  %v8845_v54 = vld [vmem:[%s10267_s3 + $0x18] sm:$0xff] }
 0x41a   : >> { %3135 = vrot.lane.b32.xlu0 %v3040_v9, %s10345_s29  ;;  %v2813_v59 = vpop.permute.xlu0 %2812  ;;  %v8753_v35 = vpack.c.bf16 %v3040_v9, %v3027_v39 }
 0x41b   : >> { %v2939_v40 = vpop.permute.xlu1 %2938  ;;  %v2851_v24 = vsel %vm607_vm0, %v2811_v45, %v2813_v59  ;;  %v2902_v51 = vmax.f32 %v8636_v41, %v2813_v59 }
 0x41c   : >> { %v2978_v13 = vsel %vm672_vm1, %v2937_v21, %v2939_v40  ;;  %v2901_v30 = vmax.f32 %v8622_v31, %v2851_v24 }
 0x41d   : >> { %v3028_v0 = vmax.f32 %v2900_v49, %v2978_v13 }
 0x41e   : >> { %v2941_v26 = vpop.permute.xlu0 %2940 }
 0x41f   : >> { %v2965_v55 = vpop.permute.xlu1 %2964  ;;  %3113 = vrot.lane.b32.xlu1 %v3028_v0, %s10345_s29  ;;  %v2979_v44 = vsel %vm672_vm1, %v2939_v40, %v2941_v26  ;;  %v3030_v62 = vmax.f32 %v2902_v51, %v2941_v26 }
 0x420   : >> { %v2990_v61 = vsel %vm672_vm1, %v2963_v38, %v2965_v55  ;;  %v8765_v25 = vmax.f32 %v2901_v30, %v2979_v44  ;;  %v8814_v38 = vld [vmem:[%s10267_s3] sm:$0xff] }
 0x421   : >> { %v3041_v43 = vmax.f32 %v2913_v3, %v2990_v61  ;;  %3222 = vst.msk [vmem:[#allocation3 + $0x1d8] sm:$0xff] %vm3055_vm3, %v3030_v62 }
 0x422   : >> { %3056 = vst.msk [vmem:[#allocation3 + $0x58] sm:$0xff] %vm3055_vm3, %v8765_v25  ;;  %3115 = vrot.lane.b32.xlu0 %v8765_v25, %s10345_s29 }
 0x423   : >> { %v2839_v47 = vpop.permute.xlu1 %2838  ;;  %3137 = vrot.lane.b32.xlu1 %v3041_v43, %s10345_s29  ;;  %v8773_v31 = vpack.c.bf16 %v3041_v43, %v3028_v0 }
 0x424   : >> { %v2863_v41 = vsel %vm607_vm0, %v2837_v7, %v2839_v47  ;;  %v2915_v52 = vmax.f32 %v8647_v53, %v2839_v47  ;;  %vm4404_vm0 = vcmask 154624  }
 0x425   : >> { %v2914_v56 = vmax.f32 %v8630_v20, %v2863_v41 }
 0x426   : >> { %3237 = vrot.lane.b32.xlu0 %v3030_v62, %s10345_s29 }
 0x427   : >> { %v2967_v22 = vpop.permute.xlu1 %2966 }
 0x428   : >> { %v2991_v28 = vsel %vm672_vm1, %v2965_v55, %v2967_v22  ;;  %v3043_v4 = vmax.f32 %v2915_v52, %v2967_v22  ;;  %vm4417_vm1 = vcmask 1042432  }
 0x429   : >> { %v8783_v37 = vmax.f32 %v2914_v56, %v2991_v28 }
 0x42a   : >> { %3234 = vst.msk [vmem:[#allocation3 + $0x238] sm:$0xff] %vm3055_vm3, %v3043_v4  ;;  %3377 = vperm.xlu0 %6755, %v3371_v8  }
 0x42b   : >> { %3068 = vst.msk [vmem:[#allocation3 + $0xb8] sm:$0xff] %vm3055_vm3, %v8783_v37  ;;  %v3098_v53 = vpop.permute.xlu1 %3097  ;;  %3139 = vrot.lane.b32.xlu1 %v8783_v37, %s10345_s29  ;;  %v3096_v20 = vpop.permute.xlu0 %3095  ;;  %v6421_v50 = vpack.c.bf16 %v8783_v37, %v8765_v25  ;;  %v4273_v25 = vld [vmem:[%s10269_s5 + $0x80] sm:$0xff]  ;;  %v4274_v37 = vld [vmem:[%s10269_s5 + $0x88] sm:$0xff] }
 0x42c   : >> { %v3142_v33 = vsel %vm737_vm2, %v3096_v20, %v3098_v53 }
 0x42e   : >> { %3387 = vperm.xlu0 %6755, %v3373_v5  }
 0x42f   : >> { %3239 = vrot.lane.b32.xlu1 %v3043_v4, %s10345_s29  ;;  %v3120_v29 = vpop.permute.xlu0 %3119  ;;  %v3286_v4 = vld [vmem:[#allocation3 + $0x58] sm:$0xff] }
 0x432   : >> { %v3298_v8 = vld [vmem:[#allocation3 + $0xb8] sm:$0xff] }
 0x433   : >> { %v3122_v14 = vpop.permute.xlu1 %3121  ;;  %3382 = vperm.xlu1 %6754, %v3372_v57   ;;  %v3094_v15 = vpop.permute.xlu0 %3093 }
 0x434   : >> { %v3153_v46 = vsel %vm737_vm2, %v3120_v29, %v3122_v14  ;;  %v3141_v6 = vsel %vm737_vm2, %v3094_v15, %v3096_v20 }
 0x435   : >> { %v6335_v32 = vpack.c.bf16 %v3153_v46, %v3142_v33 }
 0x437   : >> { %v3118_v34 = vpop.permute.xlu1 %3117  ;;  %3392 = vperm.xlu1 %6754, %v3374_v42   ;;  %v3100_v27 = vpop.permute.xlu0 %3099  ;;  %6336 = vmatprep.subr.bf16.mxu1 %v6335_v32 }
 0x438   : >> { %v3152_v60 = vsel %vm737_vm2, %v3118_v34, %v3120_v29  ;;  %v3143_v48 = vsel %vm737_vm2, %v3098_v53, %v3100_v27  ;;  %v6411_v53 = vpack.c.bf16 %v3298_v8, %v3286_v4  ;;  %v4281_v4 = vld [vmem:[%s10269_s5 + $0xc0] sm:$0xff] }
 0x439   : >> { %v6337_v21 = vpack.c.bf16 %v3152_v60, %v3141_v6  ;;  %v3346_v60 = vld [vmem:[#allocation3 + $0x238] sm:$0xff] }
 0x43b   : >> { %6338 = vmatpush1.bf16.msra.mxu1 %v6337_v21 }
 0x43c   : >> { %6340 = vmatprep.subr.bf16.mxu1 %v8681_v1 }
 0x43e   : >> { %v3102_v45 = vpop.permute.xlu0 %3101 }
 0x43f   : >> { %v3124_v23 = vpop.permute.xlu1 %3123  ;;  %v3144_v19 = vsel %vm737_vm2, %v3100_v27, %v3102_v45  ;;  %6342 = vmatpush1.bf16.msra.mxu1 %v8671_v58  ;;  %v10374_v58 = vmov 0.0  }
 0x440   : >> { %v3154_v39 = vsel %vm737_vm2, %v3122_v14, %v3124_v23 }
 0x441   : >> { %v6343_v12 = vpack.c.bf16 %v3154_v39, %v3143_v48  ;;  %v3334_v48 = vld [vmem:[#allocation3 + $0x1d8] sm:$0xff] }
 0x442   : >> { %v6419_v21 = vpack.c.bf16 %v3346_v60, %v3334_v48  ;;  %v4268_v48 = vld [vmem:[%s10269_s5 + $0x58] sm:$0xff] }
 0x443   : >> { %6344 = vmatprep.subr.bf16.mxu1 %v6343_v12 }
 0x444   : >> { %6346 = vmatpush1.bf16.msra.mxu1 %v6335_v32 }
 0x445   : >> { %6348 = vmatprep.subr.bf16.mxu1 %v8694_v63 }
 0x447   : >> { %v3126_v7 = vpop.permute.xlu1 %3125  ;;  %5687 = vmatmul.mubr.msk.f32.vlgmr.msra.gmra.mrb[12].mxu1 %vm1077_vm7, %v8814_v38 }
 0x448   : >> { %v3155_v10 = vsel %vm737_vm2, %v3124_v23, %v3126_v7  ;;  %6350 = vmatpush1.bf16.msra.mxu1 %v8681_v1  ;;  %3477 = vmatprep.mubr.f32.mxu1 %v10374_v58  ;;  %v8834_v1 = vld [vmem:[%s10267_s3 + $0x10] sm:$0xff] }
 0x449   : >> { %v6351_v9 = vpack.c.bf16 %v3155_v10, %v3144_v19 }
 0x44a   : >> { %v3104_v59 = vpop.permute.xlu0 %3103 }
 0x44b   : >> { %v3145_v49 = vsel %vm737_vm2, %v3102_v45, %v3104_v59  ;;  %5688 = vmatmul.mubr.msk.f32.gmra.mrb[14].mxu1 %vm1077_vm7, %v8825_v11  ;;  %6352 = vmatprep.subr.bf16.mxu1 %v6351_v9 }
 0x44c   : >> { %6354 = vmatpush1.bf16.msra.mxu1 %v6343_v12  ;;  %3483 = vmatprep.mubr.f32.mxu1 %v10374_v58  ;;  %v4257_v12 = vld [vmem:[%s10269_s5] sm:$0xff] }
 0x44d   : >> { %6356 = vmatprep.subr.bf16.mxu1 %v8713_v2 }
 0x44e   : >> { %v3128_v40 = vpop.permute.xlu0 %3127 }
 0x44f   : >> { %v3156_v24 = vsel %vm737_vm2, %v3126_v7, %v3128_v40  ;;  %5689 = vmatmul.mubr.msk.f32.gmra.mrb[16].mxu1 %vm1077_vm7, %v8834_v1 }
 0x450   : >> { %6358 = vmatpush1.bf16.msra.mxu1 %v8694_v63  ;;  %3489 = vmatprep.mubr.f32.mxu1 %v10374_v58  ;;  %v6359_v13 = vpack.c.bf16 %v3156_v24, %v3145_v49 }
 0x452   : >> { %6360 = vmatprep.subr.bf16.mxu1 %v6359_v13 }
 0x453   : >> { %v3106_v0 = vpop.permute.xlu1 %3105  ;;  %5690 = vmatmul.mubr.msk.f32.gmra.mrb[18].mxu1 %vm1077_vm7, %v8845_v54 }
 0x454   : >> { %v3146_v2 = vsel %vm737_vm2, %v3104_v59, %v3106_v0  ;;  %6362 = vmatpush1.bf16.msra.mxu1 %v6351_v9  ;;  %3560 = vmatprep.mubr.f32.mxu1 %v10374_v58 }
 0x455   : >> { %6380 = vmatprep.subr.bf16.mxu1 %v8732_v18 }
 0x456   : >> { %v3108_v63 = vpop.permute.xlu0 %3107 }
 0x457   : >> { %v3130_v51 = vpop.permute.xlu1 %3129  ;;  %v3147_v30 = vsel %vm737_vm2, %v3106_v0, %v3108_v63  ;;  %5691 = vmatmul.mubr.msk.f32.vlgmr.msra.gmra.mrb[20].mxu1 %vm1077_vm7, %v8814_v38 }
 0x458   : >> { %v3157_v26 = vsel %vm737_vm2, %v3128_v40, %v3130_v51  ;;  %6382 = vmatpush1.bf16.msra.mxu1 %v8726_v16  ;;  %3566 = vmatprep.mubr.f32.mxu1 %v10374_v58  ;;  %v4276_v40 = vld [vmem:[%s10269_s5 + $0x98] sm:$0xff] }
 0x459   : >> { %v6367_v3 = vpack.c.bf16 %v3157_v26, %v3146_v2  ;;  %v4278_v26 = vld [vmem:[%s10269_s5 + $0xa8] sm:$0xff] }
 0x45b   : >> { %6368 = vmatprep.subr.bf16.mxu0 %v6367_v3  ;;  %5692 = vmatmul.mubr.msk.f32.gmra.mrb[22].mxu1 %vm1077_vm7, %v8825_v11 }
 0x45c   : >> { %6370 = vmatpush1.bf16.msra.mxu0 %v6359_v13  ;;  %3572 = vmatprep.mubr.f32.mxu1 %v10374_v58  ;;  %v4260_v13 = vld [vmem:[%s10269_s5 + $0x18] sm:$0xff] }
 0x45d   : >> { %6372 = vmatprep.subr.bf16.mxu0 %v8726_v16 }
 0x45f   : >> { %v3132_v55 = vpop.permute.xlu1 %3131  ;;  %5693 = vmatmul.mubr.msk.f32.gmra.mrb[24].mxu1 %vm1077_vm7, %v8834_v1 }
 0x460   : >> { %v3158_v44 = vsel %vm737_vm2, %v3130_v51, %v3132_v55  ;;  %6374 = vmatpush1.bf16.msra.mxu0 %v8709_v36  ;;  %3578 = vmatprep.mubr.f32.mxu1 %v10374_v58 }
 0x461   : >> { %v6375_v62 = vpack.c.bf16 %v3158_v44, %v3147_v30  ;;  %v4277_v30 = vld [vmem:[%s10269_s5 + $0xa0] sm:$0xff] }
 0x463   : >> { %6376 = vmatprep.subr.bf16.mxu0 %v6375_v62  ;;  %5694 = vmatmul.mubr.msk.f32.gmra.mrb[26].mxu1 %vm1077_vm7, %v8845_v54 }
 0x464   : >> { %6378 = vmatpush1.bf16.msra.mxu0 %v6367_v3  ;;  %3738 = vmatprep.mubr.f32.mxu1 %v10374_v58  ;;  %v4261_v3 = vld [vmem:[%s10269_s5 + $0x20] sm:$0xff] }
 0x465   : >> { %6396 = vmatprep.subr.bf16.mxu0 %v8753_v35 }
 0x467   : >> { %5695 = vmatmul.mubr.msk.f32.vlgmr.msra.gmra.mrb[14].mxu0 %vm1077_vm7, %v8814_v38 }
 0x468   : >> { %6398 = vmatpush1.bf16.msra.mxu0 %v8743_v17  ;;  %3655 = vmatprep.mubr.f32.mxu0 %v10374_v58 }
 0x46b   : >> { %5696 = vmatmul.mubr.msk.f32.gmra.mrb[16].mxu0 %vm1077_vm7, %v8825_v11 }
 0x46c   : >> { %3661 = vmatprep.mubr.f32.mxu0 %v10374_v58 }
 0x46f   : >> { %5697 = vmatmul.mubr.msk.f32.gmra.mrb[18].mxu0 %vm1077_vm7, %v8834_v1 }
 0x470   : >> { %3667 = vmatprep.mubr.f32.mxu0 %v10374_v58 }
 0x473   : >> { %5698 = vmatmul.mubr.msk.f32.gmra.mrb[20].mxu0 %vm1077_vm7, %v8845_v54 }
 0x474   : >> { %3827 = vmatprep.mubr.f32.mxu0 %v10374_v58 }
 0x478   : >> { %v3110_v36 = vpop.permute.xlu0 %3109 }
 0x479   : >> { %v3148_v16 = vsel %vm737_vm2, %v3108_v63, %v3110_v36 }
 0x481   : >> { %v3134_v61 = vpop.permute.xlu1 %3133 }
 0x482   : >> { %v3159_v43 = vsel %vm737_vm2, %v3132_v55, %v3134_v61 }
 0x483   : >> { %v6383_v47 = vpack.c.bf16 %v3159_v43, %v3148_v16  ;;  %v4279_v43 = vld [vmem:[%s10269_s5 + $0xb0] sm:$0xff] }
 0x485   : >> { %6384 = vmatprep.subr.bf16.mxu1 %v6383_v47 }
 0x486   : >> { %6386 = vmatpush1.bf16.msra.mxu1 %v6375_v62  ;;  %v6435_v62 = vpack.c.bf16 %v4278_v26, %v4277_v30 }
 0x487   : >> { %6388 = vmatprep.subr.bf16.mxu1 %v8743_v17 }
 0x488   : >> { %v3112_v41 = vpop.permute.xlu0 %3111 }
 0x489   : >> { %v3149_v52 = vsel %vm737_vm2, %v3110_v36, %v3112_v41  ;;  %v4262_v36 = vld [vmem:[%s10269_s5 + $0x28] sm:$0xff] }
 0x48a   : >> { %6390 = vmatpush1.bf16.msra.mxu1 %v8732_v18 }
 0x48c   : >> { %v3136_v56 = vpop.permute.xlu0 %3135 }
 0x48d   : >> { %v3160_v22 = vsel %vm737_vm2, %v3134_v61, %v3136_v56  ;;  %v6437_v61 = vpack.c.bf16 %v4262_v36, %v4261_v3  ;;  %v4288_v36 = vld [vmem:[%s10269_s5 + $0xf8] sm:$0xff] }
 0x48e   : >> { %v6391_v28 = vpack.c.bf16 %v3160_v22, %v3149_v52 }
 0x490   : >> { %6392 = vmatprep.subr.bf16.mxu1 %v6391_v28 }
 0x491   : >> { %v3114_v20 = vpop.permute.xlu1 %3113  ;;  %6394 = vmatpush1.bf16.msra.mxu1 %v6383_v47  ;;  %v4280_v47 = vld [vmem:[%s10269_s5 + $0xb8] sm:$0xff] }
 0x492   : >> { %v3150_v5 = vsel %vm737_vm2, %v3112_v41, %v3114_v20  ;;  %6412 = vmatprep.subr.bf16.mxu1 %v6411_v53  ;;  %v4263_v41 = vld [vmem:[%s10269_s5 + $0x30] sm:$0xff]  ;;  %v6439_v8 = vpack.c.bf16 %v4280_v47, %v4279_v43  ;;  %v4282_v53 = vld [vmem:[%s10269_s5 + $0xc8] sm:$0xff] }
 0x493   : >> { %v4271_v47 = vld [vmem:[%s10269_s5 + $0x70] sm:$0xff] }
 0x494   : >> { %v3116_v33 = vpop.permute.xlu0 %3115  ;;  %5699 = vmatmul.mubr.msk.f32.vlgmr.msra.gmra.mrb[28].mxu1 %vm1077_vm7, %v8814_v38 }
 0x495   : >> { %v3138_v17 = vpop.permute.xlu1 %3137  ;;  %v3151_v18 = vsel %vm737_vm2, %v3114_v20, %v3116_v33  ;;  %3198 = vst.msk [vmem:[#allocation3 + $0x118] sm:$0xff] %vm3055_vm3, %v3116_v33  ;;  %6414 = vmatpush1.bf16.msra.mxu1 %v8773_v31  ;;  %3744 = vmatprep.mubr.f32.mxu1 %v10374_v58 }
 0x496   : >> { %v3161_v29 = vsel %vm737_vm2, %v3136_v56, %v3138_v17 }
 0x497   : >> { %v6399_v57 = vpack.c.bf16 %v3161_v29, %v3150_v5  ;;  %v4265_v29 = vld [vmem:[%s10269_s5 + $0x40] sm:$0xff] }
 0x498   : >> { %v3238_v14 = vpop.permute.xlu0 %3237  ;;  %5700 = vmatmul.mubr.msk.f32.gmra.mrb[30].mxu1 %vm1077_vm7, %v8825_v11 }
 0x499   : >> { %v3241_v15 = vsel %vm737_vm2, %v3116_v33, %v3238_v14  ;;  %3258 = vst.msk [vmem:[#allocation3 + $0x298] sm:$0xff] %vm3055_vm3, %v3238_v14  ;;  %6400 = vmatprep.subr.bf16.mxu0 %v6399_v57  ;;  %3750 = vmatprep.mubr.f32.mxu1 %v10374_v58 }
 0x49a   : >> { %6402 = vmatpush1.bf16.msra.mxu0 %v6391_v28  ;;  %v4264_v28 = vld [vmem:[%s10269_s5 + $0x38] sm:$0xff] }
 0x49b   : >> { %6404 = vmatprep.subr.bf16.mxu0 %v8773_v31 }
 0x49c   : >> { %5701 = vmatmul.mubr.msk.f32.gmra.mrb[32].mxu1 %vm1077_vm7, %v8834_v1  ;;  %v3310_v34 = vld [vmem:[#allocation3 + $0x118] sm:$0xff] }
 0x49d   : >> { %v3140_v46 = vpop.permute.xlu1 %3139  ;;  %3756 = vmatprep.mubr.f32.mxu1 %v10374_v58 }
 0x49e   : >> { %v3162_v6 = vsel %vm737_vm2, %v3138_v17, %v3140_v46  ;;  %3210 = vst.msk [vmem:[#allocation3 + $0x178] sm:$0xff] %vm3055_vm3, %v3140_v46  ;;  %6406 = vmatpush1.bf16.msra.mxu0 %v8753_v35  ;;  %v6441_v17 = vpack.c.bf16 %v4264_v28, %v4263_v41  ;;  %v4272_v41 = vld [vmem:[%s10269_s5 + $0x78] sm:$0xff] }
 0x49f   : >> { %v6407_v42 = vpack.c.bf16 %v3162_v6, %v3151_v18  ;;  %v6443_v18 = vpack.c.bf16 %v4282_v53, %v4281_v4  ;;  %v4283_v6 = vld [vmem:[%s10269_s5 + $0xd0] sm:$0xff] }
 0x4a0   : >> { %5702 = vmatmul.mubr.msk.f32.gmra.mrb[34].mxu1 %vm1077_vm7, %v8845_v54  ;;  %v3358_v23 = vld [vmem:[#allocation3 + $0x298] sm:$0xff] }
 0x4a1   : >> { %v3240_v32 = vpop.permute.xlu1 %3239  ;;  %6408 = vmatprep.subr.bf16.mxu0 %v6407_v42  ;;  %3916 = vmatprep.mubr.f32.mxu1 %v10374_v58 }
 0x4a2   : >> { %v3242_v31 = vsel %vm737_vm2, %v3140_v46, %v3240_v32  ;;  %3270 = vst.msk [vmem:[#allocation3 + $0x2f8] sm:$0xff] %vm3055_vm3, %v3240_v32  ;;  %6410 = vmatpush1.bf16.msra.mxu0 %v6399_v57  ;;  %v4266_v57 = vld [vmem:[%s10269_s5 + $0x48] sm:$0xff] }
 0x4a3   : >> { %v6425_v39 = vpack.c.bf16 %v3242_v31, %v3241_v15 }
 0x4a5   : >> { %v3322_v27 = vld [vmem:[#allocation3 + $0x178] sm:$0xff]  ;;  %5703 = vmatmul.mubr.msk.f32.vlgmr.msra.gmra.mrb[22].mxu0 %vm1077_vm7, %v8814_v38 }
 0x4a6   : >> { %v6415_v35 = vpack.c.bf16 %v3322_v27, %v3310_v34  ;;  %3833 = vmatprep.mubr.f32.mxu0 %v10374_v58  ;;  %v6445_v27 = vpack.c.bf16 %v4266_v57, %v4265_v29 }
 0x4a8   : >> { %6416 = vmatprep.subr.bf16.mxu1 %v6415_v35  ;;  %v4267_v35 = vld [vmem:[%s10269_s5 + $0x50] sm:$0xff] }
 0x4a9   : >> { %6418 = vmatpush1.bf16.msra.mxu1 %v6407_v42  ;;  %v3370_v45 = vld [vmem:[#allocation3 + $0x2f8] sm:$0xff]  ;;  %5704 = vmatmul.mubr.msk.f32.gmra.mrb[24].mxu0 %vm1077_vm7, %v8825_v11  ;;  %v8952_v7 = vpop.permute.xlu0 %3377 }
 0x4aa   : >> { %6420 = vmatprep.subr.bf16.mxu1 %v6419_v21  ;;  %3839 = vmatprep.mubr.f32.mxu0 %v10374_v58  ;;  %v6423_v19 = vpack.c.bf16 %v3370_v45, %v3358_v23  ;;  %v4284_v42 = vld [vmem:[%s10269_s5 + $0xd8] sm:$0xff] }
 0x4ab   : >> { %v6447_v60 = vpack.c.bf16 %v4284_v42, %v4283_v6 }
 0x4ad   : >> { %6422 = vmatpush1.bf16.msra.mxu1 %v6421_v50  ;;  %5705 = vmatmul.mubr.msk.f32.gmra.mrb[26].mxu0 %vm1077_vm7, %v8834_v1  ;;  %v6427_v50 = vpack.c.bf16 %v4274_v37, %v4273_v25  ;;  %v9003_v52 = vpop.permute.xlu0 %3387  ;;  %v6449_v25 = vpack.c.bf16 %v4268_v48, %v4267_v35 }
 0x4ae   : >> { %6424 = vmatprep.subr.bf16.mxu1 %v6423_v19  ;;  %3845 = vmatprep.mubr.f32.mxu0 %v10374_v58 }
 0x4af   : >> { %6428 = vmatprep.subr.bf16.mxu0 %v6427_v50 }
 0x4b1   : >> { %6426 = vmatpush1.bf16.msra.mxu1 %v6425_v39  ;;  %5706 = vmatmul.mubr.msk.f32.gmra.mrb[28].mxu0 %vm1077_vm7, %v8845_v54 }
 0x4b2   : >> { %v8972_v0 = vpop.permute.xlu1 %3382 }
 0x4b4   : >> { %5707 = vmatmul.mubr.msk.f32.vlgmr.msra.gmra.mrb[36].mxu1 %vm1077_vm7, %v8814_v38  ;;  %v4258_v38 = vld [vmem:[%s10269_s5 + $0x8] sm:$0xff] }
 0x4b5   : >> { %3922 = vmatprep.mubr.f32.mxu1 %v10374_v58 }
 0x4b6   : >> { %v9026_v14 = vpop.permute.xlu1 %3392 }
 0x4b8   : >> { %5708 = vmatmul.mubr.msk.f32.gmra.mrb[38].mxu1 %vm1077_vm7, %v8825_v11  ;;  %v6429_v11 = vpack.c.bf16 %v4258_v38, %v4257_v12 }
 0x4b9   : >> { %3928 = vmatprep.mubr.f32.mxu1 %v10374_v58 }
 0x4ba   : >> { %6430 = vmatpush3.bf16.msra.mxu0 %v6429_v11  ;;  %v4286_v11 = vld [vmem:[%s10269_s5 + $0xe8] sm:$0xff] }
 0x4bc   : >> { %5709 = vmatmul.mubr.msk.f32.gmra.mrb[40].mxu1 %vm1077_vm7, %v8834_v1  ;;  %v4275_v1 = vld [vmem:[%s10269_s5 + $0x90] sm:$0xff] }
 0x4bd   : >> { %3934 = vmatprep.mubr.f32.mxu1 %v10374_v58  ;;  %v6431_v24 = vpack.c.bf16 %v4276_v40, %v4275_v1 }
 0x4bf   : >> { %6432 = vmatprep.subr.bf16.mxu0 %v6431_v24  ;;  %v4270_v24 = vld [vmem:[%s10269_s5 + $0x68] sm:$0xff] }
 0x4c0   : >> { %5710 = vmatmul.mubr.msk.f32.gmra.mrb[42].mxu1 %vm1077_vm7, %v8845_v54  ;;  %v4259_v54 = vld [vmem:[%s10269_s5 + $0x10] sm:$0xff] }
 0x4c1   : >> { %v6433_v51 = vpack.c.bf16 %v4260_v13, %v4259_v54 }
 0x4c3   : >> { %6434 = vmatpush3.bf16.msra.mxu0 %v6433_v51 }
 0x4c4   : >> { %6436 = vmatprep.subr.bf16.mxu0 %v6435_v62  ;;  %v4287_v62 = vld [vmem:[%s10269_s5 + $0xf0] sm:$0xff] }
 0x4c5   : >> { %v6455_v43 = vpack.c.bf16 %v4288_v36, %v4287_v62 }
 0x4c7   : >> { %6438 = vmatpush3.bf16.msra.mxu0 %v6437_v61 }
 0x4c8   : >> { %6440 = vmatprep.subr.bf16.mxu0 %v6439_v8  ;;  %v6457_v8 = vpack.c.bf16 %v4272_v41, %v4271_v47  ;;  %v4308_v41 = vld [vmem:[%s10269_s5 + $0x198] sm:$0xff] }
 0x4cb   : >> { %6442 = vmatpush3.bf16.msra.mxu0 %v6441_v17 }
 0x4cc   : >> { %6444 = vmatprep.subr.bf16.mxu0 %v6443_v18 }
 0x4cf   : >> { %6446 = vmatpush3.bf16.msra.mxu0 %v6445_v27 }
 0x4d0   : >> { %6448 = vmatprep.subr.bf16.mxu0 %v6447_v60 }
 0x4d3   : >> { %6450 = vmatpush3.bf16.msra.mxu0 %v6449_v25 }
 0x51a   : >> { %v3473_v10 = vpop.f32.mrb[12].mxu1 }
 0x51b   : >> { %v8955_v9 = vadd.f32 %v3473_v10, %v8952_v7  ;;  %v3475_v59 = vpop.f32.mrb[13].mxu1  ;;  %v4285_v10 = vld [vmem:[%s10269_s5 + $0xe0] sm:$0xff] }
 0x51c   : >> { %v8958_v49 = vadd.f32 %v3475_v59, %v8952_v7  ;;  %v6451_v40 = vpack.c.bf16 %v4286_v11, %v4285_v10 }
 0x51e   : >> { %v3941_v2 = vmax.f32 %v8955_v9, %v8958_v49  ;;  %v3479_v63 = vpop.f32.mrb[14].mxu1  ;;  %v4269_v9 = vld [vmem:[%s10269_s5 + $0x60] sm:$0xff]  ;;  %6452 = vmatprep.subr.bf16.mxu0 %v6451_v40 }
 0x51f   : >> { %v8986_v55 = vadd.f32 %v3479_v63, %v8972_v0  ;;  %v3481_v44 = vpop.f32.mrb[15].mxu1  ;;  %v6453_v13 = vpack.c.bf16 %v4270_v24, %v4269_v9  ;;  %v4337_v40 = vld [vmem:[%s10269_s5 + $0x280] sm:$0xff] }
 0x520   : >> { %v8992_v16 = vadd.f32 %v3481_v44, %v8972_v0 }
 0x521   : >> { %6454 = vmatpush3.bf16.msra.mxu0 %v6453_v13 }
 0x522   : >> { %v3951_v56 = vmax.f32 %v8986_v55, %v8992_v16  ;;  %v3485_v22 = vpop.f32.mrb[16].mxu1  ;;  %6456 = vmatprep.subr.bf16.mxu0 %v6455_v43 }
 0x523   : >> { %v3486_v20 = vadd.f32 %v3485_v22, %v9003_v52  ;;  %v3487_v5 = vpop.f32.mrb[17].mxu1 }
 0x524   : >> { %v9018_v33 = vadd.f32 %v3487_v5, %v9003_v52 }
 0x525   : >> { %6458 = vmatpush3.bf16.msra.mxu0 %v6457_v8 }
 0x526   : >> { %v3961_v15 = vmax.f32 %v3486_v20, %v9018_v33  ;;  %v3491_v46 = vpop.f32.mrb[18].mxu1 }
 0x527   : >> { %v3492_v32 = vadd.f32 %v3491_v46, %v9026_v14  ;;  %v3493_v31 = vpop.f32.mrb[19].mxu1 }
 0x528   : >> { %v9037_v34 = vadd.f32 %v3493_v31, %v9026_v14 }
 0x52a   : >> { %v3971_v21 = vmax.f32 %v3492_v32, %v9037_v34  ;;  %v3562_v45 = vpop.f32.mrb[20].mxu1 }
 0x52b   : >> { %v3563_v23 = vadd.f32 %v3562_v45, %v8952_v7  ;;  %v3564_v19 = vpop.f32.mrb[21].mxu1 }
 0x52c   : >> { %v3565_v39 = vadd.f32 %v3564_v19, %v8952_v7 }
 0x52d   : >> { %v3942_v37 = vmax.f32 %v8958_v49, %v3563_v23  ;;  %v9049_v50 = vmax.f32 %v3941_v2, %v3563_v23 }
 0x52e   : >> { %v3943_v12 = vmax.f32 %v3563_v23, %v3565_v39  ;;  %v3568_v38 = vpop.f32.mrb[22].mxu1 }
 0x52f   : >> { %v9060_v59 = vmax.f32 %v3942_v37, %v3565_v39  ;;  %v3569_v49 = vadd.f32 %v3568_v38, %v8972_v0  ;;  %v3570_v1 = vpop.f32.mrb[23].mxu1  ;;  %4061 = vrot.lane.b32.xlu1 %v9049_v50, %s10345_s29 }
 0x530   : >> { %v3571_v54 = vadd.f32 %v3570_v1, %v8972_v0  ;;  %v4306_v1 = vld [vmem:[%s10269_s5 + $0x188] sm:$0xff] }
 0x531   : >> { %v3952_v2 = vmax.f32 %v8992_v16, %v3569_v49  ;;  %v9070_v63 = vmax.f32 %v3951_v56, %v3569_v49 }
 0x532   : >> { %v3953_v51 = vmax.f32 %v3569_v49, %v3571_v54  ;;  %v3574_v30 = vpop.f32.mrb[24].mxu1  ;;  %v4305_v49 = vld [vmem:[%s10269_s5 + $0x180] sm:$0xff] }
 0x533   : >> { %v9072_v26 = vmax.f32 %v3952_v2, %v3571_v54  ;;  %v3575_v3 = vadd.f32 %v3574_v30, %v9003_v52  ;;  %v3576_v55 = vpop.f32.mrb[25].mxu1  ;;  %v6459_v13 = vpack.c.bf16 %v4306_v1, %v4305_v49  ;;  %v4338_v2 = vld [vmem:[%s10269_s5 + $0x288] sm:$0xff]  ;;  %v4313_v49 = vld [vmem:[%s10269_s5 + $0x1c0] sm:$0xff] }
 0x534   : >> { %v3577_v44 = vadd.f32 %v3576_v55, %v9003_v52  ;;  %v4290_v30 = vld [vmem:[%s10269_s5 + $0x108] sm:$0xff]  ;;  %v6491_v36 = vpack.c.bf16 %v4338_v2, %v4337_v40 }
 0x535   : >> { %v3962_v16 = vmax.f32 %v9018_v33, %v3575_v3  ;;  %v9083_v61 = vmax.f32 %v3961_v15, %v3575_v3  ;;  %6460 = vmatprep.subr.bf16.mxu1 %v6459_v13  ;;  %v4314_v1 = vld [vmem:[%s10269_s5 + $0x1c8] sm:$0xff]  ;;  %v4297_v13 = vld [vmem:[%s10269_s5 + $0x140] sm:$0xff] }
 0x536   : >> { %v3963_v56 = vmax.f32 %v3575_v3, %v3577_v44  ;;  %v3580_v22 = vpop.f32.mrb[26].mxu1  ;;  %6492 = vmatprep.subr.bf16.mxu0 %v6491_v36  ;;  %v4298_v2 = vld [vmem:[%s10269_s5 + $0x148] sm:$0xff] }
 0x537   : >> { %v9091_v28 = vmax.f32 %v3962_v16, %v3577_v44  ;;  %v3581_v4 = vadd.f32 %v3580_v22, %v9026_v14  ;;  %v3582_v53 = vpop.f32.mrb[27].mxu1  ;;  %v4307_v16 = vld [vmem:[%s10269_s5 + $0x190] sm:$0xff] }
 0x538   : >> { %v9095_v20 = vadd.f32 %v3582_v53, %v9026_v14  ;;  %v6463_v8 = vpack.c.bf16 %v4308_v41, %v4307_v16  ;;  %v4292_v53 = vld [vmem:[%s10269_s5 + $0x118] sm:$0xff] }
 0x539   : >> { %v6761_v5 = vpack.i.bf16 %v9091_v28, %v9070_v63  ;;  %v3972_v33 = vmax.f32 %v9037_v34, %v3581_v4  ;;  %v9100_v17 = vmax.f32 %v3971_v21, %v3581_v4 }
 0x53a   : >> { %v3651_v18 = vpop.f32.mrb[14].mxu0  ;;  %v3973_v29 = vmax.f32 %v3581_v4, %v9095_v20  ;;  %v4291_v4 = vld [vmem:[%s10269_s5 + $0x110] sm:$0xff] }
 0x53b   : >> { %v9104_v57 = vadd.f32 %v3651_v18, %v8952_v7  ;;  %v9107_v15 = vmax.f32 %v3972_v33, %v9095_v20  ;;  %v3653_v46 = vpop.f32.mrb[15].mxu0  ;;  %6762 = vrot.lane.b32.xlu1 %v6761_v5, %s10345_s29  ;;  %v6465_v33 = vpack.c.bf16 %v4292_v53, %v4291_v4  ;;  %v4310_v18 = vld [vmem:[%s10269_s5 + $0x1a8] sm:$0xff]  ;;  %v4299_v4 = vld [vmem:[%s10269_s5 + $0x150] sm:$0xff]  ;;  %v4300_v53 = vld [vmem:[%s10269_s5 + $0x158] sm:$0xff] }
 0x53c   : >> { %v9111_v6 = vadd.f32 %v3653_v46, %v8952_v7 }
 0x53d   : >> { %v3944_v42 = vmax.f32 %v3565_v39, %v9104_v57  ;;  %v9115_v32 = vmax.f32 %v3943_v12, %v9104_v57 }
 0x53e   : >> { %v3945_v31 = vmax.f32 %v9104_v57, %v9111_v6  ;;  %v3657_v34 = vpop.f32.mrb[16].mxu0  ;;  %v4318_v57 = vld [vmem:[%s10269_s5 + $0x1e8] sm:$0xff] }
 0x53f   : >> { %v6756_v27 = vpack.i.bf16 %v9115_v32, %v9060_v59  ;;  %v9122_v60 = vmax.f32 %v3944_v42, %v9111_v6  ;;  %v9125_v35 = vadd.f32 %v3657_v34, %v8972_v0  ;;  %v3659_v48 = vpop.f32.mrb[17].mxu0  ;;  %v4293_v34 = vld [vmem:[%s10269_s5 + $0x120] sm:$0xff] }
 0x540   : >> { %v9128_v21 = vadd.f32 %v3659_v48, %v8972_v0  ;;  %v4311_v48 = vld [vmem:[%s10269_s5 + $0x1b0] sm:$0xff] }
 0x541   : >> { %v9131_v45 = vmax.f32 %v3953_v51, %v9125_v35  ;;  %v3954_v23 = vmax.f32 %v3571_v54, %v9125_v35  ;;  %6757 = vrot.lane.b32.xlu0 %v6756_v27, %s10345_s29  ;;  %v4289_v51 = vld [vmem:[%s10269_s5 + $0x100] sm:$0xff]  ;;  %v4294_v27 = vld [vmem:[%s10269_s5 + $0x128] sm:$0xff] }
 0x542   : >> { %v3955_v19 = vmax.f32 %v9125_v35, %v9128_v21  ;;  %v3663_v39 = vpop.f32.mrb[18].mxu0  ;;  %v6461_v47 = vpack.c.bf16 %v4290_v30, %v4289_v51  ;;  %v6477_v51 = vpack.c.bf16 %v4298_v2, %v4297_v13  ;;  %v4315_v30 = vld [vmem:[%s10269_s5 + $0x1d0] sm:$0xff] }
 0x543   : >> { %v6766_v25 = vpack.i.bf16 %v9131_v45, %v9072_v26  ;;  %v9140_v37 = vmax.f32 %v3954_v23, %v9128_v21  ;;  %v9143_v12 = vadd.f32 %v3663_v39, %v9003_v52  ;;  %v3665_v38 = vpop.f32.mrb[19].mxu0  ;;  %v4312_v23 = vld [vmem:[%s10269_s5 + $0x1b8] sm:$0xff]  ;;  %v6469_v39 = vpack.c.bf16 %v4294_v27, %v4293_v34  ;;  %v4301_v34 = vld [vmem:[%s10269_s5 + $0x160] sm:$0xff]  ;;  %v4319_v35 = vld [vmem:[%s10269_s5 + $0x1f0] sm:$0xff] }
 0x544   : >> { %v9146_v10 = vadd.f32 %v3665_v38, %v9003_v52  ;;  %6462 = vmatpush3.bf16.msra.mxu1 %v6461_v47  ;;  %v4295_v38 = vld [vmem:[%s10269_s5 + $0x130] sm:$0xff] }
 0x545   : >> { %v3964_v11 = vmax.f32 %v3577_v44, %v9143_v12  ;;  %v9150_v9 = vmax.f32 %v3963_v56, %v9143_v12  ;;  %6767 = vrot.lane.b32.xlu0 %v6766_v25, %s10345_s29  ;;  %6464 = vmatprep.subr.bf16.mxu1 %v6463_v8  ;;  %v6471_v25 = vpack.c.bf16 %v4312_v23, %v4311_v48  ;;  %v4302_v23 = vld [vmem:[%s10269_s5 + $0x168] sm:$0xff] }
 0x546   : >> { %v3965_v24 = vmax.f32 %v9143_v12, %v9146_v10  ;;  %v3669_v54 = vpop.f32.mrb[20].mxu0 }
 0x547   : >> { %v6771_v3 = vpack.i.bf16 %v9083_v61, %v9150_v9  ;;  %v9176_v55 = vmax.f32 %v3964_v11, %v9146_v10  ;;  %v9179_v44 = vadd.f32 %v3669_v54, %v9026_v14  ;;  %v3671_v62 = vpop.f32.mrb[21].mxu0  ;;  %v4296_v11 = vld [vmem:[%s10269_s5 + $0x138] sm:$0xff]  ;;  %v6475_v54 = vpack.c.bf16 %v4314_v1, %v4313_v49 }
 0x548   : >> { %v9185_v43 = vadd.f32 %v3671_v62, %v9026_v14  ;;  %6466 = vmatpush3.bf16.msra.mxu1 %v6465_v33  ;;  %v6473_v40 = vpack.c.bf16 %v4296_v11, %v4295_v38  ;;  %v6485_v11 = vpack.c.bf16 %v4302_v23, %v4301_v34 }
 0x549   : >> { %v9191_v56 = vmax.f32 %v3973_v29, %v9179_v44  ;;  %v3974_v22 = vmax.f32 %v9095_v20, %v9179_v44  ;;  %6772 = vrot.lane.b32.xlu0 %v6771_v3, %s10345_s29  ;;  %v4309_v20 = vld [vmem:[%s10269_s5 + $0x1a0] sm:$0xff]  ;;  %v4316_v3 = vld [vmem:[%s10269_s5 + $0x1d8] sm:$0xff] }
 0x54a   : >> { %v3975_v5 = vmax.f32 %v9179_v44, %v9185_v43  ;;  %v6467_v42 = vpack.c.bf16 %v4310_v18, %v4309_v20  ;;  %v6479_v62 = vpack.c.bf16 %v4316_v3, %v4315_v30  ;;  %v6481_v18 = vpack.c.bf16 %v4300_v53, %v4299_v4 }
 0x54b   : >> { %v6781_v29 = vpack.i.bf16 %v9191_v56, %v9107_v15  ;;  %v9213_v46 = vmax.f32 %v3974_v22, %v9185_v43 }
 0x54c   : >> { %6468 = vmatprep.subr.bf16.mxu1 %v6467_v42 }
 0x54d   : >> { %6782 = vrot.lane.b32.xlu1 %v6781_v29, %s10345_s29  ;;  %6470 = vmatpush3.bf16.msra.mxu1 %v6469_v39  ;;  %v4317_v29 = vld [vmem:[%s10269_s5 + $0x1e0] sm:$0xff] }
 0x54e   : >> { %6472 = vmatprep.subr.bf16.mxu1 %v6471_v25  ;;  %v6483_v48 = vpack.c.bf16 %v4318_v57, %v4317_v29 }
 0x551   : >> { %6474 = vmatpush3.bf16.msra.mxu1 %v6473_v40 }
 0x552   : >> { %6476 = vmatprep.subr.bf16.mxu1 %v6475_v54 }
 0x555   : >> { %6478 = vmatpush3.bf16.msra.mxu1 %v6477_v51 }
 0x556   : >> { %6480 = vmatprep.subr.bf16.mxu1 %v6479_v62  ;;  %v4303_v62 = vld [vmem:[%s10269_s5 + $0x170] sm:$0xff] }
 0x559   : >> { %6482 = vmatpush3.bf16.msra.mxu1 %v6481_v18 }
 0x55a   : >> { %6484 = vmatprep.subr.bf16.mxu1 %v6483_v48 }
 0x55d   : >> { %6486 = vmatpush3.bf16.msra.mxu1 %v6485_v11 }
 0x567   : >> { %v3740_v36 = vpop.f32.mrb[28].mxu1 }
 0x568   : >> { %v9253_v16 = vadd.f32 %v3740_v36, %v8952_v7  ;;  %v3742_v47 = vpop.f32.mrb[29].mxu1  ;;  %v4304_v36 = vld [vmem:[%s10269_s5 + $0x178] sm:$0xff] }
 0x569   : >> { %v9256_v41 = vadd.f32 %v3742_v47, %v8952_v7 }
 0x56a   : >> { %v3946_v22 = vmax.f32 %v9111_v6, %v9253_v16  ;;  %v9264_v8 = vmax.f32 %v3945_v31, %v9253_v16 }
 0x56b   : >> { %v3947_v33 = vmax.f32 %v9253_v16, %v9256_v41  ;;  %v3746_v20 = vpop.f32.mrb[30].mxu1 }
 0x56c   : >> { %v9281_v6 = vmax.f32 %v3946_v22, %v9256_v41  ;;  %v9284_v31 = vadd.f32 %v3746_v20, %v8972_v0  ;;  %v3748_v42 = vpop.f32.mrb[31].mxu1  ;;  %v6489_v22 = vpack.c.bf16 %v4304_v36, %v4303_v62 }
 0x56d   : >> { %v9290_v27 = vadd.f32 %v3748_v42, %v8972_v0 }
 0x56e   : >> { %v6776_v39 = vpack.i.bf16 %v9281_v6, %v9100_v17  ;;  %v3956_v25 = vmax.f32 %v9128_v21, %v9284_v31  ;;  %v9303_v38 = vmax.f32 %v3955_v19, %v9284_v31  ;;  %v4320_v21 = vld [vmem:[%s10269_s5 + $0x1f8] sm:$0xff]  ;;  %v6791_v19 = vpack.i.bf16 %v9140_v37, %v9264_v8 }
 0x56f   : >> { %v3957_v49 = vmax.f32 %v9284_v31, %v9290_v27  ;;  %v3752_v1 = vpop.f32.mrb[32].mxu1  ;;  %v6487_v3 = vpack.c.bf16 %v4320_v21, %v4319_v35 }
 0x570   : >> { %v9308_v40 = vmax.f32 %v3956_v25, %v9290_v27  ;;  %v3753_v54 = vadd.f32 %v3752_v1, %v9003_v52  ;;  %v3754_v13 = vpop.f32.mrb[33].mxu1  ;;  %6777 = vrot.lane.b32.xlu0 %v6776_v39, %s10345_s29  ;;  %v6796_v62 = vpack.i.bf16 %v9176_v55, %v9303_v38 }
 0x571   : >> { %v3755_v2 = vadd.f32 %v3754_v13, %v9003_v52  ;;  %6488 = vmatprep.subr.bf16.mxu1 %v6487_v3 }
 0x572   : >> { %v3966_v51 = vmax.f32 %v9146_v10, %v3753_v54  ;;  %v9325_v30 = vmax.f32 %v3965_v24, %v3753_v54  ;;  %6490 = vmatpush3.bf16.msra.mxu1 %v6489_v22  ;;  %v4369_v10 = vld [vmem:[%s10269_s5 + $0x380] sm:$0xff]  ;;  %v4370_v24 = vld [vmem:[%s10269_s5 + $0x388] sm:$0xff] }
 0x573   : >> { %v3967_v16 = vmax.f32 %v3753_v54, %v3755_v2  ;;  %v3758_v47 = vpop.f32.mrb[34].mxu1  ;;  %v6523_v31 = vpack.c.bf16 %v4370_v24, %v4369_v10 }
 0x574   : >> { %v9333_v4 = vmax.f32 %v3966_v51, %v3755_v2  ;;  %v3759_v53 = vadd.f32 %v3758_v47, %v9026_v14  ;;  %v3760_v20 = vpop.f32.mrb[35].mxu1  ;;  %6792 = vrot.lane.b32.xlu0 %v6791_v19, %s10345_s29  ;;  %v6801_v18 = vpack.i.bf16 %v9308_v40, %v9325_v30 }
 0x575   : >> { %v3761_v12 = vadd.f32 %v3760_v20, %v9026_v14  ;;  %6524 = vmatprep.subr.bf16.mxu1 %v6523_v31 }
 0x576   : >> { %v3976_v29 = vmax.f32 %v9185_v43, %v3759_v53  ;;  %v9350_v57 = vmax.f32 %v3975_v5, %v3759_v53 }
 0x577   : >> { %v3977_v42 = vmax.f32 %v3759_v53, %v3761_v12 }
 0x578   : >> { %v3829_v34 = vpop.f32.mrb[22].mxu0  ;;  %v9352_v48 = vmax.f32 %v3976_v29, %v3761_v12  ;;  %6802 = vrot.lane.b32.xlu0 %v6801_v18, %s10345_s29  ;;  %v6806_v25 = vpack.i.bf16 %v9333_v4, %v9350_v57 }
 0x579   : >> { %v3830_v23 = vadd.f32 %v3829_v34, %v8952_v7  ;;  %v3831_v39 = vpop.f32.mrb[23].mxu0 }
 0x57a   : >> { %v3832_v11 = vadd.f32 %v3831_v39, %v8952_v7 }
 0x57b   : >> { %v3948_v44 = vmax.f32 %v9256_v41, %v3830_v23  ;;  %v9360_v43 = vmax.f32 %v3947_v33, %v3830_v23 }
 0x57c   : >> { %v3835_v5 = vpop.f32.mrb[24].mxu0  ;;  %v3949_v1 = vmax.f32 %v3830_v23, %v3832_v11  ;;  %6807 = vrot.lane.b32.xlu0 %v6806_v25, %s10345_s29 }
 0x57d   : >> { %v6786_v54 = vpack.i.bf16 %v9122_v60, %v9360_v43  ;;  %v9365_v13 = vmax.f32 %v3948_v44, %v3832_v11  ;;  %v3836_v35 = vadd.f32 %v3835_v5, %v8972_v0  ;;  %v3837_v21 = vpop.f32.mrb[25].mxu0 }
 0x57e   : >> { %v3838_v19 = vadd.f32 %v3837_v21, %v8972_v0 }
 0x57f   : >> { %v9369_v51 = vmax.f32 %v3957_v49, %v3836_v35  ;;  %v3958_v41 = vmax.f32 %v9290_v27, %v3836_v35  ;;  %6787 = vrot.lane.b32.xlu1 %v6786_v54, %s10345_s29 }
 0x580   : >> { %v3841_v33 = vpop.f32.mrb[26].mxu0  ;;  %v3959_v3 = vmax.f32 %v3836_v35, %v3838_v19 }
 0x581   : >> { %v9375_v36 = vmax.f32 %v3958_v41, %v3838_v19  ;;  %v3842_v47 = vadd.f32 %v3841_v33, %v9003_v52  ;;  %v3843_v22 = vpop.f32.mrb[27].mxu0  ;;  %v6816_v24 = vpack.i.bf16 %v9213_v46, %v9369_v51 }
 0x582   : >> { %v3844_v53 = vadd.f32 %v3843_v22, %v9003_v52 }
 0x583   : >> { %v3968_v20 = vmax.f32 %v3755_v2, %v3842_v47  ;;  %v9379_v10 = vmax.f32 %v3967_v16, %v3842_v47  ;;  %6797 = vrot.lane.b32.xlu1 %v6796_v62, %s10345_s29 }
 0x584   : >> { %v3847_v27 = vpop.f32.mrb[28].mxu0  ;;  %v3969_v49 = vmax.f32 %v3842_v47, %v3844_v53 }
 0x585   : >> { %v9384_v18 = vmax.f32 %v3968_v20, %v3844_v53  ;;  %v3848_v29 = vadd.f32 %v3847_v27, %v9026_v14  ;;  %v3849_v31 = vpop.f32.mrb[29].mxu0  ;;  %v6821_v5 = vpack.i.bf16 %v9365_v13, %v9379_v10 }
 0x586   : >> { %v3850_v34 = vadd.f32 %v3849_v31, %v9026_v14 }
 0x587   : >> { %v3918_v23 = vpop.f32.mrb[36].mxu1  ;;  %v3978_v39 = vmax.f32 %v3761_v12, %v3848_v29  ;;  %v9388_v25 = vmax.f32 %v3977_v42, %v3848_v29  ;;  %6817 = vrot.lane.b32.xlu1 %v6816_v24, %s10345_s29 }
 0x588   : >> { %v3919_v2 = vadd.f32 %v3918_v23, %v8952_v7  ;;  %v3920_v16 = vpop.f32.mrb[37].mxu1  ;;  %v3979_v44 = vmax.f32 %v3848_v29, %v3850_v34 }
 0x589   : >> { %v3921_v54 = vadd.f32 %v3920_v16, %v8952_v7  ;;  %v9395_v35 = vmax.f32 %v3978_v39, %v3850_v34  ;;  %v6826_v22 = vpack.i.bf16 %v9375_v36, %v9388_v25 }
 0x58a   : >> { %v3950_v21 = vmax.f32 %v3832_v11, %v3919_v2  ;;  %v9397_v41 = vmax.f32 %v3949_v1, %v3919_v2 }
 0x58b   : >> { %v3924_v33 = vpop.f32.mrb[38].mxu1  ;;  %6822 = vrot.lane.b32.xlu1 %v6821_v5, %s10345_s29 }
 0x58c   : >> { %v6811_v12 = vpack.i.bf16 %v9352_v48, %v9397_v41  ;;  %v9402_v42 = vmax.f32 %v3950_v21, %v3921_v54  ;;  %v3925_v62 = vadd.f32 %v3924_v33, %v8972_v0  ;;  %v3926_v47 = vpop.f32.mrb[39].mxu1  ;;  %v4321_v33 = vld [vmem:[%s10269_s5 + $0x200] sm:$0xff] }
 0x58d   : >> { %v3927_v7 = vadd.f32 %v3926_v47, %v8972_v0  ;;  %v4339_v47 = vld [vmem:[%s10269_s5 + $0x290] sm:$0xff] }
 0x58e   : >> { %v3960_v20 = vmax.f32 %v3838_v19, %v3925_v62  ;;  %v9408_v11 = vmax.f32 %v3959_v3, %v3925_v62  ;;  %6812 = vrot.lane.b32.xlu0 %v6811_v12, %s10345_s29  ;;  %v4322_v12 = vld [vmem:[%s10269_s5 + $0x208] sm:$0xff] }
 0x58f   : >> { %v3930_v1 = vpop.f32.mrb[40].mxu1  ;;  %6827 = vrot.lane.b32.xlu1 %v6826_v22, %s10345_s29  ;;  %v4340_v22 = vld [vmem:[%s10269_s5 + $0x298] sm:$0xff] }
 0x590   : >> { %v6831_v27 = vpack.i.bf16 %v9384_v18, %v9408_v11  ;;  %v9414_v24 = vmax.f32 %v3960_v20, %v3927_v7  ;;  %v3931_v29 = vadd.f32 %v3930_v1, %v9003_v52  ;;  %v3932_v31 = vpop.f32.mrb[41].mxu1 }
 0x591   : >> { %v3933_v23 = vadd.f32 %v3932_v31, %v9003_v52  ;;  %v6493_v31 = vpack.c.bf16 %v4322_v12, %v4321_v33 }
 0x592   : >> { %v3970_v39 = vmax.f32 %v3844_v53, %v3931_v29  ;;  %v9418_v0 = vmax.f32 %v3969_v49, %v3931_v29  ;;  %6832 = vrot.lane.b32.xlu0 %v6831_v27, %s10345_s29 }
 0x593   : >> { %v3936_v19 = vpop.f32.mrb[42].mxu1  ;;  %4079 = vrot.lane.b32.xlu1 %v9402_v42, %s10345_s29 }
 0x594   : >> { %v9423_v3 = vmax.f32 %v3970_v39, %v3933_v23  ;;  %v3937_v2 = vadd.f32 %v3936_v19, %v9026_v14  ;;  %v3938_v16 = vpop.f32.mrb[43].mxu1 }
 0x595   : >> { %v3939_v5 = vadd.f32 %v3938_v16, %v9026_v14  ;;  %v4323_v16 = vld [vmem:[%s10269_s5 + $0x210] sm:$0xff] }
 0x596   : >> { %v9427_v54 = vmax.f32 %v3979_v44, %v3937_v2  ;;  %v3980_v21 = vmax.f32 %v3850_v34, %v3937_v2  ;;  %4117 = vrot.lane.b32.xlu0 %v9418_v0, %s10345_s29  ;;  %v6495_v2 = vpack.c.bf16 %v4340_v22, %v4339_v47 }
 0x597   : >> { %4099 = vrot.lane.b32.xlu1 %v9414_v24, %s10345_s29 }
 0x598   : >> { %v6836_v52 = vpack.i.bf16 %v9427_v54, %v9395_v35  ;;  %v9435_v53 = vmax.f32 %v3980_v21, %v3939_v5  ;;  %v4324_v5 = vld [vmem:[%s10269_s5 + $0x218] sm:$0xff] }
 0x599   : >> { %v6497_v12 = vpack.c.bf16 %v4324_v5, %v4323_v16 }
 0x59a   : >> { %6837 = vrot.lane.b32.xlu0 %v6836_v52, %s10345_s29 }
 0x59b   : >> { %4119 = vrot.lane.b32.xlu1 %v9423_v3, %s10345_s29 }
 0x59e   : >> { %4139 = vrot.lane.b32.xlu0 %v9435_v53, %s10345_s29 }
 0x5a1   : >> { %v4062_v14 = vpop.permute.xlu1 %4061 }
 0x5ad   : >> { %v6763_v62 = vpop.permute.xlu1 %6762 }
 0x5ae   : >> { %v6764_v23 = vunpack.i.l.bf16 %v6763_v62  ;;  %v6765_v47 = vunpack.i.h.bf16 %v6763_v62 }
 0x5b3   : >> { %v9442_v49 = vpop.permute.xlu0 %6757 }
 0x5b4   : >> { %v6760_v34 = vunpack.i.h.bf16 %v9442_v49  ;;  %v6759_v44 = vunpack.i.l.bf16 %v9442_v49  ;;  %v4355_v49 = vld [vmem:[%s10269_s5 + $0x310] sm:$0xff] }
 0x5b6   : >> { %v4141_v7 = vsel %vm737_vm2, %v4062_v14, %v6759_v44  ;;  %v4142_v20 = vsel %vm737_vm2, %v6759_v44, %v6760_v34 }
 0x5b7   : >> { %v4217_v1 = vmax.f32 %v9049_v50, %v4141_v7  ;;  %v9463_v27 = vpop.permute.xlu0 %6767  ;;  %v4218_v29 = vmax.f32 %v9060_v59, %v4142_v20  ;;  %v4341_v50 = vld [vmem:[%s10269_s5 + $0x2a0] sm:$0xff]  ;;  %v4342_v59 = vld [vmem:[%s10269_s5 + $0x2a8] sm:$0xff] }
 0x5b8   : >> { %v6770_v39 = vunpack.i.h.bf16 %v9463_v27  ;;  %v6769_v19 = vunpack.i.l.bf16 %v9463_v27  ;;  %v6499_v20 = vpack.c.bf16 %v4342_v59, %v4341_v50 }
 0x5b9   : >> { %4485 = vmatprep.mubr.f32.mxu0 %v4218_v29  ;;  %v4326_v29 = vld [vmem:[%s10269_s5 + $0x228] sm:$0xff] }
 0x5ba   : >> { %4486 = vmatmul.mubr.f32.vlgmr.msra.gmra.mrb[30].mxu0 %v4217_v1  ;;  %v4151_v21 = vsel %vm737_vm2, %v6769_v19, %v6770_v39  ;;  %v4150_v52 = vsel %vm737_vm2, %v6764_v23, %v6769_v19  ;;  %v4325_v1 = vld [vmem:[%s10269_s5 + $0x220] sm:$0xff] }
 0x5bb   : >> { %v9484_v14 = vpop.permute.xlu0 %6772  ;;  %v4228_v44 = vmax.f32 %v9072_v26, %v4151_v21  ;;  %v4227_v33 = vmax.f32 %v9070_v63, %v4150_v52  ;;  %6494 = vmatpush3.bf16.msra.mxu0 %v6493_v31  ;;  %v4343_v63 = vld [vmem:[%s10269_s5 + $0x2b0] sm:$0xff]  ;;  %v4344_v26 = vld [vmem:[%s10269_s5 + $0x2b8] sm:$0xff]  ;;  %v6501_v16 = vpack.c.bf16 %v4326_v29, %v4325_v1 }
 0x5bc   : >> { %v6775_v22 = vunpack.i.h.bf16 %v9484_v14  ;;  %v6774_v7 = vunpack.i.l.bf16 %v9484_v14  ;;  %6496 = vmatprep.subr.bf16.mxu0 %v6495_v2  ;;  %v6503_v59 = vpack.c.bf16 %v4344_v26, %v4343_v63  ;;  %v4327_v21 = vld [vmem:[%s10269_s5 + $0x230] sm:$0xff]  ;;  %v4328_v52 = vld [vmem:[%s10269_s5 + $0x238] sm:$0xff] }
 0x5bd   : >> { %4490 = vmatprep.mubr.f32.mxu0 %v4228_v44  ;;  %v4347_v1 = vld [vmem:[%s10269_s5 + $0x2d0] sm:$0xff] }
 0x5be   : >> { %4491 = vmatmul.mubr.f32.gmra.mrb[32].mxu0 %v4227_v33  ;;  %v4160_v62 = vsel %vm737_vm2, %v6765_v47, %v6774_v7  ;;  %v4159_v31 = vsel %vm737_vm2, %v6775_v22, %v6765_v47  ;;  %v4329_v22 = vld [vmem:[%s10269_s5 + $0x240] sm:$0xff]  ;;  %v4331_v26 = vld [vmem:[%s10269_s5 + $0x250] sm:$0xff] }
 0x5bf   : >> { %v9506_v23 = vpop.permute.xlu1 %6782  ;;  %v4238_v19 = vmax.f32 %v9091_v28, %v4160_v62  ;;  %v4237_v2 = vmax.f32 %v9083_v61, %v4159_v31  ;;  %6498 = vmatpush3.bf16.msra.mxu0 %v6497_v12  ;;  %v4345_v61 = vld [vmem:[%s10269_s5 + $0x2c0] sm:$0xff]  ;;  %v4346_v28 = vld [vmem:[%s10269_s5 + $0x2c8] sm:$0xff]  ;;  %v6505_v12 = vpack.c.bf16 %v4328_v52, %v4327_v21  ;;  %v4332_v62 = vld [vmem:[%s10269_s5 + $0x258] sm:$0xff] }
 0x5c0   : >> { %v10324_v5 = vunpack.i.h.bf16 %v9506_v23  ;;  %v6784_v50 = vunpack.i.l.bf16 %v9506_v23  ;;  %6500 = vmatprep.subr.bf16.mxu0 %v6499_v20  ;;  %v6507_v47 = vpack.c.bf16 %v4346_v28, %v4345_v61  ;;  %v4330_v20 = vld [vmem:[%s10269_s5 + $0x248] sm:$0xff]  ;;  %v4349_v31 = vld [vmem:[%s10269_s5 + $0x2e0] sm:$0xff]  ;;  %v4351_v52 = vld [vmem:[%s10269_s5 + $0x2f0] sm:$0xff] }
 0x5c1   : >> { %4495 = vmatprep.mubr.f32.mxu0 %v4238_v19  ;;  %v6509_v29 = vpack.c.bf16 %v4330_v20, %v4329_v22  ;;  %v4350_v19 = vld [vmem:[%s10269_s5 + $0x2e8] sm:$0xff]  ;;  %v4352_v61 = vld [vmem:[%s10269_s5 + $0x2f8] sm:$0xff]  ;;  %v6917_v22 = vmov 0.0|0.0  }
 0x5c2   : >> { %4496 = vmatmul.mubr.f32.gmra.mrb[34].mxu0 %v4237_v2  ;;  %v4169_v44 = vsel %vm737_vm2, %v6784_v50, %v10324_v5  ;;  %v6513_v2 = vpack.c.bf16 %v4332_v62, %v4331_v26  ;;  %v4334_v21 = vld [vmem:[%s10269_s5 + $0x268] sm:$0xff] }
 0x5c3   : >> { %v4248_v33 = vmax.f32 %v9107_v15, %v4169_v44  ;;  %6502 = vmatpush3.bf16.msra.mxu0 %v6501_v16  ;;  %v4348_v15 = vld [vmem:[%s10269_s5 + $0x2d8] sm:$0xff]  ;;  %v6515_v16 = vpack.c.bf16 %v4350_v19, %v4349_v31  ;;  %v6519_v44 = vpack.c.bf16 %v4352_v61, %v4351_v52  ;;  %v4353_v19 = vld [vmem:[%s10269_s5 + $0x300] sm:$0xff] }
 0x5c4   : >> { %6504 = vmatprep.subr.bf16.mxu0 %v6503_v59  ;;  %v6511_v63 = vpack.c.bf16 %v4348_v15, %v4347_v1  ;;  %v4333_v59 = vld [vmem:[%s10269_s5 + $0x260] sm:$0xff] }
 0x5c5   : >> { %4500 = vmatprep.mubr.f32.mxu0 %v4248_v33  ;;  %v6517_v28 = vpack.c.bf16 %v4334_v21, %v4333_v59  ;;  %v4335_v33 = vld [vmem:[%s10269_s5 + $0x270] sm:$0xff]  ;;  %v4385_v59 = vld [vmem:[%s10269_s5 + $0x400] sm:$0xff]  ;;  %v4386_v21 = vld [vmem:[%s10269_s5 + $0x408] sm:$0xff] }
 0x5c6   : >> { %v6556_v5 = vpack.c.bf16 %v4386_v21, %v4385_v59  ;;  %v4374_v59 = vld [vmem:[%s10269_s5 + $0x3a8] sm:$0xff] }
 0x5c7   : >> { %6506 = vmatpush3.bf16.msra.mxu0 %v6505_v12  ;;  %v4336_v12 = vld [vmem:[%s10269_s5 + $0x278] sm:$0xff] }
 0x5c8   : >> { %6508 = vmatprep.subr.bf16.mxu0 %v6507_v47  ;;  %v6521_v47 = vpack.c.bf16 %v4336_v12, %v4335_v33 }
 0x5cb   : >> { %6510 = vmatpush3.bf16.msra.mxu0 %v6509_v29 }
 0x5cc   : >> { %6512 = vmatprep.subr.bf16.mxu0 %v6511_v63 }
 0x5cf   : >> { %6514 = vmatpush3.bf16.msra.mxu0 %v6513_v2  ;;  %v4354_v2 = vld [vmem:[%s10269_s5 + $0x308] sm:$0xff] }
 0x5d0   : >> { %6516 = vmatprep.subr.bf16.mxu0 %v6515_v16 }
 0x5d3   : >> { %6518 = vmatpush3.bf16.msra.mxu0 %v6517_v28  ;;  %v4371_v28 = vld [vmem:[%s10269_s5 + $0x390] sm:$0xff] }
 0x5d4   : >> { %6520 = vmatprep.subr.bf16.mxu0 %v6519_v44  ;;  %v4372_v44 = vld [vmem:[%s10269_s5 + $0x398] sm:$0xff] }
 0x5d7   : >> { %6522 = vmatpush3.bf16.msra.mxu0 %v6521_v47 }
 0x5d8   : >> { %6555 = vmatprep.subr.bf16.mxu0 %v6917_v22 }
 0x5e2   : >> { %v6778_v20 = vpop.permute.xlu0 %6777 }
 0x5e3   : >> { %v6779_v1 = vunpack.i.l.bf16 %v6778_v20  ;;  %v6780_v62 = vunpack.i.h.bf16 %v6778_v20  ;;  %v6525_v20 = vpack.c.bf16 %v4354_v2, %v4353_v19  ;;  %v6527_v2 = vpack.c.bf16 %v4372_v44, %v4371_v28 }
 0x5e5   : >> { %v4168_v15 = vsel %vm737_vm2, %v6779_v1, %v6784_v50 }
 0x5e6   : >> { %v4247_v29 = vmax.f32 %v9100_v17, %v4168_v15  ;;  %v6793_v63 = vpop.permute.xlu0 %6792 }
 0x5e7   : >> { %v6794_v26 = vunpack.i.l.bf16 %v6793_v63  ;;  %v6795_v52 = vunpack.i.h.bf16 %v6793_v63 }
 0x5e8   : >> { %4501 = vmatmul.mubr.f32.gmra.mrb[36].mxu0 %v4247_v29 }
 0x5e9   : >> { %v4145_v61 = vsel %vm737_vm2, %v6794_v26, %v6780_v62 }
 0x5ea   : >> { %v9581_v16 = vpop.permute.xlu0 %6802 }
 0x5eb   : >> { %v6805_v44 = vunpack.i.h.bf16 %v9581_v16 }
 0x5ee   : >> { %v9631_v21 = vpop.permute.xlu0 %6807 }
 0x5f1   : >> { %v9573_v31 = vpop.permute.xlu1 %6787 }
 0x5f2   : >> { %v6790_v50 = vunpack.i.h.bf16 %v9573_v31  ;;  %v6789_v17 = vunpack.i.l.bf16 %v9573_v31 }
 0x5f4   : >> { %v4143_v33 = vsel %vm737_vm2, %v6760_v34, %v6790_v50  ;;  %v4144_v12 = vsel %vm737_vm2, %v6790_v50, %v6794_v26  ;;  %v4146_v47 = vsel %vm737_vm2, %v6780_v62, %v6789_v17  ;;  %v4356_v34 = vld [vmem:[%s10269_s5 + $0x318] sm:$0xff]  ;;  %v4221_v26 = vmax.f32 %v9264_v8, %v4145_v61  ;;  %v4373_v8 = vld [vmem:[%s10269_s5 + $0x3a0] sm:$0xff] }
 0x5f5   : >> { %v4219_v1 = vmax.f32 %v9115_v32, %v4143_v33  ;;  %v6798_v15 = vpop.permute.xlu1 %6797  ;;  %v4220_v29 = vmax.f32 %v9122_v60, %v4144_v12  ;;  %v4222_v63 = vmax.f32 %v9281_v6, %v4146_v47  ;;  %v4387_v32 = vld [vmem:[%s10269_s5 + $0x410] sm:$0xff]  ;;  %v4388_v60 = vld [vmem:[%s10269_s5 + $0x418] sm:$0xff]  ;;  %v6804_v6 = vunpack.i.l.bf16 %v9581_v16  ;;  %v4357_v47 = vld [vmem:[%s10269_s5 + $0x320] sm:$0xff] }
 0x5f6   : >> { %v6800_v62 = vunpack.i.h.bf16 %v6798_v15  ;;  %v6799_v19 = vunpack.i.l.bf16 %v6798_v15  ;;  %v4152_v50 = vsel %vm737_vm2, %v6770_v39, %v6795_v52  ;;  %v6529_v28 = vpack.c.bf16 %v4356_v34, %v4355_v49  ;;  %v4390_v15 = vld [vmem:[%s10269_s5 + $0x428] sm:$0xff]  ;;  %v4375_v34 = vld [vmem:[%s10269_s5 + $0x3b0] sm:$0xff] }
 0x5f7   : >> { %4570 = vmatprep.mubr.f32.mxu1 %v4220_v29  ;;  %4655 = vmatprep.mubr.f32.mxu0 %v4222_v63  ;;  %v6559_v33 = vpack.c.bf16 %v4388_v60, %v4387_v32  ;;  %v6810_v29 = vunpack.i.h.bf16 %v9631_v21  ;;  %v6809_v63 = vunpack.i.l.bf16 %v9631_v21 }
 0x5f8   : >> { %4571 = vmatmul.mubr.f32.vlgmr.msra.gmra.mrb[44].mxu1 %v4219_v1  ;;  %4656 = vmatmul.mubr.f32.vlgmr.msra.gmra.mrb[38].mxu0 %v4221_v26  ;;  %v4153_v61 = vsel %vm737_vm2, %v6795_v52, %v6799_v19  ;;  %v4162_v12 = vsel %vm737_vm2, %v6800_v62, %v6804_v6  ;;  %v4358_v52 = vld [vmem:[%s10269_s5 + $0x328] sm:$0xff]  ;;  %v4161_v49 = vsel %vm737_vm2, %v6774_v7, %v6800_v62  ;;  %v4376_v26 = vld [vmem:[%s10269_s5 + $0x3b8] sm:$0xff]  ;;  %v4359_v7 = vld [vmem:[%s10269_s5 + $0x330] sm:$0xff] }
 0x5f9   : >> { %6526 = vmatpush3.bf16.msra.mxu1 %v6525_v20  ;;  %6557 = vmatpush1.bf16.msra.mxu0 %v6556_v5  ;;  %v9635_v27 = vpop.permute.xlu1 %6817  ;;  %v4230_v39 = vmax.f32 %v9140_v37, %v4153_v61  ;;  %v4229_v37 = vmax.f32 %v9131_v45, %v4152_v50  ;;  %v6531_v5 = vpack.c.bf16 %v4374_v59, %v4373_v8  ;;  %v4389_v20 = vld [vmem:[%s10269_s5 + $0x420] sm:$0xff]  ;;  %v4360_v62 = vld [vmem:[%s10269_s5 + $0x338] sm:$0xff]  ;;  %v4391_v8 = vld [vmem:[%s10269_s5 + $0x430] sm:$0xff] }
 0x5fa   : >> { %v6820_v1 = vunpack.i.h.bf16 %v9635_v27  ;;  %v6819_v16 = vunpack.i.l.bf16 %v9635_v27  ;;  %6528 = vmatprep.subr.bf16.mxu1 %v6527_v2  ;;  %6558 = vmatprep.subr.bf16.mxu0 %v6917_v22  ;;  %v4154_v45 = vsel %vm737_vm2, %v6799_v19, %v6805_v44  ;;  %v4240_v2 = vmax.f32 %v9176_v55, %v4162_v12  ;;  %v4392_v59 = vld [vmem:[%s10269_s5 + $0x438] sm:$0xff] }
 0x5fb   : >> { %4575 = vmatprep.mubr.f32.mxu1 %v4230_v39  ;;  %v6533_v14 = vpack.c.bf16 %v4358_v52, %v4357_v47  ;;  %v6562_v55 = vpack.c.bf16 %v4390_v15, %v4389_v20  ;;  %v4239_v61 = vmax.f32 %v9150_v9, %v4161_v49  ;;  %v6537_v12 = vpack.c.bf16 %v4360_v62, %v4359_v7  ;;  %v4377_v47 = vld [vmem:[%s10269_s5 + $0x3c0] sm:$0xff]  ;;  %v4378_v9 = vld [vmem:[%s10269_s5 + $0x3c8] sm:$0xff] }
 0x5fc   : >> { %4576 = vmatmul.mubr.f32.gmra.mrb[46].mxu1 %v4229_v37  ;;  %v4155_v32 = vsel %vm737_vm2, %v6805_v44, %v6819_v16  ;;  %v4171_v50 = vsel %vm737_vm2, %v6820_v1, %v6809_v63  ;;  %v10375_v44 = vunpack.i.h.bf16 %v9506_v23 }
 0x5fd   : >> { %6530 = vmatpush3.bf16.msra.mxu1 %v6529_v28  ;;  %6560 = vmatpush1.bf16.msra.mxu0 %v6559_v33  ;;  %v9677_v19 = vpop.permute.xlu1 %6822  ;;  %v4232_v60 = vmax.f32 %v9308_v40, %v4155_v32  ;;  %v4231_v28 = vmax.f32 %v9303_v38, %v4154_v45  ;;  %v6535_v40 = vpack.c.bf16 %v4376_v26, %v4375_v34  ;;  %v4362_v26 = vld [vmem:[%s10269_s5 + $0x348] sm:$0xff]  ;;  %v4379_v32 = vld [vmem:[%s10269_s5 + $0x3d0] sm:$0xff] }
 0x5fe   : >> { %v6824_v21 = vunpack.i.l.bf16 %v9677_v19  ;;  %4580 = vmatprep.mubr.f32.mxu1 %v4240_v2  ;;  %6532 = vmatprep.subr.bf16.mxu1 %v6531_v5  ;;  %v4170_v39 = vsel %vm737_vm2, %v10375_v44, %v6820_v1  ;;  %v4163_v33 = vsel %vm737_vm2, %v6804_v6, %v6810_v29  ;;  %v4250_v52 = vmax.f32 %v9213_v46, %v4171_v50  ;;  %v4361_v46 = vld [vmem:[%s10269_s5 + $0x340] sm:$0xff]  ;;  %v4394_v2 = vld [vmem:[%s10269_s5 + $0x448] sm:$0xff] }
 0x5ff   : >> { %4660 = vmatprep.mubr.f32.mxu0 %v4232_v60  ;;  %6561 = vmatprep.subr.bf16.mxu0 %v6917_v22  ;;  %v6565_v6 = vpack.c.bf16 %v4392_v59, %v4391_v8  ;;  %v6825_v5 = vunpack.i.h.bf16 %v9677_v19  ;;  %v4241_v45 = vmax.f32 %v9325_v30, %v4163_v33  ;;  %v6539_v34 = vpack.c.bf16 %v4378_v9, %v4377_v47  ;;  %v4363_v8 = vld [vmem:[%s10269_s5 + $0x350] sm:$0xff]  ;;  %v4366_v9 = vld [vmem:[%s10269_s5 + $0x368] sm:$0xff] }
 0x600   : >> { %v9701_v38 = vpop.permute.xlu0 %6812  ;;  %4581 = vmatmul.mubr.f32.gmra.mrb[48].mxu1 %v4239_v61  ;;  %4661 = vmatmul.mubr.f32.gmra.mrb[40].mxu0 %v4231_v28  ;;  %v4164_v23 = vsel %vm737_vm2, %v6810_v29, %v6824_v21  ;;  %v4249_v29 = vmax.f32 %v9191_v56, %v4170_v39  ;;  %v4364_v28 = vld [vmem:[%s10269_s5 + $0x358] sm:$0xff] }
 0x601   : >> { %v6815_v1 = vunpack.i.h.bf16 %v9701_v38  ;;  %v6814_v37 = vunpack.i.l.bf16 %v9701_v38  ;;  %6534 = vmatpush3.bf16.msra.mxu1 %v6533_v14  ;;  %6563 = vmatpush1.bf16.msra.mxu0 %v6562_v55  ;;  %v9710_v20 = vpop.permute.xlu1 %6827  ;;  %v4242_v15 = vmax.f32 %v9333_v4, %v4164_v23  ;;  %v4393_v4 = vld [vmem:[%s10269_s5 + $0x440] sm:$0xff]  ;;  %v4380_v14 = vld [vmem:[%s10269_s5 + $0x3d8] sm:$0xff]  ;;  %v6541_v55 = vpack.c.bf16 %v4362_v26, %v4361_v46  ;;  %v4398_v23 = vld [vmem:[%s10269_s5 + $0x468] sm:$0xff] }
 0x602   : >> { %v6829_v49 = vunpack.i.l.bf16 %v9710_v20  ;;  %4585 = vmatprep.mubr.f32.mxu1 %v4250_v52  ;;  %6536 = vmatprep.subr.bf16.mxu1 %v6535_v40  ;;  %v6568_v50 = vpack.c.bf16 %v4394_v2, %v4393_v4  ;;  %v6543_v61 = vpack.c.bf16 %v4380_v14, %v4379_v32  ;;  %v4396_v40 = vld [vmem:[%s10269_s5 + $0x458] sm:$0xff]  ;;  %v6545_v39 = vpack.c.bf16 %v4364_v28, %v4363_v8  ;;  %v4397_v52 = vld [vmem:[%s10269_s5 + $0x460] sm:$0xff]  ;;  %v4399_v26 = vld [vmem:[%s10269_s5 + $0x470] sm:$0xff] }
 0x603   : >> { %4665 = vmatprep.mubr.f32.mxu0 %v4242_v15  ;;  %6564 = vmatprep.subr.bf16.mxu0 %v6917_v22  ;;  %v4148_v56 = vsel %vm737_vm2, %v6825_v5, %v6814_v37  ;;  %v4172_v30 = vsel %vm737_vm2, %v6809_v63, %v6815_v1  ;;  %v6574_v46 = vpack.c.bf16 %v4398_v23, %v4397_v52  ;;  %v4400_v4 = vld [vmem:[%s10269_s5 + $0x478] sm:$0xff]  ;;  %v6830_v14 = vunpack.i.h.bf16 %v9710_v20 }
 0x604   : >> { %4586 = vmatmul.mubr.f32.gmra.mrb[50].mxu1 %v4249_v29  ;;  %4666 = vmatmul.mubr.f32.gmra.mrb[42].mxu0 %v4241_v45  ;;  %v4224_v7 = vmax.f32 %v9365_v13, %v4148_v56  ;;  %v4173_v62 = vsel %vm737_vm2, %v6815_v1, %v6829_v49  ;;  %v4251_v13 = vmax.f32 %v9350_v57, %v4172_v30  ;;  %v4381_v57 = vld [vmem:[%s10269_s5 + $0x3e0] sm:$0xff]  ;;  %v9770_v44 = vpop.permute.xlu0 %6832  ;;  %v4384_v1 = vld [vmem:[%s10269_s5 + $0x3f8] sm:$0xff]  ;;  %v4367_v29 = vld [vmem:[%s10269_s5 + $0x370] sm:$0xff] }
 0x605   : >> { %6538 = vmatpush3.bf16.msra.mxu1 %v6537_v12  ;;  %6566 = vmatpush1.bf16.msra.mxu0 %v6565_v6  ;;  %v9745_v60 = vpop.permute.xlu1 %4079  ;;  %v4252_v63 = vmax.f32 %v9352_v48, %v4173_v62  ;;  %v4395_v48 = vld [vmem:[%s10269_s5 + $0x450] sm:$0xff]  ;;  %v4365_v12 = vld [vmem:[%s10269_s5 + $0x360] sm:$0xff]  ;;  %v6834_v56 = vunpack.i.l.bf16 %v9770_v44  ;;  %v6577_v32 = vpack.c.bf16 %v4400_v4, %v4399_v26  ;;  %v4402_v62 = vld [vmem:[%s10269_s5 + $0x488] sm:$0xff]  ;;  %v4156_v31 = vsel %vm737_vm2, %v6819_v16, %v6830_v14 }
 0x606   : >> { %v4226_v59 = vmax.f32 %v9402_v42, %v9745_v60  ;;  %4740 = vmatprep.mubr.f32.mxu1 %v4224_v7  ;;  %6540 = vmatprep.subr.bf16.mxu1 %v6539_v34  ;;  %v4382_v42 = vld [vmem:[%s10269_s5 + $0x3e8] sm:$0xff]  ;;  %v6571_v33 = vpack.c.bf16 %v4396_v40, %v4395_v48  ;;  %v4383_v6 = vld [vmem:[%s10269_s5 + $0x3f0] sm:$0xff]  ;;  %v6549_v15 = vpack.c.bf16 %v4366_v9, %v4365_v12  ;;  %v4368_v34 = vld [vmem:[%s10269_s5 + $0x378] sm:$0xff] }
 0x607   : >> { %4670 = vmatprep.mubr.f32.mxu0 %v4252_v63  ;;  %6567 = vmatprep.subr.bf16.mxu0 %v6917_v22  ;;  %v6547_v47 = vpack.c.bf16 %v4382_v42, %v4381_v57  ;;  %v6551_v45 = vpack.c.bf16 %v4384_v1, %v4383_v6  ;;  %v6553_v30 = vpack.c.bf16 %v4368_v34, %v4367_v29  ;;  %v4401_v7 = vld [vmem:[%s10269_s5 + $0x480] sm:$0xff] }
 0x608   : >> { %4671 = vmatmul.mubr.f32.gmra.mrb[44].mxu0 %v4251_v13  ;;  %v4118_v2 = vpop.permute.xlu0 %4117  ;;  %v4147_v63 = vsel %vm737_vm2, %v6789_v17, %v6825_v5  ;;  %v6580_v8 = vpack.c.bf16 %v4402_v62, %v4401_v7  ;;  %v4149_v40 = vsel %vm737_vm2, %v6814_v37, %v9745_v60 }
 0x609   : >> { %6542 = vmatpush3.bf16.msra.mxu1 %v6541_v55  ;;  %6569 = vmatpush1.bf16.msra.mxu0 %v6568_v50  ;;  %v4157_v55 = vsel %vm737_vm2, %v6830_v14, %v6834_v56  ;;  %v4223_v13 = vmax.f32 %v9360_v43, %v4147_v63  ;;  %v4100_v48 = vpop.permute.xlu1 %4099  ;;  %v4233_v43 = vmax.f32 %v9369_v51, %v4156_v31 }
 0x60a   : >> { %5712 = vmatprep.mubr.msk.f32.mxu0 %vm4404_vm0, %v4226_v59  ;;  %6544 = vmatprep.subr.bf16.mxu1 %v6543_v61  ;;  %v6835_v59 = vunpack.i.h.bf16 %v9770_v44  ;;  %v4234_v61 = vmax.f32 %v9375_v36, %v4157_v55  ;;  %v4403_v36 = vld [vmem:[%s10269_s5 + $0x490] sm:$0x7]  ;;  %v4225_v16 = vmax.f32 %v9397_v41, %v4149_v40  ;;  %v4158_v51 = vsel %vm737_vm2, %v6834_v56, %v4100_v48  ;;  %v4850_v44 = vld [vmem:[%s10270_s6 + $0x20] sm:$0xff] }
 0x60b   : >> { %6570 = vmatprep.subr.bf16.mxu0 %v6917_v22  ;;  %v4236_v37 = vmax.f32 %v9414_v24, %v4100_v48  ;;  %v4235_v19 = vmax.f32 %v9408_v11, %v4158_v51 }
 0x60c   : >> { %v6838_v50 = vpop.permute.xlu0 %6837  ;;  %v4166_v17 = vsel %vm737_vm2, %v6835_v59, %v4118_v2  ;;  %v4165_v27 = vsel %vm737_vm2, %v6824_v21, %v6835_v59 }
 0x60d   : >> { %6546 = vmatpush3.bf16.msra.mxu1 %v6545_v39  ;;  %6572 = vmatpush1.bf16.msra.mxu0 %v6571_v33  ;;  %v6840_v5 = vunpack.i.h.bf16 %v6838_v50  ;;  %v6839_v28 = vunpack.i.l.bf16 %v6838_v50  ;;  %v4120_v60 = vpop.permute.xlu1 %4119  ;;  %v4243_v57 = vmax.f32 %v9379_v10, %v4165_v27  ;;  %v4853_v33 = vld [vmem:[%s10270_s6 + $0x38] sm:$0xff] }
 0x60e   : >> { %6548 = vmatprep.subr.bf16.mxu1 %v6547_v47  ;;  %6573 = vmatprep.subr.bf16.mxu0 %v6917_v22  ;;  %v4167_v21 = vsel %vm737_vm2, %v4118_v2, %v4120_v60  ;;  %v4246_v24 = vmax.f32 %v9423_v3, %v4120_v60  ;;  %v4846_v3 = vld [vmem:[%s10270_s6] sm:$0xff] }
 0x60f   : >> { %v4175_v38 = vsel %vm737_vm2, %v6839_v28, %v6840_v5  ;;  %v4174_v41 = vsel %vm737_vm2, %v6829_v49, %v6839_v28  ;;  %v6584_v39 = vpack.c.bf16 %v4850_v44, %v4846_v3 }
 0x610   : >> { %v4140_v42 = vpop.permute.xlu0 %4139  ;;  %v4253_v10 = vmax.f32 %v9388_v25, %v4174_v41  ;;  %v4847_v25 = vld [vmem:[%s10270_s6 + $0x8] sm:$0xff] }
 0x611   : >> { %6550 = vmatpush3.bf16.msra.mxu1 %v6549_v15  ;;  %6575 = vmatpush1.bf16.msra.mxu0 %v6574_v46  ;;  %v4176_v20 = vsel %vm737_vm2, %v6840_v5, %v4140_v42  ;;  %v4256_v49 = vmax.f32 %v9435_v53, %v4140_v42  ;;  %v4852_v42 = vld [vmem:[%s10270_s6 + $0x30] sm:$0xff]  ;;  %vm4854_vm2 = vcmask 130048  }
 0x612   : >> { %6552 = vmatprep.subr.bf16.mxu1 %v6551_v45  ;;  %6576 = vmatprep.subr.bf16.mxu0 %v6917_v22  ;;  %v4255_v11 = vmax.f32 %v9427_v54, %v4176_v20  ;;  %v4849_v54 = vld [vmem:[%s10270_s6 + $0x18] sm:$0xff] }
 0x613   : >> { %v6586_v12 = vpack.c.bf16 %v4853_v33, %v4849_v54 }
 0x615   : >> { %6554 = vmatpush3.bf16.msra.mxu1 %v6553_v30  ;;  %6578 = vmatpush1.bf16.msra.mxu0 %v6577_v32 }
 0x616   : >> { %6579 = vmatprep.subr.bf16.mxu0 %v6917_v22  ;;  %v4244_v22 = vmax.f32 %v9384_v18, %v4166_v17  ;;  %v4254_v18 = vmax.f32 %v9395_v35, %v4175_v38  ;;  %v4245_v35 = vmax.f32 %v9418_v0, %v4167_v21  ;;  %v4851_v0 = vld [vmem:[%s10270_s6 + $0x28] sm:$0xff] }
 0x617   : >> { %v6582_v53 = vpack.c.bf16 %v4851_v0, %v4847_v25 }
 0x618   : >> { %4741 = vmatmul.mubr.f32.vlgmr.msra.gmra.mrb[52].mxu1 %v4223_v13 }
 0x619   : >> { %4745 = vmatprep.mubr.f32.mxu1 %v4234_v61  ;;  %6581 = vmatpush1.bf16.msra.mxu0 %v6580_v8 }
 0x61a   : >> { %4797 = vmatprep.subr.mxu0 %v10374_v58  ;;  %6583 = vmatprep.subr.bf16.mxu1 %v6582_v53 }
 0x61b   : >> { %6585 = vmatpush1.bf16.msra.mxu1 %v6584_v39 }
 0x61c   : >> { %4746 = vmatmul.mubr.f32.gmra.mrb[54].mxu1 %v4233_v43  ;;  %6587 = vmatprep.subr.bf16.mxu1 %v6586_v12 }
 0x61d   : >> { %4750 = vmatprep.mubr.f32.mxu1 %v4244_v22  ;;  %5711 = vmatpush1.msk.msra.mxu0 %vm4417_vm1, %v4403_v36 }
 0x61e   : >> { %4826 = vmatmul.mubr.f32.vlgmr.msra.gmra.mrb[46].mxu0 %v4225_v16 }
 0x61f   : >> { %5713 = vmatprep.mubr.msk.f32.mxu0 %vm4404_vm0, %v4236_v37 }
 0x620   : >> { %4751 = vmatmul.mubr.f32.gmra.mrb[56].mxu1 %v4243_v57 }
 0x621   : >> { %4755 = vmatprep.mubr.f32.mxu1 %v4254_v18 }
 0x622   : >> { %4831 = vmatmul.mubr.f32.gmra.mrb[48].mxu0 %v4235_v19 }
 0x623   : >> { %5714 = vmatprep.mubr.msk.f32.mxu0 %vm4404_vm0, %v4246_v24  ;;  %v4848_v24 = vld [vmem:[%s10270_s6 + $0x10] sm:$0xff] }
 0x624   : >> { %4756 = vmatmul.mubr.f32.gmra.mrb[58].mxu1 %v4253_v10  ;;  %v6588_v25 = vpack.c.bf16 %v4852_v42, %v4848_v24  ;;  %v5048_v42 = vld [vmem:[%s10271_s7 + $0x18] sm:$0xff] }
 0x625   : >> { %4931 = vmatprep.mubr.f32.mxu1 %v10374_v58 }
 0x626   : >> { %4836 = vmatmul.mubr.f32.gmra.mrb[50].mxu0 %v4245_v35 }
 0x627   : >> { %5715 = vmatprep.mubr.msk.f32.mxu0 %vm4404_vm0, %v4256_v49 }
 0x62a   : >> { %4841 = vmatmul.mubr.f32.gmra.mrb[52].mxu0 %v4255_v11 }
 0x68d   : >> { %v5783_v47 = vpop.f32.mrb[30].mxu0 }
 0x68e   : >> { %v5784_v9 = vpop.f32.mrb[31].mxu0 }
 0x68f   : >> { %v5785_v52 = vadd.f32 %v5784_v9, %v5783_v47 }
 0x691   : >> { %v5786_v23 = vpop.f32.mrb[32].mxu0 }
 0x692   : >> { %v5787_v6 = vpop.f32.mrb[33].mxu0 }
 0x693   : >> { %v5788_v1 = vadd.f32 %v5787_v6, %v5786_v23 }
 0x695   : >> { %v5789_v15 = vpop.f32.mrb[34].mxu0 }
 0x696   : >> { %v5790_v46 = vpop.f32.mrb[35].mxu0 }
 0x697   : >> { %v5791_v29 = vadd.f32 %v5790_v46, %v5789_v15 }
 0x6bb   : >> { %v5792_v45 = vpop.f32.mrb[36].mxu0 }
 0x6bc   : >> { %v5793_v34 = vpop.f32.mrb[37].mxu0 }
 0x6bd   : >> { %v5794_v26 = vadd.f32 %v5793_v34, %v5792_v45 }
 0x6cb   : >> { %v5827_v4 = vpop.f32.mrb[44].mxu1  ;;  %v5871_v2 = vpop.f32.mrb[38].mxu0 }
 0x6cc   : >> { %v5828_v56 = vpop.f32.mrb[45].mxu1  ;;  %v5872_v30 = vpop.f32.mrb[39].mxu0 }
 0x6cd   : >> { %v5829_v32 = vadd.f32 %v5828_v56, %v5827_v4  ;;  %v5873_v14 = vadd.f32 %v5872_v30, %v5871_v2  ;;  %v5045_v56 = vld [vmem:[%s10271_s7] sm:$0xff] }
 0x6ce   : >> { %v5049_v30 = vld [vmem:[%s10271_s7 + $0x20] sm:$0xff] }
 0x6cf   : >> { %v4573_v7 = vadd.f32 %v5829_v32, %v5785_v52  ;;  %v5830_v62 = vpop.f32.mrb[46].mxu1  ;;  %v5046_v32 = vld [vmem:[%s10271_s7 + $0x8] sm:$0xff] }
 0x6d0   : >> { %v5831_v63 = vpop.f32.mrb[47].mxu1 }
 0x6d1   : >> { %v4658_v55 = vadd.f32 %v5873_v14, %v4573_v7  ;;  %v5832_v50 = vadd.f32 %v5831_v63, %v5830_v62 }
 0x6d3   : >> { %v4578_v8 = vadd.f32 %v5832_v50, %v5788_v1  ;;  %v5833_v59 = vpop.f32.mrb[48].mxu1  ;;  %v5874_v13 = vpop.f32.mrb[40].mxu0 }
 0x6d4   : >> { %v5834_v61 = vpop.f32.mrb[49].mxu1  ;;  %v5875_v31 = vpop.f32.mrb[41].mxu0 }
 0x6d5   : >> { %v5835_v17 = vadd.f32 %v5834_v61, %v5833_v59  ;;  %v5876_v5 = vadd.f32 %v5875_v31, %v5874_v13  ;;  %v5054_v13 = vld [vmem:[%s10271_s7 + $0x48] sm:$0xff] }
 0x6d7   : >> { %v4583_v28 = vadd.f32 %v5835_v17, %v5791_v29  ;;  %v4663_v48 = vadd.f32 %v5876_v5, %v4578_v8  ;;  %v5836_v40 = vpop.f32.mrb[50].mxu1  ;;  %v5877_v43 = vpop.f32.mrb[42].mxu0  ;;  %v5053_v8 = vld [vmem:[%s10271_s7 + $0x40] sm:$0xff] }
 0x6d8   : >> { %v5837_v36 = vpop.f32.mrb[51].mxu1  ;;  %v5878_v22 = vpop.f32.mrb[43].mxu0 }
 0x6d9   : >> { %v5838_v27 = vadd.f32 %v5837_v36, %v5836_v40  ;;  %v5879_v16 = vadd.f32 %v5878_v22, %v5877_v43  ;;  %v5058_v43 = vld [vmem:[%s10271_s7 + $0x68] sm:$0xff] }
 0x6db   : >> { %v4588_v38 = vadd.f32 %v5838_v27, %v5794_v26  ;;  %v4668_v51 = vadd.f32 %v5879_v16, %v4583_v28  ;;  %v5880_v37 = vpop.f32.mrb[44].mxu0 }
 0x6dc   : >> { %v5881_v60 = vpop.f32.mrb[45].mxu0 }
 0x6dd   : >> { %v5882_v57 = vadd.f32 %v5881_v60, %v5880_v37 }
 0x6df   : >> { %v4673_v18 = vadd.f32 %v5882_v57, %v4588_v38 }
 0x6eb   : >> { %v5915_v41 = vpop.f32.mrb[52].mxu1 }
 0x6ec   : >> { %v5916_v19 = vpop.f32.mrb[53].mxu1 }
 0x6ed   : >> { %v5917_v21 = vadd.f32 %v5916_v19, %v5915_v41  ;;  %v5047_v19 = vld [vmem:[%s10271_s7 + $0x10] sm:$0xff] }
 0x6ef   : >> { %v5918_v10 = vpop.f32.mrb[54].mxu1  ;;  %v4743_v35 = vadd.f32 %v5917_v21, %v4658_v55  ;;  %v5051_v21 = vld [vmem:[%s10271_s7 + $0x30] sm:$0xff] }
 0x6f0   : >> { %v5919_v20 = vpop.f32.mrb[55].mxu1 }
 0x6f1   : >> { %v5920_v49 = vadd.f32 %v5919_v20, %v5918_v10  ;;  %v4827_v11 = vpop.f32.mrb[46].mxu0  ;;  %v5052_v10 = vld [vmem:[%s10271_s7 + $0x38] sm:$0xff] }
 0x6f2   : >> { %v4828_v0 = vadd.f32 %v4827_v11, %v4743_v35  ;;  %v4829_v3 = vpop.f32.mrb[47].mxu0 }
 0x6f3   : >> { %v5921_v53 = vpop.f32.mrb[56].mxu1  ;;  %v4748_v44 = vadd.f32 %v5920_v49, %v4663_v48  ;;  %v5057_v48 = vld [vmem:[%s10271_s7 + $0x60] sm:$0xff] }
 0x6f4   : >> { %v5922_v39 = vpop.f32.mrb[57].mxu1  ;;  %5716 = vmatmul.mubr.msk.f32.vlgmr.msra.gmra.mrb[60].mxu1 %vm4854_vm2, %v4828_v0 }
 0x6f5   : >> { %v5923_v54 = vadd.f32 %v5922_v39, %v5921_v53  ;;  %v4832_v33 = vpop.f32.mrb[48].mxu0  ;;  %6589 = vmatpush1.bf16.msra.mxu1 %v6588_v25  ;;  %4937 = vmatprep.mubr.f32.mxu1 %v10374_v58  ;;  %v5055_v39 = vld [vmem:[%s10271_s7 + $0x50] sm:$0xff] }
 0x6f6   : >> { %v4833_v12 = vadd.f32 %v4832_v33, %v4748_v44  ;;  %v4834_v47 = vpop.f32.mrb[49].mxu0  ;;  %v5113_v33 = vstv %s6898_s18  ;;  %s532_s18 = sadd.s32 1, %s6898_s18  }
 0x6f7   : >> { %v5924_v9 = vpop.f32.mrb[58].mxu1  ;;  %v4753_v52 = vadd.f32 %v5923_v54, %v4668_v51  ;;  %v5056_v47 = vld [vmem:[%s10271_s7 + $0x58] sm:$0xff]  ;;  %p529_p5 = scmp.ge.s32.totalorder %s532_s18, 8  }
 0x6f8   : >> { %v5925_v23 = vpop.f32.mrb[59].mxu1  ;;  %5717 = vmatmul.mubr.msk.f32.gmra.mrb[62].mxu1 %vm4854_vm2, %v4833_v12  ;;  %vm6919_vm5 = vmmov (%p529_p5), 0   ;;  %vm5519_vm6 = vcmask (%p529_p5), 64512   ;;  %s10389_s18 = sld [smem:[#allocation23_spill]] (%p529_p5)  ;;  %vm5593_vm7 = vcmask (%p529_p5), 15360   ;;  %s10390_s29 = sld [smem:[#allocation6_spill]] (%p529_p5) }
 0x6f9   : >> { %v5926_v6 = vadd.f32 %v5925_v23, %v5924_v9  ;;  %v4837_v1 = vpop.f32.mrb[50].mxu0  ;;  %4943 = vmatprep.mubr.f32.mxu1 %v10374_v58 }
 0x6fa   : >> { %v4838_v15 = vadd.f32 %v4837_v1, %v4753_v52  ;;  %v4839_v46 = vpop.f32.mrb[51].mxu0 }
 0x6fb   : >> { %v4758_v29 = vadd.f32 %v5926_v6, %v4673_v18  ;;  %v10376_v46 = vld [vmem:[#allocation5_spill] sm:$0xff] }
 0x6fc   : >> { %5718 = vmatmul.mubr.msk.f32.gmra.mrb[64].mxu1 %vm4854_vm2, %v4838_v15  ;;  %vm9945_vm4 = vcmp.eq.s32.totalorder %v10376_v46, %v5113_v33  ;;  %v5170_v33 = vld [vmem:[%s10272_s8 + $0x198] sm:$0xff] (%p529_p5)  ;;  %v5124_v46 = vld [vmem:[%s10272_s8 + $0x28] sm:$0xff] (%p529_p5) }
 0x6fd   : >> { %v4842_v45 = vpop.f32.mrb[52].mxu0  ;;  %4949 = vmatprep.mubr.f32.mxu1 %v10374_v58 }
 0x6fe   : >> { %v4843_v34 = vadd.f32 %v4842_v45, %v4758_v29  ;;  %v4844_v26 = vpop.f32.mrb[53].mxu0  ;;  %v5171_v29 = vld [vmem:[%s10272_s8 + $0x1a0] sm:$0xff] (%p529_p5) }
 0x6ff   : >> { %v5059_v26 = vld [vmem:[%s10271_s7 + $0x70] sm:$0xff] }
 0x700   : >> { %5719 = vmatmul.mubr.msk.f32.gmra.mrb[66].mxu1 %vm4854_vm2, %v4843_v34 }
 0x701   : >> { %5020 = vmatprep.mubr.f32.mxu1 %v10374_v58 }
 0x704   : >> { %5720 = vmatmul.mubr.msk.f32.vlgmr.msra.gmra.mrb[68].mxu1 %vm4854_vm2, %v4828_v0 }
 0x705   : >> { %5026 = vmatprep.mubr.f32.mxu1 %v10374_v58 }
 0x708   : >> { %5721 = vmatmul.mubr.msk.f32.gmra.mrb[70].mxu1 %vm4854_vm2, %v4833_v12 }
 0x709   : >> { %5032 = vmatprep.mubr.f32.mxu1 %v10374_v58 }
 0x70c   : >> { %5722 = vmatmul.mubr.msk.f32.gmra.mrb[72].mxu1 %vm4854_vm2, %v4838_v15 }
 0x70d   : >> { %5038 = vmatprep.mubr.f32.mxu1 %v10374_v58  ;;  %v5050_v58 = vld [vmem:[%s10271_s7 + $0x28] sm:$0xff] }
 0x710   : >> { %5723 = vmatmul.mubr.msk.f32.gmra.mrb[74].mxu1 %vm4854_vm2, %v4843_v34 }
 0x7c7   : >> { %v4933_v4 = vpop.f32.mrb[60].mxu1 }
 0x7c8   : >> { %v4935_v2 = vpop.f32.mrb[61].mxu1  ;;  %v5061_v7 = vmul.f32 %v5045_v56, %v4933_v4  ;;  %v5060_v56 = vld [vmem:[%s10271_s7 + $0x78] sm:$0xff] }
 0x7c9   : >> { %v5062_v55 = vmul.f32 %v5046_v32, %v4935_v2 }
 0x7cb   : >> { %v4939_v14 = vpop.f32.mrb[62].mxu1 }
 0x7cc   : >> { %v5065_v62 = vmul.f32 %v5049_v30, %v4939_v14  ;;  %v4941_v63 = vpop.f32.mrb[63].mxu1  ;;  %v10379_v14 = vld [vmem:[#allocation11_spill] sm:$0xff] }
 0x7cd   : >> { %v5066_v50 = vmul.f32 %v5050_v58, %v4941_v63 }
 0x7ce   : >> { %v5077_v59 = vadd.f32 %v5065_v62, %v5061_v7 }
 0x7cf   : >> { %v5086_v61 = vadd.f32 %v5066_v50, %v5062_v55  ;;  %v4945_v31 = vpop.f32.mrb[64].mxu1  ;;  %v10381_v55 = vld [vmem:[#allocation10_spill] sm:$0xff] }
 0x7d0   : >> { %v5069_v17 = vmul.f32 %v5053_v8, %v4945_v31  ;;  %v4947_v5 = vpop.f32.mrb[65].mxu1 }
 0x7d1   : >> { %v5070_v28 = vmul.f32 %v5054_v13, %v4947_v5 }
 0x7d2   : >> { %v5078_v40 = vadd.f32 %v5077_v59, %v5069_v17 }
 0x7d3   : >> { %v5087_v36 = vadd.f32 %v5086_v61, %v5070_v28  ;;  %v4951_v22 = vpop.f32.mrb[66].mxu1 }
 0x7d4   : >> { %v5073_v27 = vmul.f32 %v5057_v48, %v4951_v22  ;;  %v4953_v16 = vpop.f32.mrb[67].mxu1 }
 0x7d5   : >> { %v5074_v38 = vmul.f32 %v5058_v43, %v4953_v16 }
 0x7d6   : >> { %v5079_v51 = vadd.f32 %v5078_v40, %v5073_v27 }
 0x7d7   : >> { %v5088_v37 = vadd.f32 %v5087_v36, %v5074_v38  ;;  %v5022_v60 = vpop.f32.mrb[68].mxu1  ;;  %v10382_v38 = vld [vmem:[#allocation9_spill] sm:$0xff] }
 0x7d8   : >> { %v5080_v57 = vrot.slane %v5079_v51, 4  ;;  %v5024_v18 = vpop.f32.mrb[69].mxu1  ;;  %v5063_v11 = vmul.f32 %v5047_v19, %v5022_v60 }
 0x7d9   : >> { %v5089_v41 = vrot.slane %v5088_v37, 4  ;;  %v5064_v53 = vmul.f32 %v5048_v42, %v5024_v18  ;;  %v5136_v18 = vld [vmem:[%s10272_s8 + $0x88] sm:$0xff] (%p529_p5) }
 0x7da   : >> { %v5081_v24 = vadd.f32 %v5080_v57, %v5079_v51  ;;  %v5135_v57 = vld [vmem:[%s10272_s8 + $0x80] sm:$0xff] (%p529_p5)  ;;  %v5168_v42 = vld [vmem:[%s10272_s8 + $0x188] sm:$0xff] (%p529_p5) }
 0x7db   : >> { %v5090_v35 = vadd.f32 %v5089_v41, %v5088_v37  ;;  %v5028_v20 = vpop.f32.mrb[70].mxu1  ;;  %v10384_v37 = vld [vmem:[#allocation8_spill] sm:$0xff]  ;;  %v5119_v41 = vld [vmem:[%s10272_s8] sm:$0xff] (%p529_p5)  ;;  %v6590_v19 = vpack.c.bf16 (%p529_p5), %v5136_v18, %v5135_v57 }
 0x7dc   : >> { %v5082_v49 = vrot.slane %v5081_v24, 2  ;;  %v5067_v25 = vmul.f32 %v5051_v21, %v5028_v20  ;;  %v5030_v0 = vpop.f32.mrb[71].mxu1  ;;  %v5120_v21 = vld [vmem:[%s10272_s8 + $0x8] sm:$0xff] (%p529_p5)  ;;  %v5151_v20 = vld [vmem:[%s10272_s8 + $0x100] sm:$0xff] (%p529_p5) }
 0x7dd   : >> { %v5091_v3 = vrot.slane %v5090_v35, 2  ;;  %v5068_v44 = vmul.f32 %v5052_v10, %v5030_v0  ;;  %v6592_v10 = vpack.c.bf16 (%p529_p5), %v5120_v21, %v5119_v41  ;;  %6591 = vmatprep.subr.bf16.mxu0 (%p529_p5), %v6590_v19  ;;  %v5138_v0 = vld [vmem:[%s10272_s8 + $0x98] sm:$0xff] (%p529_p5)  ;;  %v5129_v19 = vld [vmem:[%s10272_s8 + $0x50] sm:$0xff] (%p529_p5) }
 0x7de   : >> { %v5083_v54 = vadd.f32 %v5082_v49, %v5081_v24  ;;  %v5095_v12 = vadd.f32 %v5067_v25, %v5063_v11  ;;  %v5167_v24 = vld [vmem:[%s10272_s8 + $0x180] sm:$0xff] (%p529_p5)  ;;  %v5152_v49 = vld [vmem:[%s10272_s8 + $0x108] sm:$0xff] (%p529_p5)  ;;  %v5137_v11 = vld [vmem:[%s10272_s8 + $0x90] sm:$0xff] (%p529_p5) }
 0x7df   : >> { %v5092_v9 = vadd.f32 %v5091_v3, %v5090_v35  ;;  %v5104_v52 = vadd.f32 %v5068_v44, %v5064_v53  ;;  %v5034_v23 = vpop.f32.mrb[72].mxu1  ;;  %v6622_v35 = vpack.c.bf16 (%p529_p5), %v5168_v42, %v5167_v24  ;;  %v6624_v25 = vpack.c.bf16 (%p529_p5), %v5152_v49, %v5151_v20  ;;  %v5122_v53 = vld [vmem:[%s10272_s8 + $0x18] sm:$0xff] (%p529_p5)  ;;  %6593 = vmatpush3.bf16.msra.mxu0 (%p529_p5), %v6592_v10  ;;  %v5161_v24 = vld [vmem:[%s10272_s8 + $0x150] sm:$0xff] (%p529_p5)  ;;  %v5148_v20 = vld [vmem:[%s10272_s8 + $0xe8] sm:$0xff] (%p529_p5) }
 0x7e0   : >> { %v5084_v6 = vrot.slane %v5083_v54, 1  ;;  %v5071_v1 = vmul.f32 %v5055_v39, %v5034_v23  ;;  %v5036_v15 = vpop.f32.mrb[73].mxu1  ;;  %v6594_v44 = vpack.c.bf16 (%p529_p5), %v5138_v0, %v5137_v11  ;;  %v5140_v23 = vld [vmem:[%s10272_s8 + $0xa8] sm:$0xff] (%p529_p5)  ;;  %v5130_v21 = vld [vmem:[%s10272_s8 + $0x58] sm:$0xff] (%p529_p5)  ;;  %v5179_v49 = vld [vmem:[%s10272_s8 + $0x1e0] sm:$0xff] (%p529_p5) }
 0x7e1   : >> { %v5093_v45 = vrot.slane %v5092_v9, 1  ;;  %v5072_v34 = vmul.f32 %v5056_v47, %v5036_v15  ;;  %6623 = vmatprep.subr.bf16.mxu1 (%p529_p5), %v6622_v35  ;;  %v5123_v15 = vld [vmem:[%s10272_s8 + $0x20] sm:$0xff] (%p529_p5)  ;;  %v5162_v10 = vld [vmem:[%s10272_s8 + $0x158] sm:$0xff] (%p529_p5)  ;;  %v5180_v11 = vld [vmem:[%s10272_s8 + $0x1e8] sm:$0xff] (%p529_p5) }
 0x7e2   : >> { %v5085_v4 = vadd.f32 %v5084_v6, %v5083_v54  ;;  %v5096_v2 = vadd.f32 %v5095_v12, %v5071_v1  ;;  %v5169_v54 = vld [vmem:[%s10272_s8 + $0x190] sm:$0xff] (%p529_p5)  ;;  %6625 = vmatpush3.bf16.msra.mxu1 (%p529_p5), %v6624_v25  ;;  %6595 = vmatprep.subr.bf16.mxu0 (%p529_p5), %v6594_v44  ;;  %v5147_v35 = vld [vmem:[%s10272_s8 + $0xe0] sm:$0xff] (%p529_p5)  ;;  %v6612_v25 = vpack.c.bf16 (%p529_p5), %v5130_v21, %v5129_v19  ;;  %v5132_v44 = vld [vmem:[%s10272_s8 + $0x68] sm:$0xff] (%p529_p5) }
 0x7e3   : >> { %v5094_v30 = vadd.f32 %v5093_v45, %v5092_v9  ;;  %v5105_v32 = vadd.f32 %v5104_v52, %v5072_v34  ;;  %v5040_v58 = vpop.f32.mrb[74].mxu1  ;;  %v5153_v12 = vld [vmem:[%s10272_s8 + $0x110] sm:$0xff] (%p529_p5)  ;;  %v6626_v47 = vpack.c.bf16 (%p529_p5), %v5170_v33, %v5169_v54  ;;  %v5154_v9 = vld [vmem:[%s10272_s8 + $0x118] sm:$0xff] (%p529_p5)  ;;  %v5139_v52 = vld [vmem:[%s10272_s8 + $0xa0] sm:$0xff] (%p529_p5)  ;;  %v6644_v0 = vpack.c.bf16 (%p529_p5), %v5162_v10, %v5161_v24 }
 0x7e4   : >> { %v9958_v5 = vsel %vm9945_vm4, %v5085_v4, %v10379_v14   ;;  %v5075_v62 = vmul.f32 %v5059_v26, %v5040_v58  ;;  %v5042_v63 = vpop.f32.mrb[75].mxu1  ;;  %v6628_v6 = vpack.c.bf16 (%p529_p5), %v5154_v9, %v5153_v12  ;;  %v6598_v1 = vpack.c.bf16 (%p529_p5), %v5140_v23, %v5139_v52  ;;  %v5172_v45 = vld [vmem:[%s10272_s8 + $0x1a8] sm:$0xff] (%p529_p5)  ;;  %v5155_v34 = vld [vmem:[%s10272_s8 + $0x120] sm:$0xff] (%p529_p5)  ;;  %v5149_v12 = vld [vmem:[%s10272_s8 + $0xf0] sm:$0xff] (%p529_p5) }
 0x7e5   : >> { %v10380_v7 = vmov %v9958_v5  ;;  %v5116_v50 = vsel %vm9945_vm4, %v5094_v30, %v10381_v55   ;;  %v5076_v8 = vmul.f32 %v5060_v56, %v5042_v63  ;;  %6627 = vmatprep.subr.bf16.mxu1 (%p529_p5), %v6626_v47  ;;  %v5156_v26 = vld [vmem:[%s10272_s8 + $0x128] sm:$0xff] (%p529_p5)  ;;  %v5141_v56 = vld [vmem:[%s10272_s8 + $0xb0] sm:$0xff] (%p529_p5)  ;;  %v5142_v30 = vld [vmem:[%s10272_s8 + $0xb8] sm:$0xff] (%p529_p5)  ;;  %v6646_v54 = vpack.c.bf16 (%p529_p5), %v5180_v11, %v5179_v49 }
 0x7e6   : >> { %v5097_v59 = vadd.f32 %v5096_v2, %v5075_v62  ;;  %v10387_v4 = vmov %v5116_v50  ;;  %5254 = vmatprep.mubr.f32.mxu0 (%p529_p5), %v5116_v50  ;;  %6629 = vmatpush3.bf16.msra.mxu1 (%p529_p5), %v6628_v6  ;;  %v6632_v58 = vpack.c.bf16 (%p529_p5), %v5156_v26, %v5155_v34  ;;  %v6602_v14 = vpack.c.bf16 (%p529_p5), %v5142_v30, %v5141_v56  ;;  %v5126_v62 = vld [vmem:[%s10272_s8 + $0x38] sm:$0xff] (%p529_p5)  ;;  %v5173_v63 = vld [vmem:[%s10272_s8 + $0x1b0] sm:$0xff] (%p529_p5)  ;;  %v5164_v33 = vld [vmem:[%s10272_s8 + $0x168] sm:$0xff] (%p529_p5) }
 0x7e7   : >> { %v5106_v13 = vadd.f32 %v5105_v32, %v5076_v8  ;;  %v6600_v4 = vpack.c.bf16 (%p529_p5), %v5124_v46, %v5123_v15  ;;  %v5125_v32 = vld [vmem:[%s10272_s8 + $0x30] sm:$0xff] (%p529_p5)  ;;  %v5174_v55 = vld [vmem:[%s10272_s8 + $0x1b8] sm:$0xff] (%p529_p5)  ;;  %v5332_v56 = vld [vmem:[%s10274_s10 + $0x8] sm:$0xff] (%p529_p5) }
 0x7e8   : >> { %v5098_v61 = vrot.slane %v5097_v59, 4  ;;  %v6634_v50 = vpack.c.bf16 (%p529_p5), %v5174_v55, %v5173_v63  ;;  %v5157_v8 = vld [vmem:[%s10272_s8 + $0x130] sm:$0xff] (%p529_p5)  ;;  %v5150_v47 = vld [vmem:[%s10272_s8 + $0xf8] sm:$0xff] (%p529_p5)  ;;  %v5335_v63 = vld [vmem:[%s10274_s10 + $0x20] sm:$0xff] (%p529_p5) }
 0x7e9   : >> { %v5107_v31 = vrot.slane %v5106_v13, 4  ;;  %v5181_v9 = vld [vmem:[%s10272_s8 + $0x1f0] sm:$0xff] (%p529_p5)  ;;  %v5182_v52 = vld [vmem:[%s10272_s8 + $0x1f8] sm:$0xff] (%p529_p5)  ;;  %v5336_v55 = vld [vmem:[%s10274_s10 + $0x28] sm:$0xff] (%p529_p5) }
 0x7ea   : >> { %v5099_v17 = vadd.f32 %v5098_v61, %v5097_v59  ;;  %v5158_v59 = vld [vmem:[%s10272_s8 + $0x138] sm:$0xff] (%p529_p5)  ;;  %v5144_v61 = vld [vmem:[%s10272_s8 + $0xc8] sm:$0xff] (%p529_p5)  ;;  %v5133_v15 = vld [vmem:[%s10272_s8 + $0x70] sm:$0xff] (%p529_p5) }
 0x7eb   : >> { %v5108_v28 = vadd.f32 %v5107_v31, %v5106_v13  ;;  %v5143_v13 = vld [vmem:[%s10272_s8 + $0xc0] sm:$0xff] (%p529_p5)  ;;  %v6604_v31 = vpack.c.bf16 (%p529_p5), %v5126_v62, %v5125_v32  ;;  %v5134_v46 = vld [vmem:[%s10272_s8 + $0x78] sm:$0xff] (%p529_p5)  ;;  %v6918_v32 = vmov (%p529_p5), 0.0|0.0  }
 0x7ec   : >> { %v5100_v48 = vrot.slane %v5099_v17, 2  ;;  %v5166_v34 = vld [vmem:[%s10272_s8 + $0x178] sm:$0xff] (%p529_p5)  ;;  %v6620_v26 = vpack.c.bf16 (%p529_p5), %v5134_v46, %v5133_v15 }
 0x7ed   : >> { %v5109_v40 = vrot.slane %v5108_v28, 2  ;;  %v5428_v49 = vld [vmem:[%s10276_s12 + $0x18] sm:$0xff] (%p529_p5) }
 0x7ee   : >> { %v5101_v43 = vadd.f32 %v5100_v48, %v5099_v17  ;;  %v5175_v17 = vld [vmem:[%s10272_s8 + $0x1c0] sm:$0xff] (%p529_p5)  ;;  %v6636_v48 = vpack.c.bf16 (%p529_p5), %v5158_v59, %v5157_v8 }
 0x7ef   : >> { %v5110_v36 = vadd.f32 %v5109_v40, %v5108_v28  ;;  %v5176_v28 = vld [vmem:[%s10272_s8 + $0x1c8] sm:$0xff] (%p529_p5)  ;;  %v6606_v40 = vpack.c.bf16 (%p529_p5), %v5144_v61, %v5143_v13  ;;  %v5339_v59 = vld [vmem:[%s10274_s10 + $0x40] sm:$0xff] (%p529_p5) }
 0x7f0   : >> { %v5102_v22 = vrot.slane %v5101_v43, 1  ;;  %531 = sbr.rel (!%p529_p5) target bundleno = 26 (0x1a), region = 122  ;;  %v5340_v13 = vld [vmem:[%s10274_s10 + $0x48] sm:$0xff] (%p529_p5) }
 0x7f1   : >> { %v5111_v27 = vrot.slane %v5110_v36, 1  ;;  %v6667_v61 = vpack.c.bf16 (%p529_p5), %v5340_v13, %v5339_v59 }
 0x7f2   : >> { %v5103_v5 = vadd.f32 %v5102_v22, %v5101_v43  ;;  %v5127_v43 = vld [vmem:[%s10272_s8 + $0x40] sm:$0xff] (%p529_p5) }
 0x7f3   : >> { %v5112_v16 = vadd.f32 %v5111_v27, %v5110_v36  ;;  %v5128_v36 = vld [vmem:[%s10272_s8 + $0x48] sm:$0xff] (%p529_p5)  ;;  %v5159_v22 = vld [vmem:[%s10272_s8 + $0x140] sm:$0xff] (%p529_p5)  ;;  %v6638_v27 = vpack.c.bf16 (%p529_p5), %v5176_v28, %v5175_v17  ;;  %v5342_v17 = vld [vmem:[%s10274_s10 + $0x58] sm:$0xff] (%p529_p5) }
 0x7f4   : >> { %v9966_v3 = vsel %vm9945_vm4, %v5103_v5, %v10382_v38   ;;  %v10388_v5 = vmov %v10380_v7  ;;  %v5146_v38 = vld [vmem:[%s10272_s8 + $0xd8] sm:$0xff] (%p529_p5)  ;;  %v6608_v57 = vpack.c.bf16 (%p529_p5), %v5128_v36, %v5127_v43  ;;  %v5345_v36 = vld [vmem:[%s10274_s10 + $0x70] sm:$0xff] (%p529_p5) }
 0x7f5   : >> { %v10383_v51 = vmov %v9966_v3  ;;  %v5118_v60 = vsel %vm9945_vm4, %v5112_v16, %v10384_v37   ;;  %v5160_v5 = vld [vmem:[%s10272_s8 + $0x148] sm:$0xff] (%p529_p5)  ;;  %v5145_v16 = vld [vmem:[%s10272_s8 + $0xd0] sm:$0xff] (%p529_p5) }
 0x7f6   : >> { %v10385_v2 = vmov %v5118_v60  ;;  %v10386_v3 = vmov %v10383_v51  ;;  %5324 = vmatprep.mubr.f32.mxu1 (%p529_p5), %v5118_v60  ;;  %v5177_v37 = vld [vmem:[%s10272_s8 + $0x1d0] sm:$0xff] (%p529_p5)  ;;  %v5178_v60 = vld [vmem:[%s10272_s8 + $0x1d8] sm:$0xff] (%p529_p5)  ;;  %v6640_v18 = vpack.c.bf16 (%p529_p5), %v5160_v5, %v5159_v22  ;;  %v6610_v41 = vpack.c.bf16 (%p529_p5), %v5146_v38, %v5145_v16  ;;  %v5425_v16 = vld [vmem:[%s10276_s12] sm:$0xff] (%p529_p5) }
 0x7f7   : > { %v5121_v3 = vld [vmem:[%s10272_s8 + $0x10] sm:$0xff]  ;;  %v6630_v2 = vpack.c.bf16 %v5172_v45, %v5171_v29  ;;  %v6642_v42 = vpack.c.bf16 %v5178_v60, %v5177_v37  ;;  %v6650_v29 = vpack.c.bf16 %v5182_v52, %v5181_v9  ;;  %v5346_v22 = vld [vmem:[%s10274_s10 + $0x78] sm:$0xff]  ;;  %v6920_v5 = vmov 0.0   ;;  %v5426_v38 = vld [vmem:[%s10276_s12 + $0x8] sm:$0xff] }
 0x7f8   : > { %v6596_v39 = vpack.c.bf16 %v5122_v53, %v5121_v3  ;;  %v6614_v3 = vpack.c.bf16 %v5148_v20, %v5147_v35  ;;  %v5131_v53 = vld [vmem:[%s10272_s8 + $0x60] sm:$0xff]  ;;  %v5165_v45 = vld [vmem:[%s10272_s8 + $0x170] sm:$0xff]  ;;  %v6679_v37 = vpack.c.bf16 %v5426_v38, %v5425_v16 }
 0x7f9   : > { %6631 = vmatprep.subr.bf16.mxu1 %v6630_v2  ;;  %v6616_v23 = vpack.c.bf16 %v5132_v44, %v5131_v53  ;;  %v5331_v2 = vld [vmem:[%s10274_s10] sm:$0xff]  ;;  %v5427_v20 = vld [vmem:[%s10276_s12 + $0x10] sm:$0xff] }
 0x7fa   : > { %6597 = vmatpush3.bf16.msra.mxu0 %v6596_v39  ;;  %6633 = vmatpush3.bf16.msra.mxu1 %v6632_v58  ;;  %v5163_v39 = vld [vmem:[%s10272_s8 + $0x160] sm:$0xff]  ;;  %v6655_v30 = vpack.c.bf16 %v5332_v56, %v5331_v2  ;;  %v5333_v58 = vld [vmem:[%s10274_s10 + $0x10] sm:$0xff]  ;;  %v6682_v11 = vpack.c.bf16 %v5428_v49, %v5427_v20 }
 0x7fb   : > { %6599 = vmatprep.subr.bf16.mxu0 %v6598_v1  ;;  %6635 = vmatprep.subr.bf16.mxu1 %v6634_v50  ;;  %v6648_v6 = vpack.c.bf16 %v5164_v33, %v5163_v39  ;;  %v6618_v1 = vpack.c.bf16 %v5150_v47, %v5149_v12  ;;  %v6661_v50 = vpack.c.bf16 %v5336_v55, %v5335_v63  ;;  %v5511_v39 = vld [vmem:[%s10278_s14] sm:$0xff] }
 0x7fc   : > { %v5728_v52 = vld [vmem:[%s10389_s18] ss:$0 sm:$0xff] }
 0x7fe   : > { %6601 = vmatpush3.bf16.msra.mxu0 %v6600_v4  ;;  %6637 = vmatpush3.bf16.msra.mxu1 %v6636_v48  ;;  %v6652_v4 = vpack.c.bf16 %v5166_v34, %v5165_v45  ;;  %v5343_v48 = vld [vmem:[%s10274_s10 + $0x60] sm:$0xff] }
 0x7ff   : > { %6603 = vmatprep.subr.bf16.mxu0 %v6602_v14  ;;  %6639 = vmatprep.subr.bf16.mxu1 %v6638_v27  ;;  %v5334_v14 = vld [vmem:[%s10274_s10 + $0x18] sm:$0xff]  ;;  %v6676_v27 = vpack.c.bf16 %v5346_v22, %v5345_v36 }
 0x800   : > { %v6658_v62 = vpack.c.bf16 %v5334_v14, %v5333_v58 }
 0x802   : > { %6605 = vmatpush3.bf16.msra.mxu0 %v6604_v31  ;;  %6641 = vmatpush3.bf16.msra.mxu1 %v6640_v18  ;;  %v5341_v31 = vld [vmem:[%s10274_s10 + $0x50] sm:$0xff] }
 0x803   : > { %6607 = vmatprep.subr.bf16.mxu0 %v6606_v40  ;;  %6643 = vmatprep.subr.bf16.mxu1 %v6642_v42  ;;  %v6670_v28 = vpack.c.bf16 %v5342_v17, %v5341_v31  ;;  %v5344_v40 = vld [vmem:[%s10274_s10 + $0x68] sm:$0xff] }
 0x804   : > { %v6673_v43 = vpack.c.bf16 %v5344_v40, %v5343_v48 }
 0x806   : > { %6609 = vmatpush3.bf16.msra.mxu0 %v6608_v57  ;;  %6645 = vmatpush3.bf16.msra.mxu1 %v6644_v0  ;;  %v5724_v57 = vld [vmem:[%s10273_s9] ss:$0 sm:$0xff] }
 0x807   : > { %6611 = vmatprep.subr.bf16.mxu0 %v6610_v41  ;;  %6647 = vmatprep.subr.bf16.mxu1 %v6646_v54  ;;  %v5726_v54 = vld [vmem:[%s10277_s13] ss:$0 sm:$0xff] }
 0x80a   : > { %6613 = vmatpush3.bf16.msra.mxu0 %v6612_v25  ;;  %6649 = vmatpush3.bf16.msra.mxu1 %v6648_v6  ;;  %v5725_v25 = vld [vmem:[%s10275_s11] ss:$0 sm:$0xff] }
 0x80b   : > { %6615 = vmatprep.subr.bf16.mxu0 %v6614_v3  ;;  %6651 = vmatprep.subr.bf16.mxu1 %v6650_v29 }
 0x80e   : > { %6617 = vmatpush3.bf16.msra.mxu0 %v6616_v23  ;;  %6653 = vmatpush3.bf16.msra.mxu1 %v6652_v4 }
 0x80f   : > { %6619 = vmatprep.subr.bf16.mxu0 %v6618_v1  ;;  %6678 = vmatprep.subr.bf16.mxu1 %v6918_v32 }
 0x811   : > { %5325 = vmatmul.mubr.f32.vlgmr.msra.gmra.mrb[0].mxu1 %v10383_v51  ;;  %v5338_v51 = vld [vmem:[%s10274_s10 + $0x38] sm:$0xff] }
 0x812   : > { %6621 = vmatpush3.bf16.msra.mxu0 %v6620_v26  ;;  %6099 = vmatprep.mubr.msk.f32.mxu1 %vm6919_vm5, %v6920_v5 }
 0x813   : > { %6654 = vmatprep.subr.bf16.mxu0 %v6918_v32  ;;  %6680 = vmatpush3.bf16.msra.mxu1 %v6679_v37 }
 0x814   : > { %6681 = vmatprep.subr.bf16.mxu1 %v6918_v32 }
 0x815   : > { %5255 = vmatmul.mubr.f32.vlgmr.msra.gmra.mrb[0].mxu0 %v10380_v7  ;;  %v5337_v7 = vld [vmem:[%s10274_s10 + $0x30] sm:$0xff] }
 0x816   : > { %6656 = vmatpush3.bf16.msra.mxu0 %v6655_v30  ;;  %v6664_v8 = vpack.c.bf16 %v5338_v51, %v5337_v7  ;;  %6088 = vmatprep.mubr.msk.f32.mxu0 %vm6919_vm5, %v6920_v5 }
 0x817   : > { %6657 = vmatprep.subr.bf16.mxu0 %v6918_v32  ;;  %6683 = vmatpush3.bf16.msra.mxu1 %v6682_v11 }
 0x818   : > { %6102 = vmatprep.subr.mxu1 %v6920_v5 }
 0x81a   : > { %6659 = vmatpush3.bf16.msra.mxu0 %v6658_v62 }
 0x81b   : > { %6660 = vmatprep.subr.bf16.mxu0 %v6918_v32 }
 0x81e   : > { %6662 = vmatpush3.bf16.msra.mxu0 %v6661_v50 }
 0x81f   : > { %6663 = vmatprep.subr.bf16.mxu0 %v6918_v32 }
 0x822   : > { %6665 = vmatpush3.bf16.msra.mxu0 %v6664_v8 }
 0x823   : > { %6666 = vmatprep.subr.bf16.mxu0 %v6918_v32 }
 0x826   : > { %6668 = vmatpush3.bf16.msra.mxu0 %v6667_v61 }
 0x827   : > { %6669 = vmatprep.subr.bf16.mxu0 %v6918_v32 }
 0x82a   : > { %6671 = vmatpush3.bf16.msra.mxu0 %v6670_v28 }
 0x82b   : > { %6672 = vmatprep.subr.bf16.mxu0 %v6918_v32 }
 0x82e   : > { %6674 = vmatpush3.bf16.msra.mxu0 %v6673_v43 }
 0x82f   : > { %6675 = vmatprep.subr.bf16.mxu0 %v6918_v32 }
 0x832   : > { %6677 = vmatpush3.bf16.msra.mxu0 %v6676_v27 }
 0x8e4   : > { %v5994_v41 = vpop.f32.mrb[0].mxu1 }
 0x8e5   : > { %v5995_v21 = vpop.f32.mrb[1].mxu1 }
 0x8e6   : > { %v5996_v24 = vadd.f32 %v5995_v21, %v5994_v41 }
 0x8e8   : > { %v5959_v60 = vpop.f32.mrb[0].mxu0 }
 0x8e9   : > { %v5960_v18 = vpop.f32.mrb[1].mxu0 }
 0x8ea   : > { %v5961_v19 = vadd.f32 %v5960_v18, %v5959_v60 }
 0x8ec   : > { %v5257_v42 = vadd.f32 %v5961_v19, %v5724_v57 }
 0x8ee   : > { %v5327_v10 = vadd.f32 %v5996_v24, %v5257_v42 }
 0x8f0   : > { %v5330_v35 = vmax.f32 %v5327_v10, 0.0 }
 0x8f2   : > { %6089 = vmatmul.mubr.f32.vlgmr.msra.gmra.mrb[2].mxu0 %v5330_v35 }
 0x9c5   : > { %v5420_v0 = vpop.f32.mrb[2].mxu0 }
 0x9c6   : > { %v5421_v3 = vadd.f32 %v5725_v25, %v5420_v0  ;;  %v6090_v53 = vpop.f32.mrb[3].mxu0 }
 0x9c8   : > { %v5424_v44 = vmax.f32 %v5421_v3, 0.0 }
 0x9ca   : > { %6100 = vmatmul.mubr.msk.f32.vlgmr.msra.gmra.mrb[2].mxu1 %vm1349_vm11, %v5424_v44 }
 0x9cb   : > { %6104 = vmatprep.mubr.msk.f32.mxu1 %vm6919_vm5, %v6920_v5  ;;  %6103 = vmatpush3.msra.mxu1 %v5511_v39 }
 0xa9d   : > { %v5506_v33 = vpop.f32.mrb[2].mxu1 }
 0xa9e   : > { %v5507_v12 = vadd.f32 %v5726_v54, %v5506_v33  ;;  %v6101_v47 = vpop.f32.mrb[3].mxu1 }
 0xaa0   : > { %v5510_v9 = vmax.f32 %v5507_v12, 0.0 }
 0xaa2   : > { %6105 = vmatmul.mubr.msk.f32.vlgmr.msra.gmra.mrb[4].mxu1 %vm5519_vm6, %v5510_v9 }
 0xb75   : > { %v5589_v23 = vpop.f32.mrb[4].mxu1 }
 0xb76   : > { %v5590_v6 = vadd.f32 %v5728_v52, %v5589_v23  ;;  %v6106_v1 = vpop.f32.mrb[5].mxu1 }
 0xb78   : > { %v5594_v15 = vsel %vm5593_vm7, %v5590_v6, -inf }
 0xb79   : > { %5595 = vmax.xlane.f32.xlu0 %v5594_v15 }
 0xc06   : > { %v5596_v46 = vpop.xlane.xlu0 %5595 }
 0xc07   : > { %v5597_v29 = vsub.f32 %v5590_v6, %v5596_v46 }
 0xc09   : > { %v5598_v45 = vmul.f32 1.442695, %v5597_v29 }
 0xc0b   : > { %6848 = vpow2.f32 %v5598_v45 }
 0xc15   : > { %v6849_v34 = vpop.eup %6848 }
 0xc16   : > { %v5600_v26 = vsel %vm5593_vm7, %v6849_v34, 0.0 }
 0xc17   : > { %5601 = vadd.xlane.f32.xlu0 %v5600_v26 }
 0xca4   : > { %v5602_v4 = vpop.xlane.xlu0 %5601 }
 0xca5   : > { %6850 = vrcp.f32 %v5602_v4 }
 0xcaf   : > { %v6851_v2 = vpop.eup %6850 }
 0xcb0   : > { %v5604_v56 = vmul.f32 %v6851_v2, %v6849_v34 }
 0xcb2   : > { %5605 = vst.msk [vmem:[%s10390_s29] sm:$0xff] %vm5593_vm7, %v5604_v56 }
 0xcb3 PF: > { %s10391_s22 = sld [smem:[#allocation4_spill]] }
 0xcb9   : > { %s26_s21 = sadd.s32 1, %s10391_s22  }
 0xcba   : > { %p23_p6 = scmp.ge.s32.totalorder %s26_s21, 4  }
 0xcbc   :  { %25 = sbr.rel (!%p23_p6) target bundleno = 4 (0x4), region = 133 }

</bundles_post_ra>
